<compile_context>
chip_gen: v7x
topology: tpu7x:2x2x1
jax: 0.10.0
libtpu: 0.0.40
codegen_flags: <defaults>
</compile_context>

<pallas_src>
import math
import functools

import numpy as np
import jax
import jax.numpy as jnp
from jax.experimental import pallas as pl
from jax.experimental.pallas import tpu as pltpu

NORM_EPS = 1e-6
NEG_INF = -1e30  # finite stand-in for -inf (exp underflows to 0; bf16-representable)


# ----------------------------------------------------------------------------- helpers
def _round_up(x, m):
    return (x + m - 1) // m * m


def _layernorm(x, eps=NORM_EPS):
    # LayerNorm with elementwise_affine=False (ln_wo_grad in VAR), f32 stats
    mu = jnp.mean(x, axis=-1, keepdims=True)
    var = jnp.mean(jnp.square(x - mu), axis=-1, keepdims=True)
    return (x - mu) * jax.lax.rsqrt(var + eps)


# ----------------------------------------------------------------------------- fused embed + AdaLN block stack
def _fused_blocks_kernel(
    feat_ref, cond_ref, bias_ref, lvlpos_ref, tokmask_ref, sosmask_ref,
    we_w_ref, we_b_ref,
    ada_w_ref, ada_b_ref, wqkv_ref, bqkv_ref, wproj_ref, bproj_ref,
    w1_ref, b1_ref, w2_ref, b2_ref,
    out_ref, x_sc,
    *, num_heads, head_dim, half_len,
):
    C = num_heads * head_dim
    d = pl.program_id(1)
    bf16 = jnp.bfloat16

    # ---- d == 0: fused prepare_to_var (word_embed + lvl_pos + sos + concat + pad) ----
    @pl.when(d == 0)
    def _():
        emb = jnp.dot(feat_ref[0].astype(bf16), we_w_ref[...],
                      preferred_element_type=jnp.float32) + we_b_ref[0]
        x0 = (emb * tokmask_ref[...]                    # image tokens + depth tokens
              + cond_ref[0] * sosmask_ref[...]          # sos rows (class embedding)
              + lvlpos_ref[...])                        # lvl_embed + pos_1LC (0 on pad rows)
        x_sc[...] = x0

    x = x_sc[...]                                       # (Spad, C) f32 residual stream
    cond = cond_ref[0]                                  # (1, C)

    # ada_lin = SiLU -> Linear(C, 6C); unbind: gamma1, gamma2, scale1, scale2, shift1, shift2
    ada = jnp.dot(jax.nn.silu(cond).astype(bf16), ada_w_ref[0],
                  preferred_element_type=jnp.float32) + ada_b_ref[0]
    gamma1 = ada[:, 0 * C:1 * C]
    gamma2 = ada[:, 1 * C:2 * C]
    scale1 = ada[:, 2 * C:3 * C]
    scale2 = ada[:, 3 * C:4 * C]
    shift1 = ada[:, 4 * C:5 * C]
    shift2 = ada[:, 5 * C:6 * C]

    # ---------- attention branch ----------
    h = (_layernorm(x) * (scale1 + 1.0) + shift1).astype(bf16)
    qkv = jnp.dot(h, wqkv_ref[0], preferred_element_type=jnp.float32) + bqkv_ref[0]
    sm_scale = 1.0 / math.sqrt(head_dim)
    q = qkv[:, 0 * C:1 * C] * sm_scale                  # fold scale into q (S*C mults)
    k = qkv[:, 1 * C:2 * C]
    v = qkv[:, 2 * C:3 * C]

    H, hd = num_heads, head_dim
    # (H, S, hd) head-major layout -> two batched MXU matmuls instead of a per-head loop
    qh = jnp.stack([q[:, i * hd:(i + 1) * hd] for i in range(H)], axis=0).astype(bf16)
    kh = jnp.stack([k[:, i * hd:(i + 1) * hd] for i in range(H)], axis=0).astype(bf16)
    vh = jnp.stack([v[:, i * hd:(i + 1) * hd] for i in range(H)], axis=0).astype(bf16)

    s = jnp.einsum('hqd,hkd->hqk', qh, kh, preferred_element_type=jnp.float32)
    s = s + bias_ref[...].astype(jnp.float32)[None, :, :]
    m = jnp.max(s, axis=-1, keepdims=True)
    p = jnp.exp(s - m)
    p = p * pl.reciprocal(jnp.sum(p, axis=-1, keepdims=True), approx=True)
    o = jnp.einsum('hqk,hkd->hqd', p.astype(bf16), vh,
                   preferred_element_type=jnp.float32)  # (H, S, hd)
    attn = jnp.concatenate([o[i] for i in range(H)], axis=-1)  # (S, C)
    attn = jnp.dot(attn.astype(bf16), wproj_ref[0],
                   preferred_element_type=jnp.float32) + bproj_ref[0]
    # TODO(synk): drop_path is stochastic during training; treated as identity here.
    x = x + attn * gamma1

    # ---------- FFN branch ----------
    h2 = (_layernorm(x) * (scale2 + 1.0) + shift2).astype(bf16)
    ff = jnp.dot(h2, w1_ref[0], preferred_element_type=jnp.float32) + b1_ref[0]
    ff = jax.nn.gelu(ff, approximate=True).astype(bf16)  # nn.GELU(approximate='tanh')
    ff = jnp.dot(ff, w2_ref[0], preferred_element_type=jnp.float32) + b2_ref[0]
    x = x + ff * gamma2

    x_sc[...] = x

    # ---- last layer: emit only the depth-token half (rows Lp .. 2*Lp-1) ----
    @pl.when(d == pl.num_programs(1) - 1)
    def _():
        out_ref[0] = x[half_len:, :]


def fused_blocks(feat_pad, cond_BD, pk, *, num_heads):
    B, Spad, Cvae = feat_pad.shape
    C = pk["C"]
    Lp = pk["Lp"]
    depth = pk["ada_w"].shape[0]
    Ch = pk["w1"].shape[-1]
    head_dim = C // num_heads

    perb3 = lambda b, d: (b, 0, 0)   # per-batch, constant over depth (re-fetch skipped)
    perd3 = lambda b, d: (d, 0, 0)   # per-layer stacked weights
    const = lambda b, d: (0, 0)

    kernel = functools.partial(_fused_blocks_kernel, num_heads=num_heads,
                               head_dim=head_dim, half_len=Lp)
    # NOTE(real scale / v7x 64 MiB VMEM): at C>=1024 the per-layer weight set should
    # additionally be tiled over its N/K dims (extra grid axes); toy sizes fit easily.
    return pl.pallas_call(
        kernel,
        out_shape=jax.ShapeDtypeStruct((B, Lp, C), jnp.float32),
        grid=(B, depth),
        in_specs=[
            pl.BlockSpec((1, Spad, Cvae), perb3),          # padded Cvae token features
            pl.BlockSpec((1, 1, C), perb3),                # cond_BD / sos
            pl.BlockSpec((Spad, Spad), const),             # attention bias (bf16)
            pl.BlockSpec((Spad, C), const),                # lvl_pos (padded)
            pl.BlockSpec((Spad, 1), const),                # token mask
            pl.BlockSpec((Spad, 1), const),                # sos mask
            pl.BlockSpec((Cvae, C), const),                # word_embed W (bf16)
            pl.BlockSpec((1, C), const),                   # word_embed b
            pl.BlockSpec((1, C, 6 * C), perd3),            # ada_lin W (bf16)
            pl.BlockSpec((1, 1, 6 * C), perd3),
            pl.BlockSpec((1, C, 3 * C), perd3),            # qkv W (bf16)
            pl.BlockSpec((1, 1, 3 * C), perd3),
            pl.BlockSpec((1, C, C), perd3),                # proj W (bf16)
            pl.BlockSpec((1, 1, C), perd3),
            pl.BlockSpec((1, C, Ch), perd3),               # ffn W1 (bf16)
            pl.BlockSpec((1, 1, Ch), perd3),
            pl.BlockSpec((1, Ch, C), perd3),               # ffn W2 (bf16)
            pl.BlockSpec((1, 1, C), perd3),
        ],
        out_specs=pl.BlockSpec((1, Lp, C), perb3),
        scratch_shapes=[pltpu.VMEM((Spad, C), jnp.float32)],
        compiler_params=pltpu.CompilerParams(
            dimension_semantics=("parallel", "arbitrary")),
    )(
        feat_pad, cond_BD, pk["attn_bias"], pk["lvl_pos_pad"],
        pk["tokmask"], pk["sosmask"], pk["we_w"], pk["we_b"],
        pk["ada_w"], pk["ada_b"], pk["wqkv"], pk["bqkv"], pk["wproj"], pk["bproj"],
        pk["w1"], pk["b1"], pk["w2"], pk["b2"],
    )


# ----------------------------------------------------------------------------- head (AdaLNBeforeHead + Linear), vocab-tiled
def _head_kernel(x_ref, cond_ref, ada_w_ref, ada_b_ref, wh_ref, bh_ref, out_ref):
    bf16 = jnp.bfloat16
    x = x_ref[0]                    # (Lp, C) f32
    cond = cond_ref[0]              # (1, C)
    C = x.shape[-1]
    ada = jnp.dot(jax.nn.silu(cond).astype(bf16), ada_w_ref[...],
                  preferred_element_type=jnp.float32) + ada_b_ref[0]   # (1, 2C): scale, shift
    scale = ada[:, :C]
    shift = ada[:, C:]
    h = (_layernorm(x) * (scale + 1.0) + shift).astype(bf16)
    out_ref[0] = jnp.dot(h, wh_ref[...], preferred_element_type=jnp.float32) + bh_ref[0]


def head_logits(x, cond_BD, pk):
    B, Lp, C = x.shape
    V = pk["head_w"].shape[-1]
    tile_v = V if V <= 512 else 512
    assert V % tile_v == 0
    nV = V // tile_v
    return pl.pallas_call(
        _head_kernel,
        out_shape=jax.ShapeDtypeStruct((B, Lp, V), jnp.float32),
        grid=(B, nV),
        in_specs=[
            pl.BlockSpec((1, Lp, C), lambda b, j: (b, 0, 0)),
            pl.BlockSpec((1, 1, C), lambda b, j: (b, 0, 0)),
            pl.BlockSpec((C, 2 * C), lambda b, j: (0, 0)),
            pl.BlockSpec((1, 2 * C), lambda b, j: (0, 0)),
            pl.BlockSpec((C, tile_v), lambda b, j: (0, j)),
            pl.BlockSpec((1, tile_v), lambda b, j: (0, j)),
        ],
        out_specs=pl.BlockSpec((1, Lp, tile_v), lambda b, j: (b, 0, j)),
        compiler_params=pltpu.CompilerParams(
            dimension_semantics=("parallel", "parallel")),
    )(x, cond_BD, pk["head_ada_w"], pk["head_ada_b"], pk["head_w"], pk["head_b"])


# ----------------------------------------------------------------------------- bias / packing / params
def build_attn_bias_padded(patch_nums, Lp):
    # Reproduces DepthVAR.__init__'s attn_bias_for_masking (2L x 2L), then embeds it
    # into a (2*Lp, 2*Lp) padded grid; padded key columns are masked with NEG_INF.
    lvl = np.concatenate([np.full((pn * pn,), i, np.int32) for i, pn in enumerate(patch_nums)])
    L = lvl.shape[0]
    d, dT = lvl[:, None], lvl[None, :]
    base = np.where(d >= dT, 0.0, NEG_INF).astype(np.float32)                 # (L, L)
    top = np.concatenate([np.zeros((L, L), np.float32),
                          np.full((L, L), NEG_INF, np.float32)], axis=1)
    top[:, L] = 0.0                                                           # image tokens see first depth token
    bot = np.concatenate([np.zeros((L, L), np.float32), base], axis=1)
    bias = np.concatenate([top, bot], axis=0)                                 # (2L, 2L)

    Spad = 2 * Lp
    valid = np.zeros((Spad,), bool)
    valid[:L] = True
    valid[Lp:Lp + L] = True
    vpos = np.where(valid)[0]
    bias_pad = np.full((Spad, Spad), NEG_INF, np.float32)
    bias_pad[np.ix_(vpos, vpos)] = bias
    # padded query rows: attend only to valid tokens (keeps their softmax finite;
    # their outputs never reach valid rows and are discarded at the end)
    bias_pad[~valid] = np.where(valid[None, :], 0.0, NEG_INF)
    return bias_pad, lvl


def init_params(key, *, C, Cvae, V, num_classes, num_levels, L, depth, num_heads, mlp_ratio=4):
    init_std = math.sqrt(1.0 / C / 3.0)
    keys = iter(jax.random.split(key, 16 + 12 * depth))

    def nrm(shape, std=0.02):
        return jax.random.normal(next(keys), shape, jnp.float32) * std

    params = {
        "class_emb": nrm((num_classes + 1, C), init_std),
        "pos_1LC": nrm((1, L, C), init_std),
        "lvl_embed": nrm((num_levels, C), init_std),
        "we_w": nrm((Cvae, C)),
        "we_b": jnp.zeros((1, C), jnp.float32),
        "head_nm": {
            "ada_w2": nrm((C, 2 * C)),
            "ada_b2": jnp.zeros((1, 2 * C), jnp.float32),
            "wh": nrm((C, V)),
            "bh": jnp.zeros((1, V), jnp.float32),
        },
        "blocks": [],
    }
    Ch = mlp_ratio * C
    for _ in range(depth):
        params["blocks"].append({
            "ada_w": nrm((C, 6 * C)),
            "ada_b": jnp.zeros((1, 6 * C), jnp.float32),
            "wqkv": nrm((C, 3 * C)),
            "bqkv": jnp.zeros((1, 3 * C), jnp.float32),
            "wproj": nrm((C, C)),
            "bproj": jnp.zeros((1, C), jnp.float32),
            "w1": nrm((C, Ch)),
            "b1": jnp.zeros((1, Ch), jnp.float32),
            "w2": nrm((Ch, C)),
            "b2": jnp.zeros((1, C), jnp.float32),
        })
    return params


def pack_model(params, patch_nums):
    """Stack per-layer weights along a depth axis, cast MXU weights to bf16, and
    precompute the padded attention bias / lvl_pos / token masks."""
    L = sum(pn * pn for pn in patch_nums)
    first_l = patch_nums[0] ** 2
    Lp = _round_up(L, 8)
    Spad = 2 * Lp
    C = params["pos_1LC"].shape[-1]
    bf16 = jnp.bfloat16

    bias_pad, lvl = build_attn_bias_padded(patch_nums, Lp)

    lvl_pos = params["lvl_embed"][jnp.asarray(lvl)] + params["pos_1LC"][0]    # (L, C)
    lvl_pos_pad = jnp.zeros((Spad, C), jnp.float32)
    lvl_pos_pad = lvl_pos_pad.at[:L].set(lvl_pos).at[Lp:Lp + L].set(lvl_pos)

    tokmask = np.zeros((Spad, 1), np.float32)
    tokmask[:L] = 1.0
    tokmask[Lp + first_l:Lp + L] = 1.0
    sosmask = np.zeros((Spad, 1), np.float32)
    sosmask[Lp:Lp + first_l] = 1.0

    blocks = params["blocks"]
    stk = lambda name, dt: jnp.stack([blk[name] for blk in blocks], axis=0).astype(dt)

    return dict(
        L=L, first_l=first_l, Lp=Lp, Spad=Spad, C=C,
        class_emb=params["class_emb"],
        attn_bias=jnp.asarray(bias_pad).astype(bf16),     # bf16 bias (expanded to f32 in-kernel)
        lvl_pos_pad=lvl_pos_pad,
        tokmask=jnp.asarray(tokmask), sosmask=jnp.asarray(sosmask),
        we_w=params["we_w"].astype(bf16), we_b=params["we_b"],
        ada_w=stk("ada_w", bf16), ada_b=stk("ada_b", jnp.float32),
        wqkv=stk("wqkv", bf16), bqkv=stk("bqkv", jnp.float32),
        wproj=stk("wproj", bf16), bproj=stk("bproj", jnp.float32),
        w1=stk("w1", bf16), b1=stk("b1", jnp.float32),
        w2=stk("w2", bf16), b2=stk("b2", jnp.float32),
        head_ada_w=params["head_nm"]["ada_w2"].astype(bf16),
        head_ada_b=params["head_nm"]["ada_b2"],
        head_w=params["head_nm"]["wh"].astype(bf16),
        head_b=params["head_nm"]["bh"],
    )


# ----------------------------------------------------------------------------- forward_train glue
def forward_train(packed, image_feat, depth_feat, *, num_classes, num_heads):
    B, _, Cvae = image_feat.shape
    L, first_l, Lp, Spad, C = (packed["L"], packed["first_l"], packed["Lp"],
                               packed["Spad"], packed["C"])

    # sos = cond_BD = class_emb(label_B), label_B == num_classes  -> (B, 1, C)
    cond_BD = jnp.broadcast_to(packed["class_emb"][num_classes][None, None, :], (B, 1, C))
    # shared_aln=False -> shared_ada_lin is Identity

    # Padded Cvae-dim token features:
    # [ image tokens (L) | pad | sos placeholder (first_l) | depth tokens (L-first_l) | pad ]
    feat_pad = jnp.zeros((B, Spad, Cvae), image_feat.dtype)
    feat_pad = feat_pad.at[:, :L].set(image_feat)
    feat_pad = feat_pad.at[:, Lp + first_l:Lp + L].set(depth_feat)

    x_depth = fused_blocks(feat_pad, cond_BD, packed, num_heads=num_heads)   # (B, Lp, C)
    logits = head_logits(x_depth, cond_BD, packed)                           # (B, Lp, V)
    return logits[:, :L]                                                     # drop pad rows


# ----------------------------------------------------------------------------- main
if __name__ == "__main__":
    # small, forward-consistent shapes
    B = 2
    patch_nums = (1, 2, 3)
    L = sum(pn * pn for pn in patch_nums)   # 14
    first_l = patch_nums[0] ** 2            # 1
    C = 128                                 # embed_dim
    num_heads = 4
    Cvae = 16
    V = 256                                 # vocab_size
    depth = 2
    num_classes = 10

    key = jax.random.PRNGKey(0)
    k_param, k_img, k_tgt, k_if, k_df = jax.random.split(key, 5)

    params = init_params(
        k_param, C=C, Cvae=Cvae, V=V, num_classes=num_classes,
        num_levels=len(patch_nums), L=L, depth=depth, num_heads=num_heads,
    )
    packed = pack_model(params, patch_nums)

    # nominal batch inputs (as the PyTorch module receives them)
    image = jax.random.uniform(k_img, (B, 3, 16, 16), jnp.float32)           # NCHW
    target = jax.random.uniform(k_tgt, (B, 1, 16, 16), jnp.float32) * 2 - 1  # NCHW depth
    depth_norm = jnp.clip(target, -1.0, 1.0)  # TODO(synk): external `normalizer` not available; identity+clip used.

    # TODO(synk): VQVAE encode / img_to_idxBl / idxBl_to_var_input / decode have no clean Pallas
    # equivalent here; deterministic synthetic Cvae-dim multiscale token features stand in for them.
    image_feat = jax.random.normal(k_if, (B, L, Cvae), jnp.float32)            # interpolated f_hat tokens
    depth_feat = jax.random.normal(k_df, (B, L - first_l, Cvae), jnp.float32)  # idxBl_to_var_input tokens

    preds = forward_train(
        packed, image_feat, depth_feat,
        num_classes=num_classes, num_heads=num_heads,
    )
    preds = jax.block_until_ready(preds)
    assert preds.shape == (B, L, V) and preds.dtype == jnp.float32
    assert bool(jnp.all(jnp.isfinite(preds)))
    print("KERNEL_OK")
</pallas_src>

<mosaic_0001>
module attributes {stable_mosaic.version = 11 : i64} {
  func.func @_fused_blocks_kernel(%arg0: i32, %arg1: i32, %arg2: memref<1x32x16xf32, #tpu.memory_space<vmem>>, %arg3: memref<1x1x128xf32, #tpu.memory_space<vmem>>, %arg4: memref<32x32xbf16, #tpu.memory_space<vmem>>, %arg5: memref<32x128xf32, #tpu.memory_space<vmem>>, %arg6: memref<32x1xf32, #tpu.memory_space<vmem>>, %arg7: memref<32x1xf32, #tpu.memory_space<vmem>>, %arg8: memref<16x128xbf16, #tpu.memory_space<vmem>>, %arg9: memref<1x128xf32, #tpu.memory_space<vmem>>, %arg10: memref<1x128x768xbf16, #tpu.memory_space<vmem>>, %arg11: memref<1x1x768xf32, #tpu.memory_space<vmem>>, %arg12: memref<1x128x384xbf16, #tpu.memory_space<vmem>>, %arg13: memref<1x1x384xf32, #tpu.memory_space<vmem>>, %arg14: memref<1x128x128xbf16, #tpu.memory_space<vmem>>, %arg15: memref<1x1x128xf32, #tpu.memory_space<vmem>>, %arg16: memref<1x128x512xbf16, #tpu.memory_space<vmem>>, %arg17: memref<1x1x512xf32, #tpu.memory_space<vmem>>, %arg18: memref<1x512x128xbf16, #tpu.memory_space<vmem>>, %arg19: memref<1x1x128xf32, #tpu.memory_space<vmem>>, %arg20: memref<1x16x128xf32, #tpu.memory_space<vmem>>, %arg21: memref<32x128xf32, #tpu.memory_space<vmem>>) attributes {dimension_semantics = [#tpu.dimension_semantics<parallel>, #tpu.dimension_semantics<arbitrary>], iteration_bounds = array<i64: 2, 2>, scalar_prefetch = 0 : i64, scratch_operands = 1 : i64, tpu.core_type = #tpu.core_type<tc>, window_params = [{transform_indices = @transform_0, window_bounds = array<i64: 1, 32, 16>}, {transform_indices = @transform_1, window_bounds = array<i64: 1, 1, 128>}, {pipeline_mode = #tpu.pipeline_mode<synchronous>, transform_indices = @transform_2, window_bounds = array<i64: 32, 32>}, {pipeline_mode = #tpu.pipeline_mode<synchronous>, transform_indices = @transform_3, window_bounds = array<i64: 32, 128>}, {pipeline_mode = #tpu.pipeline_mode<synchronous>, transform_indices = @transform_4, window_bounds = array<i64: 32, 1>}, {pipeline_mode = #tpu.pipeline_mode<synchronous>, transform_indices = @transform_5, window_bounds = array<i64: 32, 1>}, {pipeline_mode = #tpu.pipeline_mode<synchronous>, transform_indices = @transform_6, window_bounds = array<i64: 16, 128>}, {pipeline_mode = #tpu.pipeline_mode<synchronous>, transform_indices = @transform_7, window_bounds = array<i64: 1, 128>}, {transform_indices = @transform_8, window_bounds = array<i64: 1, 128, 768>}, {transform_indices = @transform_9, window_bounds = array<i64: 1, 1, 768>}, {transform_indices = @transform_10, window_bounds = array<i64: 1, 128, 384>}, {transform_indices = @transform_11, window_bounds = array<i64: 1, 1, 384>}, {transform_indices = @transform_12, window_bounds = array<i64: 1, 128, 128>}, {transform_indices = @transform_13, window_bounds = array<i64: 1, 1, 128>}, {transform_indices = @transform_14, window_bounds = array<i64: 1, 128, 512>}, {transform_indices = @transform_15, window_bounds = array<i64: 1, 1, 512>}, {transform_indices = @transform_16, window_bounds = array<i64: 1, 512, 128>}, {transform_indices = @transform_17, window_bounds = array<i64: 1, 1, 128>}, {transform_indices = @transform_18, window_bounds = array<i64: 1, 16, 128>}]} {
    %c0_i32 = arith.constant 0 : i32
    %0 = arith.cmpi eq, %arg1, %c0_i32 : i32
    %1 = arith.extui %0 : i1 to i32
    %c0_i32_0 = arith.constant 0 : i32
    %2 = arith.cmpi ne, %1, %c0_i32_0 : i32
    scf.if %2 {
      %c0_66 = arith.constant 0 : index
      %c0_67 = arith.constant 0 : index
      %c0_68 = arith.constant 0 : index
      %190 = vector.load %arg2[%c0_66, %c0_67, %c0_68] : memref<1x32x16xf32, #tpu.memory_space<vmem>>, vector<1x32x16xf32>
      %191 = vector.shape_cast %190 : vector<1x32x16xf32> to vector<32x16xf32>
      %192 = arith.truncf %191 : vector<32x16xf32> to vector<32x16xbf16>
      %c0_69 = arith.constant 0 : index
      %c0_70 = arith.constant 0 : index
      %193 = vector.load %arg8[%c0_69, %c0_70] : memref<16x128xbf16, #tpu.memory_space<vmem>>, vector<16x128xbf16>
      %cst_71 = arith.constant dense<0.000000e+00> : vector<32x128xf32>
      %194 = tpu.matmul %192, %193, %cst_71 {dimension_numbers = #tpu.dot_dimension_numbers<[1], [0], [0], [1], [0, 0, 1, 1], [], []>} : vector<32x16xbf16>, vector<16x128xbf16>, vector<32x128xf32> -> vector<32x128xf32>
      %c0_72 = arith.constant 0 : index
      %c0_73 = arith.constant 0 : index
      %195 = vector.load %arg9[%c0_72, %c0_73] : memref<1x128xf32, #tpu.memory_space<vmem>>, vector<1x128xf32>
      %196 = vector.shape_cast %195 : vector<1x128xf32> to vector<128xf32>
      %197 = vector.shape_cast %196 : vector<128xf32> to vector<1x128xf32>
      %198 = vector.broadcast %197 : vector<1x128xf32> to vector<32x128xf32>
      %199 = arith.addf %194, %198 : vector<32x128xf32>
      %c0_74 = arith.constant 0 : index
      %c0_75 = arith.constant 0 : index
      %200 = vector.load %arg6[%c0_74, %c0_75] : memref<32x1xf32, #tpu.memory_space<vmem>>, vector<32x1xf32>
      %201 = vector.broadcast %200 : vector<32x1xf32> to vector<32x128xf32>
      %202 = arith.mulf %199, %201 : vector<32x128xf32>
      %c0_76 = arith.constant 0 : index
      %c0_77 = arith.constant 0 : index
      %c0_78 = arith.constant 0 : index
      %203 = vector.load %arg3[%c0_76, %c0_77, %c0_78] : memref<1x1x128xf32, #tpu.memory_space<vmem>>, vector<1x1x128xf32>
      %204 = vector.shape_cast %203 : vector<1x1x128xf32> to vector<1x128xf32>
      %c0_79 = arith.constant 0 : index
      %c0_80 = arith.constant 0 : index
      %205 = vector.load %arg7[%c0_79, %c0_80] : memref<32x1xf32, #tpu.memory_space<vmem>>, vector<32x1xf32>
      %206 = vector.broadcast %204 : vector<1x128xf32> to vector<32x128xf32>
      %207 = vector.broadcast %205 : vector<32x1xf32> to vector<32x128xf32>
      %208 = arith.mulf %206, %207 : vector<32x128xf32>
      %209 = arith.addf %202, %208 : vector<32x128xf32>
      %c0_81 = arith.constant 0 : index
      %c0_82 = arith.constant 0 : index
      %210 = vector.load %arg5[%c0_81, %c0_82] : memref<32x128xf32, #tpu.memory_space<vmem>>, vector<32x128xf32>
      %211 = arith.addf %209, %210 : vector<32x128xf32>
      %c0_83 = arith.constant 0 : index
      %c0_84 = arith.constant 0 : index
      %212 = vector.load %arg21[%c0_83, %c0_84] : memref<32x128xf32, #tpu.memory_space<vmem>>, vector<32x128xf32>
      tpu.vector_store %arg21[%c0_83, %c0_84], %211 {strides = array<i32>} : memref<32x128xf32, #tpu.memory_space<vmem>>, vector<32x128xf32>,
    } else {
    }
    %c0 = arith.constant 0 : index
    %c0_1 = arith.constant 0 : index
    %3 = vector.load %arg21[%c0, %c0_1] : memref<32x128xf32, #tpu.memory_space<vmem>>, vector<32x128xf32>
    %c0_2 = arith.constant 0 : index
    %c0_3 = arith.constant 0 : index
    %c0_4 = arith.constant 0 : index
    %4 = vector.load %arg3[%c0_2, %c0_3, %c0_4] : memref<1x1x128xf32, #tpu.memory_space<vmem>>, vector<1x1x128xf32>
    %5 = vector.shape_cast %4 : vector<1x1x128xf32> to vector<1x128xf32>
    %6 = arith.negf %5 : vector<1x128xf32>
    %7 = math.exp %6 : vector<1x128xf32>
    %cst = arith.constant 1.000000e+00 : f32
    %8 = vector.broadcast %cst : f32 to vector<1x128xf32>
    %9 = arith.addf %8, %7 : vector<1x128xf32>
    %10 = arith.divf %8, %9 : vector<1x128xf32>
    %11 = arith.mulf %5, %10 : vector<1x128xf32>
    %12 = arith.truncf %11 : vector<1x128xf32> to vector<1x128xbf16>
    %c0_5 = arith.constant 0 : index
    %c0_6 = arith.constant 0 : index
    %c0_7 = arith.constant 0 : index
    %13 = vector.load %arg10[%c0_5, %c0_6, %c0_7] : memref<1x128x768xbf16, #tpu.memory_space<vmem>>, vector<1x128x768xbf16>
    %14 = vector.shape_cast %13 : vector<1x128x768xbf16> to vector<128x768xbf16>
    %cst_8 = arith.constant dense<0.000000e+00> : vector<1x768xf32>
    %15 = tpu.matmul %12, %14, %cst_8 {dimension_numbers = #tpu.dot_dimension_numbers<[1], [0], [0], [1], [0, 0, 1, 1], [], []>} : vector<1x128xbf16>, vector<128x768xbf16>, vector<1x768xf32> -> vector<1x768xf32>
    %c0_9 = arith.constant 0 : index
    %c0_10 = arith.constant 0 : index
    %c0_11 = arith.constant 0 : index
    %16 = vector.load %arg11[%c0_9, %c0_10, %c0_11] : memref<1x1x768xf32, #tpu.memory_space<vmem>>, vector<1x1x768xf32>
    %17 = vector.shape_cast %16 : vector<1x1x768xf32> to vector<1x768xf32>
    %18 = arith.addf %15, %17 : vector<1x768xf32>
    %19 = vector.extract_strided_slice %18 {offsets = [0, 0], sizes = [1, 128], strides = [1, 1]} : vector<1x768xf32> to vector<1x128xf32>
    %20 = vector.extract_strided_slice %18 {offsets = [0, 128], sizes = [1, 128], strides = [1, 1]} : vector<1x768xf32> to vector<1x128xf32>
    %21 = vector.extract_strided_slice %18 {offsets = [0, 256], sizes = [1, 128], strides = [1, 1]} : vector<1x768xf32> to vector<1x128xf32>
    %22 = vector.extract_strided_slice %18 {offsets = [0, 384], sizes = [1, 128], strides = [1, 1]} : vector<1x768xf32> to vector<1x128xf32>
    %23 = vector.extract_strided_slice %18 {offsets = [0, 512], sizes = [1, 128], strides = [1, 1]} : vector<1x768xf32> to vector<1x128xf32>
    %24 = vector.extract_strided_slice %18 {offsets = [0, 640], sizes = [1, 128], strides = [1, 1]} : vector<1x768xf32> to vector<1x128xf32>
    %cst_12 = arith.constant dense<0.000000e+00> : vector<32xf32>
    %25 = vector.multi_reduction <add>, %3, %cst_12 [1] : vector<32x128xf32> to vector<32xf32>
    %26 = vector.shape_cast %25 : vector<32xf32> to vector<32x1xf32>
    %cst_13 = arith.constant 1.280000e+02 : f32
    %27 = vector.broadcast %cst_13 : f32 to vector<32x1xf32>
    %28 = arith.divf %26, %27 : vector<32x1xf32>
    %29 = vector.broadcast %28 : vector<32x1xf32> to vector<32x128xf32>
    %30 = arith.subf %3, %29 : vector<32x128xf32>
    %31 = arith.mulf %30, %30 : vector<32x128xf32>
    %cst_14 = arith.constant dense<0.000000e+00> : vector<32xf32>
    %32 = vector.multi_reduction <add>, %31, %cst_14 [1] : vector<32x128xf32> to vector<32xf32>
    %33 = vector.shape_cast %32 : vector<32xf32> to vector<32x1xf32>
    %cst_15 = arith.constant 1.280000e+02 : f32
    %34 = vector.broadcast %cst_15 : f32 to vector<32x1xf32>
    %35 = arith.divf %33, %34 : vector<32x1xf32>
    %36 = vector.broadcast %28 : vector<32x1xf32> to vector<32x128xf32>
    %37 = arith.subf %3, %36 : vector<32x128xf32>
    %cst_16 = arith.constant 9.99999997E-7 : f32
    %38 = vector.broadcast %cst_16 : f32 to vector<32x1xf32>
    %39 = arith.addf %35, %38 : vector<32x1xf32>
    %40 = math.rsqrt %39 : vector<32x1xf32>
    %41 = vector.broadcast %40 : vector<32x1xf32> to vector<32x128xf32>
    %42 = arith.mulf %37, %41 : vector<32x128xf32>
    %cst_17 = arith.constant 1.000000e+00 : f32
    %43 = vector.broadcast %cst_17 : f32 to vector<1x128xf32>
    %44 = arith.addf %21, %43 : vector<1x128xf32>
    %45 = vector.broadcast %44 : vector<1x128xf32> to vector<32x128xf32>
    %46 = arith.mulf %42, %45 : vector<32x128xf32>
    %47 = vector.broadcast %23 : vector<1x128xf32> to vector<32x128xf32>
    %48 = arith.addf %46, %47 : vector<32x128xf32>
    %49 = arith.truncf %48 : vector<32x128xf32> to vector<32x128xbf16>
    %c0_18 = arith.constant 0 : index
    %c0_19 = arith.constant 0 : index
    %c0_20 = arith.constant 0 : index
    %50 = vector.load %arg12[%c0_18, %c0_19, %c0_20] : memref<1x128x384xbf16, #tpu.memory_space<vmem>>, vector<1x128x384xbf16>
    %51 = vector.shape_cast %50 : vector<1x128x384xbf16> to vector<128x384xbf16>
    %cst_21 = arith.constant dense<0.000000e+00> : vector<32x384xf32>
    %52 = tpu.matmul %49, %51, %cst_21 {dimension_numbers = #tpu.dot_dimension_numbers<[1], [0], [0], [1], [0, 0, 1, 1], [], []>} : vector<32x128xbf16>, vector<128x384xbf16>, vector<32x384xf32> -> vector<32x384xf32>
    %c0_22 = arith.constant 0 : index
    %c0_23 = arith.constant 0 : index
    %c0_24 = arith.constant 0 : index
    %53 = vector.load %arg13[%c0_22, %c0_23, %c0_24] : memref<1x1x384xf32, #tpu.memory_space<vmem>>, vector<1x1x384xf32>
    %54 = vector.shape_cast %53 : vector<1x1x384xf32> to vector<1x384xf32>
    %55 = vector.broadcast %54 : vector<1x384xf32> to vector<32x384xf32>
    %56 = arith.addf %52, %55 : vector<32x384xf32>
    %57 = vector.extract_strided_slice %56 {offsets = [0, 0], sizes = [32, 128], strides = [1, 1]} : vector<32x384xf32> to vector<32x128xf32>
    %cst_25 = arith.constant 0.176776692 : f32
    %58 = vector.broadcast %cst_25 : f32 to vector<32x128xf32>
    %59 = arith.mulf %57, %58 : vector<32x128xf32>
    %60 = vector.extract_strided_slice %56 {offsets = [0, 128], sizes = [32, 128], strides = [1, 1]} : vector<32x384xf32> to vector<32x128xf32>
    %61 = vector.extract_strided_slice %56 {offsets = [0, 256], sizes = [32, 128], strides = [1, 1]} : vector<32x384xf32> to vector<32x128xf32>
    %62 = vector.extract_strided_slice %59 {offsets = [0, 0], sizes = [32, 32], strides = [1, 1]} : vector<32x128xf32> to vector<32x32xf32>
    %63 = vector.extract_strided_slice %59 {offsets = [0, 32], sizes = [32, 32], strides = [1, 1]} : vector<32x128xf32> to vector<32x32xf32>
    %64 = vector.extract_strided_slice %59 {offsets = [0, 64], sizes = [32, 32], strides = [1, 1]} : vector<32x128xf32> to vector<32x32xf32>
    %65 = vector.extract_strided_slice %59 {offsets = [0, 96], sizes = [32, 32], strides = [1, 1]} : vector<32x128xf32> to vector<32x32xf32>
    %66 = vector.shape_cast %62 : vector<32x32xf32> to vector<1x32x32xf32>
    %67 = vector.shape_cast %63 : vector<32x32xf32> to vector<1x32x32xf32>
    %68 = vector.shape_cast %64 : vector<32x32xf32> to vector<1x32x32xf32>
    %69 = vector.shape_cast %65 : vector<32x32xf32> to vector<1x32x32xf32>
    %70 = tpu.concatenate %66, %67, %68, %69 in 0 : vector<1x32x32xf32>, vector<1x32x32xf32>, vector<1x32x32xf32>, vector<1x32x32xf32> -> vector<4x32x32xf32>
    %71 = arith.truncf %70 : vector<4x32x32xf32> to vector<4x32x32xbf16>
    %72 = vector.extract_strided_slice %60 {offsets = [0, 0], sizes = [32, 32], strides = [1, 1]} : vector<32x128xf32> to vector<32x32xf32>
    %73 = vector.extract_strided_slice %60 {offsets = [0, 32], sizes = [32, 32], strides = [1, 1]} : vector<32x128xf32> to vector<32x32xf32>
    %74 = vector.extract_strided_slice %60 {offsets = [0, 64], sizes = [32, 32], strides = [1, 1]} : vector<32x128xf32> to vector<32x32xf32>
    %75 = vector.extract_strided_slice %60 {offsets = [0, 96], sizes = [32, 32], strides = [1, 1]} : vector<32x128xf32> to vector<32x32xf32>
    %76 = vector.shape_cast %72 : vector<32x32xf32> to vector<1x32x32xf32>
    %77 = vector.shape_cast %73 : vector<32x32xf32> to vector<1x32x32xf32>
    %78 = vector.shape_cast %74 : vector<32x32xf32> to vector<1x32x32xf32>
    %79 = vector.shape_cast %75 : vector<32x32xf32> to vector<1x32x32xf32>
    %80 = tpu.concatenate %76, %77, %78, %79 in 0 : vector<1x32x32xf32>, vector<1x32x32xf32>, vector<1x32x32xf32>, vector<1x32x32xf32> -> vector<4x32x32xf32>
    %81 = arith.truncf %80 : vector<4x32x32xf32> to vector<4x32x32xbf16>
    %82 = vector.extract_strided_slice %61 {offsets = [0, 0], sizes = [32, 32], strides = [1, 1]} : vector<32x128xf32> to vector<32x32xf32>
    %83 = vector.extract_strided_slice %61 {offsets = [0, 32], sizes = [32, 32], strides = [1, 1]} : vector<32x128xf32> to vector<32x32xf32>
    %84 = vector.extract_strided_slice %61 {offsets = [0, 64], sizes = [32, 32], strides = [1, 1]} : vector<32x128xf32> to vector<32x32xf32>
    %85 = vector.extract_strided_slice %61 {offsets = [0, 96], sizes = [32, 32], strides = [1, 1]} : vector<32x128xf32> to vector<32x32xf32>
    %86 = vector.shape_cast %82 : vector<32x32xf32> to vector<1x32x32xf32>
    %87 = vector.shape_cast %83 : vector<32x32xf32> to vector<1x32x32xf32>
    %88 = vector.shape_cast %84 : vector<32x32xf32> to vector<1x32x32xf32>
    %89 = vector.shape_cast %85 : vector<32x32xf32> to vector<1x32x32xf32>
    %90 = tpu.concatenate %86, %87, %88, %89 in 0 : vector<1x32x32xf32>, vector<1x32x32xf32>, vector<1x32x32xf32>, vector<1x32x32xf32> -> vector<4x32x32xf32>
    %91 = arith.truncf %90 : vector<4x32x32xf32> to vector<4x32x32xbf16>
    "tpu.trace_start"() <{level = 10 : i32, message = "hqd,hkd->hqk"}> : () -> ()
    %cst_26 = arith.constant dense<0.000000e+00> : vector<4x32x32xf32>
    %92 = tpu.matmul %71, %81, %cst_26 {dimension_numbers = #tpu.dot_dimension_numbers<[2], [2], [1], [1], [0, 0, 0, 1, 1, 1], [0], [0]>} : vector<4x32x32xbf16>, vector<4x32x32xbf16>, vector<4x32x32xf32> -> vector<4x32x32xf32>
    "tpu.trace_stop"() : () -> ()
    %c0_27 = arith.constant 0 : index
    %c0_28 = arith.constant 0 : index
    %93 = vector.load %arg4[%c0_27, %c0_28] : memref<32x32xbf16, #tpu.memory_space<vmem>>, vector<32x32xbf16>
    %94 = arith.extf %93 : vector<32x32xbf16> to vector<32x32xf32>
    %95 = vector.shape_cast %94 : vector<32x32xf32> to vector<1x32x32xf32>
    %96 = vector.broadcast %95 : vector<1x32x32xf32> to vector<4x32x32xf32>
    %97 = arith.addf %92, %96 : vector<4x32x32xf32>
    %cst_29 = arith.constant dense<0xFF800000> : vector<4x32xf32>
    %98 = vector.multi_reduction <maximumf>, %97, %cst_29 [2] : vector<4x32x32xf32> to vector<4x32xf32>
    %99 = vector.shape_cast %98 : vector<4x32xf32> to vector<4x32x1xf32>
    %100 = vector.broadcast %99 : vector<4x32x1xf32> to vector<4x32x32xf32>
    %101 = arith.subf %97, %100 : vector<4x32x32xf32>
    %102 = math.exp %101 : vector<4x32x32xf32>
    %cst_30 = arith.constant dense<0.000000e+00> : vector<4x32xf32>
    %103 = vector.multi_reduction <add>, %102, %cst_30 [2] : vector<4x32x32xf32> to vector<4x32xf32>
    %104 = vector.shape_cast %103 : vector<4x32xf32> to vector<4x32x1xf32>
    %105 = tpu.reciprocal %104 {approx = true} : vector<4x32x1xf32> -> vector<4x32x1xf32>
    %106 = vector.broadcast %105 : vector<4x32x1xf32> to vector<4x32x32xf32>
    %107 = arith.mulf %102, %106 : vector<4x32x32xf32>
    %108 = arith.truncf %107 : vector<4x32x32xf32> to vector<4x32x32xbf16>
    "tpu.trace_start"() <{level = 10 : i32, message = "hqk,hkd->hqd"}> : () -> ()
    %cst_31 = arith.constant dense<0.000000e+00> : vector<4x32x32xf32>
    %109 = tpu.matmul %108, %91, %cst_31 {dimension_numbers = #tpu.dot_dimension_numbers<[2], [1], [1], [2], [0, 0, 0, 1, 1, 2], [0], [0]>} : vector<4x32x32xbf16>, vector<4x32x32xbf16>, vector<4x32x32xf32> -> vector<4x32x32xf32>
    "tpu.trace_stop"() : () -> ()
    %110 = vector.extract_strided_slice %109 {offsets = [0, 0, 0], sizes = [1, 32, 32], strides = [1, 1, 1]} : vector<4x32x32xf32> to vector<1x32x32xf32>
    %111 = vector.shape_cast %110 : vector<1x32x32xf32> to vector<32x32xf32>
    %112 = vector.extract_strided_slice %109 {offsets = [1, 0, 0], sizes = [1, 32, 32], strides = [1, 1, 1]} : vector<4x32x32xf32> to vector<1x32x32xf32>
    %113 = vector.shape_cast %112 : vector<1x32x32xf32> to vector<32x32xf32>
    %114 = vector.extract_strided_slice %109 {offsets = [2, 0, 0], sizes = [1, 32, 32], strides = [1, 1, 1]} : vector<4x32x32xf32> to vector<1x32x32xf32>
    %115 = vector.shape_cast %114 : vector<1x32x32xf32> to vector<32x32xf32>
    %116 = vector.extract_strided_slice %109 {offsets = [3, 0, 0], sizes = [1, 32, 32], strides = [1, 1, 1]} : vector<4x32x32xf32> to vector<1x32x32xf32>
    %117 = vector.shape_cast %116 : vector<1x32x32xf32> to vector<32x32xf32>
    %118 = tpu.concatenate %111, %113, %115, %117 in 1 : vector<32x32xf32>, vector<32x32xf32>, vector<32x32xf32>, vector<32x32xf32> -> vector<32x128xf32>
    %119 = arith.truncf %118 : vector<32x128xf32> to vector<32x128xbf16>
    %c0_32 = arith.constant 0 : index
    %c0_33 = arith.constant 0 : index
    %c0_34 = arith.constant 0 : index
    %120 = vector.load %arg14[%c0_32, %c0_33, %c0_34] : memref<1x128x128xbf16, #tpu.memory_space<vmem>>, vector<1x128x128xbf16>
    %121 = vector.shape_cast %120 : vector<1x128x128xbf16> to vector<128x128xbf16>
    %cst_35 = arith.constant dense<0.000000e+00> : vector<32x128xf32>
    %122 = tpu.matmul %119, %121, %cst_35 {dimension_numbers = #tpu.dot_dimension_numbers<[1], [0], [0], [1], [0, 0, 1, 1], [], []>} : vector<32x128xbf16>, vector<128x128xbf16>, vector<32x128xf32> -> vector<32x128xf32>
    %c0_36 = arith.constant 0 : index
    %c0_37 = arith.constant 0 : index
    %c0_38 = arith.constant 0 : index
    %123 = vector.load %arg15[%c0_36, %c0_37, %c0_38] : memref<1x1x128xf32, #tpu.memory_space<vmem>>, vector<1x1x128xf32>
    %124 = vector.shape_cast %123 : vector<1x1x128xf32> to vector<1x128xf32>
    %125 = vector.broadcast %124 : vector<1x128xf32> to vector<32x128xf32>
    %126 = arith.addf %122, %125 : vector<32x128xf32>
    %127 = vector.broadcast %19 : vector<1x128xf32> to vector<32x128xf32>
    %128 = arith.mulf %126, %127 : vector<32x128xf32>
    %129 = arith.addf %3, %128 : vector<32x128xf32>
    %cst_39 = arith.constant dense<0.000000e+00> : vector<32xf32>
    %130 = vector.multi_reduction <add>, %129, %cst_39 [1] : vector<32x128xf32> to vector<32xf32>
    %131 = vector.shape_cast %130 : vector<32xf32> to vector<32x1xf32>
    %cst_40 = arith.constant 1.280000e+02 : f32
    %132 = vector.broadcast %cst_40 : f32 to vector<32x1xf32>
    %133 = arith.divf %131, %132 : vector<32x1xf32>
    %134 = vector.broadcast %133 : vector<32x1xf32> to vector<32x128xf32>
    %135 = arith.subf %129, %134 : vector<32x128xf32>
    %136 = arith.mulf %135, %135 : vector<32x128xf32>
    %cst_41 = arith.constant dense<0.000000e+00> : vector<32xf32>
    %137 = vector.multi_reduction <add>, %136, %cst_41 [1] : vector<32x128xf32> to vector<32xf32>
    %138 = vector.shape_cast %137 : vector<32xf32> to vector<32x1xf32>
    %cst_42 = arith.constant 1.280000e+02 : f32
    %139 = vector.broadcast %cst_42 : f32 to vector<32x1xf32>
    %140 = arith.divf %138, %139 : vector<32x1xf32>
    %141 = vector.broadcast %133 : vector<32x1xf32> to vector<32x128xf32>
    %142 = arith.subf %129, %141 : vector<32x128xf32>
    %cst_43 = arith.constant 9.99999997E-7 : f32
    %143 = vector.broadcast %cst_43 : f32 to vector<32x1xf32>
    %144 = arith.addf %140, %143 : vector<32x1xf32>
    %145 = math.rsqrt %144 : vector<32x1xf32>
    %146 = vector.broadcast %145 : vector<32x1xf32> to vector<32x128xf32>
    %147 = arith.mulf %142, %146 : vector<32x128xf32>
    %cst_44 = arith.constant 1.000000e+00 : f32
    %148 = vector.broadcast %cst_44 : f32 to vector<1x128xf32>
    %149 = arith.addf %22, %148 : vector<1x128xf32>
    %150 = vector.broadcast %149 : vector<1x128xf32> to vector<32x128xf32>
    %151 = arith.mulf %147, %150 : vector<32x128xf32>
    %152 = vector.broadcast %24 : vector<1x128xf32> to vector<32x128xf32>
    %153 = arith.addf %151, %152 : vector<32x128xf32>
    %154 = arith.truncf %153 : vector<32x128xf32> to vector<32x128xbf16>
    %c0_45 = arith.constant 0 : index
    %c0_46 = arith.constant 0 : index
    %c0_47 = arith.constant 0 : index
    %155 = vector.load %arg16[%c0_45, %c0_46, %c0_47] : memref<1x128x512xbf16, #tpu.memory_space<vmem>>, vector<1x128x512xbf16>
    %156 = vector.shape_cast %155 : vector<1x128x512xbf16> to vector<128x512xbf16>
    %cst_48 = arith.constant dense<0.000000e+00> : vector<32x512xf32>
    %157 = tpu.matmul %154, %156, %cst_48 {dimension_numbers = #tpu.dot_dimension_numbers<[1], [0], [0], [1], [0, 0, 1, 1], [], []>} : vector<32x128xbf16>, vector<128x512xbf16>, vector<32x512xf32> -> vector<32x512xf32>
    %c0_49 = arith.constant 0 : index
    %c0_50 = arith.constant 0 : index
    %c0_51 = arith.constant 0 : index
    %158 = vector.load %arg17[%c0_49, %c0_50, %c0_51] : memref<1x1x512xf32, #tpu.memory_space<vmem>>, vector<1x1x512xf32>
    %159 = vector.shape_cast %158 : vector<1x1x512xf32> to vector<1x512xf32>
    %160 = vector.broadcast %159 : vector<1x512xf32> to vector<32x512xf32>
    %161 = arith.addf %157, %160 : vector<32x512xf32>
    %162 = arith.mulf %161, %161 : vector<32x512xf32>
    %163 = arith.mulf %161, %162 : vector<32x512xf32>
    %cst_52 = arith.constant 4.471500e-02 : f32
    %164 = vector.broadcast %cst_52 : f32 to vector<32x512xf32>
    %165 = arith.mulf %164, %163 : vector<32x512xf32>
    %166 = arith.addf %161, %165 : vector<32x512xf32>
    %cst_53 = arith.constant 0.797884583 : f32
    %167 = vector.broadcast %cst_53 : f32 to vector<32x512xf32>
    %168 = arith.mulf %167, %166 : vector<32x512xf32>
    %169 = math.tanh %168 : vector<32x512xf32>
    %cst_54 = arith.constant 1.000000e+00 : f32
    %170 = vector.broadcast %cst_54 : f32 to vector<32x512xf32>
    %171 = arith.addf %170, %169 : vector<32x512xf32>
    %cst_55 = arith.constant 5.000000e-01 : f32
    %172 = vector.broadcast %cst_55 : f32 to vector<32x512xf32>
    %173 = arith.mulf %172, %171 : vector<32x512xf32>
    %174 = arith.mulf %161, %173 : vector<32x512xf32>
    %175 = arith.truncf %174 : vector<32x512xf32> to vector<32x512xbf16>
    %c0_56 = arith.constant 0 : index
    %c0_57 = arith.constant 0 : index
    %c0_58 = arith.constant 0 : index
    %176 = vector.load %arg18[%c0_56, %c0_57, %c0_58] : memref<1x512x128xbf16, #tpu.memory_space<vmem>>, vector<1x512x128xbf16>
    %177 = vector.shape_cast %176 : vector<1x512x128xbf16> to vector<512x128xbf16>
    %cst_59 = arith.constant dense<0.000000e+00> : vector<32x128xf32>
    %178 = tpu.matmul %175, %177, %cst_59 {dimension_numbers = #tpu.dot_dimension_numbers<[1], [0], [0], [1], [0, 0, 1, 1], [], []>} : vector<32x512xbf16>, vector<512x128xbf16>, vector<32x128xf32> -> vector<32x128xf32>
    %c0_60 = arith.constant 0 : index
    %c0_61 = arith.constant 0 : index
    %c0_62 = arith.constant 0 : index
    %179 = vector.load %arg19[%c0_60, %c0_61, %c0_62] : memref<1x1x128xf32, #tpu.memory_space<vmem>>, vector<1x1x128xf32>
    %180 = vector.shape_cast %179 : vector<1x1x128xf32> to vector<1x128xf32>
    %181 = vector.broadcast %180 : vector<1x128xf32> to vector<32x128xf32>
    %182 = arith.addf %178, %181 : vector<32x128xf32>
    %183 = vector.broadcast %20 : vector<1x128xf32> to vector<32x128xf32>
    %184 = arith.mulf %182, %183 : vector<32x128xf32>
    %185 = arith.addf %129, %184 : vector<32x128xf32>
    %c0_63 = arith.constant 0 : index
    %c0_64 = arith.constant 0 : index
    %186 = vector.load %arg21[%c0_63, %c0_64] : memref<32x128xf32, #tpu.memory_space<vmem>>, vector<32x128xf32>
    tpu.vector_store %arg21[%c0_63, %c0_64], %185 {strides = array<i32>} : memref<32x128xf32, #tpu.memory_space<vmem>>, vector<32x128xf32>,
    %c1_i32 = arith.constant 1 : i32
    %187 = arith.cmpi eq, %arg1, %c1_i32 : i32
    %188 = arith.extui %187 : i1 to i32
    %c0_i32_65 = arith.constant 0 : i32
    %189 = arith.cmpi ne, %188, %c0_i32_65 : i32
    scf.if %189 {
      %190 = vector.extract_strided_slice %185 {offsets = [16, 0], sizes = [16, 128], strides = [1, 1]} : vector<32x128xf32> to vector<16x128xf32>
      %c0_66 = arith.constant 0 : index
      %c0_67 = arith.constant 0 : index
      %c0_68 = arith.constant 0 : index
      %191 = vector.load %arg20[%c0_66, %c0_67, %c0_68] : memref<1x16x128xf32, #tpu.memory_space<vmem>>, vector<1x16x128xf32>
      %192 = vector.shape_cast %191 : vector<1x16x128xf32> to vector<16x128xf32>
      %193 = vector.shape_cast %190 : vector<16x128xf32> to vector<1x16x128xf32>
      tpu.vector_store %arg20[%c0_66, %c0_67, %c0_68], %193 {strides = array<i32>} : memref<1x16x128xf32, #tpu.memory_space<vmem>>, vector<1x16x128xf32>,
    } else {
    }
    return
  }
  func.func @transform_0(%arg0: i32, %arg1: i32) -> (i32, i32, i32) {
    %c0_i32 = arith.constant 0 : i32
    %c0_i32_0 = arith.constant 0 : i32
    %c0_i32_1 = arith.constant 0 : i32
    return %arg0, %c0_i32, %c0_i32_0 : i32, i32, i32
  }
  func.func @transform_1(%arg0: i32, %arg1: i32) -> (i32, i32, i32) {
    %c0_i32 = arith.constant 0 : i32
    %c0_i32_0 = arith.constant 0 : i32
    %c0_i32_1 = arith.constant 0 : i32
    return %arg0, %c0_i32, %c0_i32_0 : i32, i32, i32
  }
  func.func @transform_2(%arg0: i32, %arg1: i32) -> (i32, i32) {
    %c0_i32 = arith.constant 0 : i32
    %c0_i32_0 = arith.constant 0 : i32
    %c0_i32_1 = arith.constant 0 : i32
    return %c0_i32, %c0_i32_0 : i32, i32
  }
  func.func @transform_3(%arg0: i32, %arg1: i32) -> (i32, i32) {
    %c0_i32 = arith.constant 0 : i32
    %c0_i32_0 = arith.constant 0 : i32
    %c0_i32_1 = arith.constant 0 : i32
    return %c0_i32, %c0_i32_0 : i32, i32
  }
  func.func @transform_4(%arg0: i32, %arg1: i32) -> (i32, i32) {
    %c0_i32 = arith.constant 0 : i32
    %c0_i32_0 = arith.constant 0 : i32
    %c0_i32_1 = arith.constant 0 : i32
    return %c0_i32, %c0_i32_0 : i32, i32
  }
  func.func @transform_5(%arg0: i32, %arg1: i32) -> (i32, i32) {
    %c0_i32 = arith.constant 0 : i32
    %c0_i32_0 = arith.constant 0 : i32
    %c0_i32_1 = arith.constant 0 : i32
    return %c0_i32, %c0_i32_0 : i32, i32
  }
  func.func @transform_6(%arg0: i32, %arg1: i32) -> (i32, i32) {
    %c0_i32 = arith.constant 0 : i32
    %c0_i32_0 = arith.constant 0 : i32
    %c0_i32_1 = arith.constant 0 : i32
    return %c0_i32, %c0_i32_0 : i32, i32
  }
  func.func @transform_7(%arg0: i32, %arg1: i32) -> (i32, i32) {
    %c0_i32 = arith.constant 0 : i32
    %c0_i32_0 = arith.constant 0 : i32
    %c0_i32_1 = arith.constant 0 : i32
    return %c0_i32, %c0_i32_0 : i32, i32
  }
  func.func @transform_8(%arg0: i32, %arg1: i32) -> (i32, i32, i32) {
    %c0_i32 = arith.constant 0 : i32
    %c0_i32_0 = arith.constant 0 : i32
    %c0_i32_1 = arith.constant 0 : i32
    return %arg1, %c0_i32, %c0_i32_0 : i32, i32, i32
  }
  func.func @transform_9(%arg0: i32, %arg1: i32) -> (i32, i32, i32) {
    %c0_i32 = arith.constant 0 : i32
    %c0_i32_0 = arith.constant 0 : i32
    %c0_i32_1 = arith.constant 0 : i32
    return %arg1, %c0_i32, %c0_i32_0 : i32, i32, i32
  }
  func.func @transform_10(%arg0: i32, %arg1: i32) -> (i32, i32, i32) {
    %c0_i32 = arith.constant 0 : i32
    %c0_i32_0 = arith.constant 0 : i32
    %c0_i32_1 = arith.constant 0 : i32
    return %arg1, %c0_i32, %c0_i32_0 : i32, i32, i32
  }
  func.func @transform_11(%arg0: i32, %arg1: i32) -> (i32, i32, i32) {
    %c0_i32 = arith.constant 0 : i32
    %c0_i32_0 = arith.constant 0 : i32
    %c0_i32_1 = arith.constant 0 : i32
    return %arg1, %c0_i32, %c0_i32_0 : i32, i32, i32
  }
  func.func @transform_12(%arg0: i32, %arg1: i32) -> (i32, i32, i32) {
    %c0_i32 = arith.constant 0 : i32
    %c0_i32_0 = arith.constant 0 : i32
    %c0_i32_1 = arith.constant 0 : i32
    return %arg1, %c0_i32, %c0_i32_0 : i32, i32, i32
  }
  func.func @transform_13(%arg0: i32, %arg1: i32) -> (i32, i32, i32) {
    %c0_i32 = arith.constant 0 : i32
    %c0_i32_0 = arith.constant 0 : i32
    %c0_i32_1 = arith.constant 0 : i32
    return %arg1, %c0_i32, %c0_i32_0 : i32, i32, i32
  }
  func.func @transform_14(%arg0: i32, %arg1: i32) -> (i32, i32, i32) {
    %c0_i32 = arith.constant 0 : i32
    %c0_i32_0 = arith.constant 0 : i32
    %c0_i32_1 = arith.constant 0 : i32
    return %arg1, %c0_i32, %c0_i32_0 : i32, i32, i32
  }
  func.func @transform_15(%arg0: i32, %arg1: i32) -> (i32, i32, i32) {
    %c0_i32 = arith.constant 0 : i32
    %c0_i32_0 = arith.constant 0 : i32
    %c0_i32_1 = arith.constant 0 : i32
    return %arg1, %c0_i32, %c0_i32_0 : i32, i32, i32
  }
  func.func @transform_16(%arg0: i32, %arg1: i32) -> (i32, i32, i32) {
    %c0_i32 = arith.constant 0 : i32
    %c0_i32_0 = arith.constant 0 : i32
    %c0_i32_1 = arith.constant 0 : i32
    return %arg1, %c0_i32, %c0_i32_0 : i32, i32, i32
  }
  func.func @transform_17(%arg0: i32, %arg1: i32) -> (i32, i32, i32) {
    %c0_i32 = arith.constant 0 : i32
    %c0_i32_0 = arith.constant 0 : i32
    %c0_i32_1 = arith.constant 0 : i32
    return %arg1, %c0_i32, %c0_i32_0 : i32, i32, i32
  }
  func.func @transform_18(%arg0: i32, %arg1: i32) -> (i32, i32, i32) {
    %c0_i32 = arith.constant 0 : i32
    %c0_i32_0 = arith.constant 0 : i32
    %c0_i32_1 = arith.constant 0 : i32
    return %arg0, %c0_i32, %c0_i32_0 : i32, i32, i32
  }
}

</mosaic_0001>

<bundles_post_ra>
// kernel: tpu_custom_call.1
= control target key start
LH: loop header
LB: loop body
LE: loop exit
PB: predicated region body
PF: predicated region fallthrough
CT: control target
= control target key end

     0   :  { %s6616_s0 = inlined_call_operand.vmem [shape: f32[2,32,16], index: 0, kind: input, shape index: {}]   ;;  %s6617_s1 = inlined_call_operand.vmem [shape: f32[2,1,128], index: 1, kind: input, shape index: {}]   ;;  %s6618_s2 = inlined_call_operand.vmem [shape: bf16[32,32], index: 2, kind: input, shape index: {}]   ;;  %s6619_s3 = inlined_call_operand.vmem [shape: f32[32,128], index: 3, kind: input, shape index: {}]   ;;  %s6620_s4 = inlined_call_operand.vmem [shape: f32[32,1], index: 4, kind: input, shape index: {}]   ;;  %s6621_s5 = inlined_call_operand.vmem [shape: f32[32,1], index: 5, kind: input, shape index: {}]   ;;  %s6622_s6 = inlined_call_operand.vmem [shape: bf16[16,128], index: 6, kind: input, shape index: {}]   ;;  %s6623_s7 = inlined_call_operand.vmem [shape: f32[1,128], index: 7, kind: input, shape index: {}]   ;;  %s6624_s8 = inlined_call_operand.hbm [shape: bf16[2,128,768], index: 8, kind: input, shape index: {}]   ;;  %s6625_s9 = inlined_call_operand.vmem [shape: f32[2,1,768], index: 9, kind: input, shape index: {}]   ;;  %s6626_s10 = inlined_call_operand.hbm [shape: bf16[2,128,384], index: 10, kind: input, shape index: {}]   ;;  %s6627_s11 = inlined_call_operand.hbm [shape: f32[2,1,384], index: 11, kind: input, shape index: {}]   ;;  %s6628_s12 = inlined_call_operand.vmem [shape: bf16[2,128,128], index: 12, kind: input, shape index: {}]   ;;  %s6629_s13 = inlined_call_operand.vmem [shape: f32[2,1,128], index: 13, kind: input, shape index: {}]   ;;  %s6630_s14 = inlined_call_operand.hbm [shape: bf16[2,128,512], index: 14, kind: input, shape index: {}]   ;;  %s6631_s15 = inlined_call_operand.vmem [shape: f32[2,1,512], index: 15, kind: input, shape index: {}]   ;;  %s6632_s16 = inlined_call_operand.hbm [shape: bf16[2,512,128], index: 16, kind: input, shape index: {}]   ;;  %s6633_s17 = inlined_call_operand.vmem [shape: f32[2,1,128], index: 17, kind: input, shape index: {}]   ;;  %s6634_s18 = inlined_call_operand.hbm [shape: f32[2,16,128], index: 18, kind: output, shape index: {}]  }
   0x1   :  { %6665 = sst [smem:[#allocation34_spill]] %s6616_s0 }
   0x2   :  { %6666 = sst [smem:[#allocation35_spill]] %s6617_s1 }
   0x3   :  { %6667 = sst [smem:[#allocation36_spill]] %s6618_s2 }
   0x4   :  { %6668 = sst [smem:[#allocation37_spill]] %s6619_s3 }
   0x5   :  { %6669 = sst [smem:[#allocation38_spill]] %s6620_s4 }
   0x6   :  { %6670 = sst [smem:[#allocation39_spill]] %s6621_s5 }
   0x7   :  { %6671 = sst [smem:[#allocation40_spill]] %s6622_s6 }
   0x8   :  { %6672 = sst [smem:[#allocation41_spill]] %s6623_s7 }
   0x9   :  { %6673 = sst [smem:[#allocation42_spill]] %s6624_s8 }
   0xa   :  { %6674 = sst [smem:[#allocation43_spill]] %s6625_s9 }
   0xb   :  { %6675 = sst [smem:[#allocation44_spill]] %s6626_s10 }
   0xc   :  { %6676 = sst [smem:[#allocation45_spill]] %s6627_s11 }
   0xd   :  { %6677 = sst [smem:[#allocation46_spill]] %s6628_s12 }
   0xe   :  { %6678 = sst [smem:[#allocation47_spill]] %s6629_s13 }
   0xf   :  { %6679 = sst [smem:[#allocation48_spill]] %s6630_s14 }
  0x10   :  { %6680 = sst [smem:[#allocation49_spill]] %s6631_s15 }
  0x11   :  { %6681 = sst [smem:[#allocation50_spill]] %s6632_s16 }
  0x12   :  { %6682 = sst [smem:[#allocation51_spill]] %s6633_s17 }
  0x13   :  { %6683 = sst [smem:[#allocation52_spill]] %s6634_s18 }
  0x14   :  { %23 = vsyncpa [#allocation4], 0 }
  0x15   :  { %25 = vsyncpa [#allocation4 + $0x1], 0 }
  0x16   :  { %26 = vsyncpa [#allocation7], 0 }
  0x17   :  { %28 = vsyncpa [#allocation7 + $0x1], 0 }
  0x18   :  { %29 = vsyncpa [#allocation10], 0 }
  0x19   :  { %31 = vsyncpa [#allocation10 + $0x1], 0 }
  0x1a   :  { %32 = vsyncpa [#allocation5], 0 }
  0x1b   :  { %34 = vsyncpa [#allocation5 + $0x1], 0  ;;  %s5433_s27 = smov 0   ;;  %s5435_s28 = smov 0  }
  0x1c   :  { %s5437_s29 = smov 0   ;;  %s5439_s30 = smov 0  }
  0x1d   :  { %s5441_s0 = smov 0   ;;  %s5443_s19 = smov 0  }
  0x1e   :  { %s5445_s1 = smov 0   ;;  %s5447_s20 = smov 0  }
  0x1f   :  { %s5449_s21 = smov 0   ;;  %s5451_s22 = smov 0  }
  0x20   :  { %s5453_s2 = smov 0  }
  0x21 LB: > { %6684 = sst [smem:[#allocation17_spill]] %s5275_s27  ;;  %s5487_s23 = sadd.s32 4294967295, %s5315_s2   ;;  %s5315_s2 = sphi %s5453_s2, %s40_s2   ;;  %s5311_s22 = sphi %s5451_s22, %s6759_s22   ;;  %s5307_s21 = sphi %s5449_s21, %s6758_s21   ;;  %s5303_s20 = sphi %s5447_s20, %s6757_s20   ;;  %s5299_s1 = sphi %s5445_s1, %s6756_s1   ;;  %s5295_s19 = sphi %s5443_s19, %s6755_s19   ;;  %s5291_s0 = sphi %s5441_s0, %s6754_s0   ;;  %s5287_s30 = sphi %s5439_s30, %s6753_s30   ;;  %s5283_s29 = sphi %s5437_s29, %s6752_s29   ;;  %s5279_s28 = sphi %s5435_s28, %s6751_s28   ;;  %s5275_s27 = sphi %s5433_s27, %s6750_s27  }
  0x22   : > { %6685 = sst [smem:[#allocation18_spill]] %s5279_s28  ;;  %s4013_s24 = sadd.s32 4294967294, %s5315_s2  }
  0x23   : > { %6686 = sst [smem:[#allocation19_spill]] %s5283_s29  ;;  %s49_s25 = sadd.s32 1, %s5307_s21 }
  0x24   : > { %6687 = sst [smem:[#allocation20_spill]] %s5291_s0  ;;  %s52_s26 = sadd.s32 1, %s5311_s22 }
  0x25   : > { %6688 = sst [smem:[#allocation21_spill]] %s5295_s19  ;;  %p50_p0 = scmp.ge.s32.totalorder %s49_s25, 2 }
  0x26   : > { %6689 = sst [smem:[#allocation22_spill]] %s5299_s1  ;;  %s237_s18 = sadd.s32 1, %s5295_s19 }
  0x27   : > { %6690 = sst [smem:[#allocation23_spill]] %s5303_s20  ;;  %p244_p1 = scmp.ne.s32.totalorder %s5295_s19, %s5291_s0 }
  0x28   : > { %6691 = sst [smem:[#allocation24_spill]] %s5307_s21  ;;  %p245_p2 = scmp.eq.s32.totalorder %s5315_s2, 0 }
  0x29   : > { %6692 = sst [smem:[#allocation25_spill]] %s5311_s22  ;;  %s6761_s25 = smov (%p50_p0, %s49_s25), 0 }
  0x2a   : > { %6693 = sst [smem:[#allocation26_spill]] %s5315_s2  ;;  %s6763_s26 = smov (!%p50_p0, %s52_s26), %s5311_s22 }
  0x2b   : > { %6694 = sst [smem:[#allocation27_spill]] %s6761_s25  ;;  %s234_s3 = ssub.s32 %s5307_s21, %s6761_s25 }
  0x2c   : > { %p5501_p3 = por %p245_p2, %p244_p1  ;;  %p54_p4 = scmp.ge.s32.totalorder %s6763_s26, 2 }
  0x2d   : > { %p235_p5 = scmp.eq.s32.totalorder %s234_s3, 0  ;;  %p250_p6 = scmp.ne.s32.totalorder %s5291_s0, %s5287_s30 }
  0x2e   : > { %p251_p7 = scmp.eq.s32.totalorder %s5487_s23, 0  ;;  %s6765_s26 = smov (%p54_p4, %s6763_s26), 0 }
  0x2f   : > { %6696 = sst [smem:[#allocation28_spill]] %s6765_s26  ;;  %s494_s4 = ssub.s32 %s5311_s22, %s6765_s26 }
  0x30   : > { %s5510_s5 = scalar_select %p235_p5, %s5295_s19, %s237_s18  }
  0x31   : > { %p5512_p8 = por %p251_p7, %p250_p6  ;;  %p495_p9 = scmp.eq.s32.totalorder %s494_s4, 0 }
  0x32   : > { %6697 = sst [smem:[#allocation29_spill]] %s5510_s5  ;;  %s497_s6 = sadd.s32 1, %s5283_s29 }
  0x33   : > { %s6698_s25 = scalar_select %p5512_p8, 1, 0 }
  0x34   : > { %p507_p10 = scmp.ne.s32.totalorder %s5283_s29, %s5279_s28  ;;  %p508_p11 = scmp.eq.s32.totalorder %s5487_s23, 3 }
  0x35   : > { %s5523_s3 = scalar_select %p495_p9, %s5283_s29, %s497_s6  }
  0x36   : > { %p5525_p12 = por %p508_p11, %p507_p10  ;;  %p513_p13 = scmp.ne.s32.totalorder %s5279_s28, %s5275_s27 }
  0x37   : > { %6699 = sst [smem:[#allocation30_spill]] %s5523_s3  ;;  %p514_p0 = scmp.eq.s32.totalorder %s4013_s24, 3 }
  0x38   : > { %s6700_s30 = scalar_select %p5525_p12, 1, 0 }
  0x39   : > { %p4494_p1 = scmp.lt.s32.totalorder %s5315_s2, 4  ;;  %s5533_s18 = sand.u32 1, %s5295_s19  }
  0x3a   : > { %6701 = sst [smem:[#allocation31_spill]] %s6700_s30  ;;  %p5535_p2 = por %p514_p0, %p513_p13 }
  0x3b   : > { %s6649_s4 = sand.u32 1, %s5315_s2   ;;  %p5542_p4 = pnand %p4494_p1, %p5501_p3 }
  0x3c   : > { %s6702_s26 = scalar_select %p5535_p2, 1, 0 }
  0x3d   : > { %s6704_s6 = scalar_select %p5542_p4, 1, 0 }
  0x3e   : > { %6703 = sst [smem:[#allocation32_spill]] %s6702_s26  ;;  %s4454_s22 = smul.u32 192, %s5533_s18 }
  0x3f   : > { %s4455_s5 = smul.u32 3072, %s5307_s21  ;;  %s6705_s10 = sld [smem:[#allocation44_spill]] }
  0x40   : > { %s598_s19 = scalar_lea.vmem [#allocation6], %s4454_s22  ;;  %s5558_s7 = scalar_lea.sflag [#allocation7], %s6649_s4 }
  0x41   : > { %s605_s26 = sshll.u32 %s598_s19, 4  ;;  %p5564_p6 = pneg %p5542_p4  ;;  %s5553_s26 = int_to_ptr.vmem [resolvable:$true] %s605_s26 }
  0x45   : > { %s5551_s24 = scalar_lea.hbm %s6705_s10, %s4455_s5  ;;  %s5040_s19 = scalar_lea.hbm %s6705_s10, 6144 }
  0x46   : > { %s5035_s27 = scalar_lea.hbm %s5551_s24, 3072  ;;  %p5041_p10 = scmp.lt.u32.totalorder %s5551_s24, %s6705_s10 }
  0x47   : > { %p5036_p5 = scmp.ne.s32.totalorder %s5551_s24, %s5035_s27  ;;  %p5042_p11 = scmp.lt.u32.totalorder %s5040_s19, %s5035_s27 }
  0x48   : > { %p5044_p0 = scmp.lt.u32.totalorder %s5035_s27, %s5551_s24 }
  0x49   : > { %p5038_p7 = pnand %p5564_p6, %p5036_p5  ;;  %p5043_p13 = por %p5042_p11, %p5041_p10 }
  0x4b   : > { %p5039_p9 = pneg %p5038_p7  ;;  %p5045_p1 = por %p5044_p0, %p5043_p13 }
  0x4d   : > { %p5046_p3 = pnand %p5045_p1, %p5039_p9 }
  0x4f   : > { %5049 = shalt.err (!%p5046_p3)
}
  0x50   : > { %s5050_s4 = scalar_lea.vmem %s5553_s26, 3072  ;;  %s5317_s5 = smov [#allocation6]  }
  0x51   : > { %p5051_p5 = scmp.ne.s32.totalorder %s5553_s26, %s5050_s4  ;;  %s5055_s29 = sshll.u32 %s5317_s5, 4  ;;  %s5056_s29 = int_to_ptr.vmem [resolvable:$false] %s5055_s29 }
  0x52   : > { %s5057_s22 = scalar_lea.vmem %s5056_s29, 6144  ;;  %p5058_p12 = scmp.lt.s32.totalorder %s5553_s26, %s5056_s29 }
  0x53   : > { %p5053_p7 = pnand %p5051_p5, %p5564_p6  ;;  %p5059_p8 = scmp.lt.s32.totalorder %s5057_s22, %s5050_s4 }
  0x55   : > { %p5054_p2 = pneg %p5053_p7  ;;  %p5060_p10 = por %p5059_p8, %p5058_p12 }
  0x57   : > { %p5061_p11 = pnand %p5060_p10, %p5054_p2 }
  0x59   : > { %5064 = shalt.err (!%p5061_p11)
}
  0x5a   : > { %s5318_s27 = smov 192   ;;  %s5319_s19 = smov 12  }
  0x5b   : > { %4480 = dma.hbm_to_vmem [thread:$0]  (!%p5542_p4), %s5551_s24, 3072, %s5553_s26, %s5558_s7, %s5318_s27, %s5318_s27, %s5319_s19  }
  0x5c   : > { %p701_p3 = scmp.lt.s32.totalorder %s5315_s2, 5  ;;  %s4019_s4 = sshll.u32 %s5533_s18, 8 }
  0x5d   : > { %s6652_s3 = sshll.u32 %s5307_s21, 12  ;;  %p6707_p8 = scmp.ge.s32.totalorder %s5315_s2, 1 }
  0x5e   : > { %s6709_s14 = sld [smem:[#allocation48_spill]]  ;;  %s652_s26 = scalar_lea.vmem [#allocation9], %s4019_s4 }
  0x5f   : > { %p5593_p12 = pnand %p6707_p8, %p701_p3  ;;  %s659_s24 = sshll.u32 %s652_s26, 4  ;;  %s5606_s24 = int_to_ptr.vmem [resolvable:$true] %s659_s24 }
  0x60   : > { %s6710_s27 = sand.u32 1, %s5315_s2  }
  0x61   : > { %s6708_s5 = scalar_select %p5593_p12, 1, 0 }
  0x62   : > { %s5610_s19 = scalar_lea.sflag [#allocation10], %s6710_s27 }
  0x64   : > { %s5602_s10 = scalar_lea.hbm %s6709_s14, %s6652_s3  ;;  %s5070_s3 = scalar_lea.hbm %s6709_s14, 8192 }
  0x65   : > { %s5065_s15 = scalar_lea.hbm %s5602_s10, 4096  ;;  %p5071_p0 = scmp.lt.u32.totalorder %s5602_s10, %s6709_s14 }
  0x66   : > { %p5066_p2 = scmp.ne.s32.totalorder %s5602_s10, %s5065_s15  ;;  %p5072_p1 = scmp.lt.u32.totalorder %s5070_s3, %s5065_s15 }
  0x67   : > { %p5074_p7 = scmp.lt.u32.totalorder %s5065_s15, %s5602_s10 }
  0x68   : > { %p5068_p9 = pnand %p5066_p2, %p5564_p6  ;;  %p5073_p5 = por %p5072_p1, %p5071_p0 }
  0x6a   : > { %p5069_p13 = pneg %p5068_p9  ;;  %p5075_p10 = por %p5074_p7, %p5073_p5 }
  0x6c   : > { %p5076_p11 = pnand %p5075_p10, %p5069_p13 }
  0x6e   : > { %5079 = shalt.err (!%p5076_p11)
}
  0x6f   : > { %s5080_s26 = scalar_lea.vmem %s5606_s24, 4096  ;;  %s5320_s27 = smov [#allocation9]  }
  0x70   : > { %p5081_p3 = scmp.ne.s32.totalorder %s5606_s24, %s5080_s26  ;;  %s5085_s29 = sshll.u32 %s5320_s27, 4  ;;  %s5086_s29 = int_to_ptr.vmem [resolvable:$false] %s5085_s29 }
  0x71   : > { %s5087_s12 = scalar_lea.vmem %s5086_s29, 8192  ;;  %p5088_p9 = scmp.lt.s32.totalorder %s5606_s24, %s5086_s29 }
  0x72   : > { %p5083_p8 = pnand %p5081_p3, %p5564_p6  ;;  %p5089_p12 = scmp.lt.s32.totalorder %s5087_s12, %s5080_s26 }
  0x74   : > { %p5084_p2 = pneg %p5083_p8  ;;  %p5090_p0 = por %p5089_p12, %p5088_p9 }
  0x76   : > { %p5091_p1 = pnand %p5090_p0, %p5084_p2 }
  0x78   : > { %5094 = shalt.err (!%p5091_p1)
}
  0x79   : > { %s5321_s15 = smov 256   ;;  %s5322_s17 = smov 16  }
  0x7a   : > { %4486 = dma.hbm_to_vmem [thread:$0]  (!%p5542_p4), %s5602_s10, 4096, %s5606_s24, %s5610_s19, %s5321_s15, %s5321_s15, %s5322_s17  }
  0x7b   : > { %s6711_s3 = sshll.u32 %s5307_s21, 12  ;;  %s6712_s16 = sld [smem:[#allocation50_spill]] }
  0x7c   : > { %s680_s29 = scalar_lea.vmem [#allocation11], %s4019_s4  ;;  %s4452_s14 = smul.u32 384, %s5533_s18 }
  0x7d   : > { %s687_s12 = sshll.u32 %s680_s29, 4  ;;  %s4453_s2 = smul.u32 6144, %s5307_s21  ;;  %s5643_s12 = int_to_ptr.vmem [resolvable:$true] %s687_s12 }
  0x7e   : > { %s4456_s9 = smul.u32 3, %s5533_s18  ;;  %s6713_s8 = sld [smem:[#allocation42_spill]] }
  0x7f   : > { %s570_s10 = scalar_lea.vmem [#allocation3], %s4452_s14  ;;  %s567_s4 = scalar_lea.sflag [#allocation4], %s5533_s18 }
  0x80   : > { %s577_s24 = sshll.u32 %s570_s10, 4  ;;  %s5653_s24 = int_to_ptr.vmem [resolvable:$true] %s577_s24 }
  0x81   : > { %s5639_s27 = scalar_lea.hbm %s6712_s16, %s6711_s3 }
  0x84   : > { %s5651_s20 = scalar_lea.hbm %s6713_s8, %s4453_s2  ;;  %s5100_s13 = scalar_lea.hbm %s6713_s8, 12288 }
  0x85   : > { %s5095_s15 = scalar_lea.hbm %s5651_s20, 6144  ;;  %p5101_p7 = scmp.lt.u32.totalorder %s5651_s20, %s6713_s8 }
  0x86   : > { %p5096_p12 = scmp.ne.s32.totalorder %s5651_s20, %s5095_s15  ;;  %p5102_p10 = scmp.lt.u32.totalorder %s5100_s13, %s5095_s15 }
  0x87   : > { %p5104_p3 = scmp.lt.u32.totalorder %s5095_s15, %s5651_s20 }
  0x88   : > { %p5098_p13 = pnand %p5096_p12, %p5564_p6  ;;  %p5103_p11 = por %p5102_p10, %p5101_p7 }
  0x8a   : > { %p5099_p5 = pneg %p5098_p13  ;;  %p5105_p8 = por %p5104_p3, %p5103_p11 }
  0x8c   : > { %p5106_p2 = pnand %p5105_p8, %p5099_p5 }
  0x8e   : > { %5109 = shalt.err (!%p5106_p2)
}
  0x8f   : > { %s5110_s14 = scalar_lea.vmem %s5653_s24, 6144  ;;  %s5323_s22 = smov [#allocation3]  }
  0x90   : > { %p5111_p9 = scmp.ne.s32.totalorder %s5653_s24, %s5110_s14  ;;  %s5115_s26 = sshll.u32 %s5323_s22, 4  ;;  %s5116_s26 = int_to_ptr.vmem [resolvable:$false] %s5115_s26 }
  0x91   : > { %s5117_s29 = scalar_lea.vmem %s5116_s26, 12288  ;;  %p5118_p12 = scmp.lt.s32.totalorder %s5653_s24, %s5116_s26 }
  0x92   : > { %p5113_p0 = pnand %p5111_p9, %p5564_p6  ;;  %p5119_p13 = scmp.lt.s32.totalorder %s5117_s29, %s5110_s14 }
  0x94   : > { %p5114_p1 = pneg %p5113_p0  ;;  %p5120_p7 = por %p5119_p13, %p5118_p12 }
  0x96   : > { %p5121_p10 = pnand %p5120_p7, %p5114_p1 }
  0x98   : > { %5124 = shalt.err (!%p5121_p10)
}
  0x99   : > { %s5324_s10 = smov 384   ;;  %s5325_s15 = smov 24  }
  0x9a   : > { %4477 = dma.hbm_to_vmem [thread:$0]  (!%p5542_p4), %s5651_s20, 6144, %s5653_s24, %s567_s4, %s5324_s10, %s5324_s10, %s5325_s15  }
  0x9b   : > { %s4457_s17 = smul.u32 48, %s5307_s21  ;;  %s619_s3 = scalar_lea.vmem [#allocation8], %s4456_s9 }
  0x9c   : > { %s627_s13 = sshll.u32 %s619_s3, 4  ;;  %s6714_s11 = sld [smem:[#allocation45_spill]]  ;;  %s628_s13 = int_to_ptr.vmem [resolvable:$true] %s627_s13 }
  0xa2   : > { %s625_s14 = scalar_lea.hbm %s6714_s11, %s4457_s17  ;;  %s5130_s8 = scalar_lea.hbm %s6714_s11, 96 }
  0xa3   : > { %s5125_s22 = scalar_lea.hbm %s625_s14, 48  ;;  %p5131_p8 = scmp.lt.u32.totalorder %s625_s14, %s6714_s11 }
  0xa4   : > { %p5126_p5 = scmp.ne.s32.totalorder %s625_s14, %s5125_s22  ;;  %p5132_p2 = scmp.lt.u32.totalorder %s5130_s8, %s5125_s22 }
  0xa5   : > { %p5134_p0 = scmp.lt.u32.totalorder %s5125_s22, %s625_s14 }
  0xa6   : > { %p5128_p11 = pnand %p5126_p5, %p5564_p6  ;;  %p5133_p9 = por %p5132_p2, %p5131_p8 }
  0xa8   : > { %p5129_p3 = pneg %p5128_p11  ;;  %p5135_p1 = por %p5134_p0, %p5133_p9 }
  0xaa   : > { %p5136_p12 = pnand %p5135_p1, %p5129_p3 }
  0xac   : > { %5139 = shalt.err (!%p5136_p12)
}
  0xad   : > { %s5140_s9 = scalar_lea.vmem %s628_s13, 48  ;;  %s5326_s18 = smov [#allocation8]  }
  0xae   : > { %p5141_p13 = scmp.ne.s32.totalorder %s628_s13, %s5140_s9  ;;  %s5145_s24 = sshll.u32 %s5326_s18, 4  ;;  %s5146_s24 = int_to_ptr.vmem [resolvable:$false] %s5145_s24 }
  0xaf   : > { %s5147_s4 = scalar_lea.vmem %s5146_s24, 96  ;;  %p5148_p5 = scmp.lt.s32.totalorder %s628_s13, %s5146_s24 }
  0xb0   : > { %p5143_p7 = pnand %p5141_p13, %p5564_p6  ;;  %p5149_p11 = scmp.lt.s32.totalorder %s5147_s4, %s5140_s9 }
  0xb2   : > { %p5144_p10 = pneg %p5143_p7  ;;  %p5150_p4 = por %p5149_p11, %p5148_p5 }
  0xb4   : > { %p5151_p2 = pnand %p5150_p4, %p5144_p10 }
  0xb6   : > { %5154 = shalt.err (!%p5151_p2)
}
  0xb7   : > { %p6715_p8 = scmp.ne.s32.totalorder %s6704_s6, 0  ;;  %s5155_s8 = scalar_lea.hbm %s5639_s27, 4096 }
  0xb8   : > { %p5156_p3 = scmp.ne.s32.totalorder %s5639_s27, %s5155_s8  ;;  %s5160_s15 = scalar_lea.hbm %s6712_s16, 8192 }
  0xb9   : > { %4483 = dma.hbm_to_vmem [thread:$0]  (!%p6715_p8), %s625_s14, 48, %s628_s13, %s5558_s7  }
  0xba   : > { %p5158_p9 = pnand %p5156_p3, %p5564_p6  ;;  %p5161_p4 = scmp.lt.u32.totalorder %s5639_s27, %s6712_s16 }
  0xbb   : > { %p5162_p1 = scmp.lt.u32.totalorder %s5160_s15, %s5155_s8  ;;  %p5164_p13 = scmp.lt.u32.totalorder %s5155_s8, %s5639_s27 }
  0xbc   : > { %p5159_p0 = pneg %p5158_p9 }
  0xbd   : > { %p5163_p12 = por %p5162_p1, %p5161_p4 }
  0xbf   : > { %p5165_p7 = por %p5164_p13, %p5163_p12 }
  0xc1   : > { %p5166_p10 = pnand %p5165_p7, %p5159_p0 }
  0xc3   : > { %5169 = shalt.err (!%p5166_p10)
}
  0xc4   : > { %s5170_s7 = scalar_lea.vmem %s5643_s12, 4096  ;;  %s5327_s13 = smov [#allocation11]  }
  0xc5   : > { %p5171_p5 = scmp.ne.s32.totalorder %s5643_s12, %s5170_s7  ;;  %s5175_s1 = sshll.u32 %s5327_s13, 4  ;;  %s5176_s1 = int_to_ptr.vmem [resolvable:$false] %s5175_s1 }
  0xc6   : > { %s5177_s2 = scalar_lea.vmem %s5176_s1, 8192  ;;  %p5178_p3 = scmp.lt.s32.totalorder %s5643_s12, %s5176_s1 }
  0xc7   : > { %p5173_p11 = pnand %p5171_p5, %p5564_p6  ;;  %p5179_p9 = scmp.lt.s32.totalorder %s5177_s2, %s5170_s7 }
  0xc9   : > { %p5174_p2 = pneg %p5173_p11  ;;  %p5180_p4 = por %p5179_p9, %p5178_p3 }
  0xcb   : > { %p5181_p1 = pnand %p5180_p4, %p5174_p2 }
  0xcd   : > { %5184 = shalt.err (!%p5181_p1)
}
  0xce   : > { %s5328_s14 = smov 64   ;;  %s5329_s22 = smov 4  }
  0xcf   : > { %4489 = dma.hbm_to_vmem [thread:$0]  (!%p6715_p8), %s5639_s27, 4096, %s5643_s12, %s5610_s19, %s5328_s14, %s5328_s14, %s5329_s22  }
  0xd0   : > { %p6716_p6 = scmp.ne.s32.totalorder %s6708_s5, 0 }
  0xd2   : > { %705 = sbr.rel (%p6716_p6) target bundleno = 3167 (0xc5f), region = 92 }
  0xd9   : > { %s5723_s30 = sand.u32 1, %s5291_s0   ;;  %p6717_p0 = scmp.ne.s32.totalorder %s6698_s25, 0 }
  0xda   : > { %s4458_s26 = smul.u32 384, %s5723_s30  ;;  %s708_s29 = scalar_lea.sflag [#allocation4], %s5723_s30 }
  0xdc   : > { %s5727_s20 = scalar_lea.vmem [#allocation3], %s4458_s26 }
  0xdd   : > { %5258 = dma.done.wait (%p6717_p0), %s708_s29, 6144  }
  0xde   : > { %5260 = vsyncadd (%p6717_p0), %s708_s29, 4294961152  ;;  %s716_s6 = sand.u32 1, %s5487_s23   ;;  %s4459_s5 = smul.u32 192, %s5723_s30 }
  0xdf   : > { %s717_s19 = scalar_lea.sflag [#allocation7], %s716_s6 }
  0xe0   : > { %s5735_s27 = scalar_lea.vmem [#allocation6], %s4459_s5 }
  0xe1   : > { %5262 = dma.done.wait (%p6717_p0), %s717_s19, 3120  }
  0xe2   : > { %5264 = vsyncadd (%p6717_p0), %s717_s19, 4294964176  ;;  %s4460_s12 = smul.u32 3, %s5723_s30  ;;  %s4026_s9 = sshll.u32 %s5723_s30, 8 }
  0xe3   : > { %s735_s24 = scalar_lea.sflag [#allocation10], %s716_s6  ;;  %s5745_s4 = scalar_lea.vmem [#allocation9], %s4026_s9 }
  0xe4   : > { %s5743_s18 = scalar_lea.vmem [#allocation8], %s4460_s12  ;;  %6718 = sst [smem:[#allocation33_spill]] %s5745_s4 }
  0xe5   : > { %5266 = dma.done.wait (%p6717_p0), %s735_s24, 8192  }
  0xe6   : > { %5268 = vsyncadd (%p6717_p0), %s735_s24, 4294959104  ;;  %s6719_s23 = sld [smem:[#allocation18_spill]]  ;;  %s6720_s8 = sld [smem:[#allocation23_spill]] }
  0xe7   : > { %s6721_s28 = sld [smem:[#allocation22_spill]]  ;;  %s6722_s13 = sld [smem:[#allocation35_spill]] }
  0xe8   : > { %s6723_s22 = sld [smem:[#allocation34_spill]]  ;;  %s6724_s19 = sld [smem:[#allocation47_spill]] }
  0xe9   : > { %s6726_s3 = sld [smem:[#allocation46_spill]]  ;;  %s6728_s4 = sld [smem:[#allocation49_spill]] }
  0xea   : > { %s5794_s5 = scalar_lea.vmem [#allocation11], %s4026_s9 }
  0xec   : > { %s6661_s10 = sand.u32 1, %s6719_s23   ;;  %p847_p8 = scmp.lt.s32.totalorder %s6720_s8, 1 }
  0xed   : > { %s4028_s15 = sshll.u32 %s6661_s10, 4  ;;  %p855_p12 = scmp.lt.s32.totalorder %s6721_s28, 1 }
  0xee   : > { %s6767_s8 = smov (!%p847_p8, %s6720_s8), 1  ;;  %s6725_s10 = sld [smem:[#allocation43_spill]] }
  0xef   : > { %s5758_s17 = scalar_select %p855_p12, %s6721_s28, 1 }
  0xf0   : > { %s4211_s25 = sshll.u32 %s6767_s8, 5  ;;  %s5763_s1 = scalar_lea.vmem %s6722_s13, %s6767_s8 }
  0xf1   : > { %s851_s30 = scalar_lea.vmem %s6723_s22, %s4211_s25  ;;  %s4461_s26 = smul.u32 6, %s5758_s17 }
  0xf2   : > { %s4212_s29 = sshll.u32 %s5758_s17, 6  ;;  %s866_s12 = scalar_lea.vmem %s6724_s19, %s5758_s17 }
  0xf3   : > { %s5782_s8 = scalar_lea.vmem %s6726_s3, %s4212_s29  ;;  %s4033_s7 = sshll.u32 %s5758_s17, 2 }
  0xf4   : > { %s5777_s11 = scalar_lea.vmem %s6725_s10, %s4461_s26  ;;  %s6727_s25 = sld [smem:[#allocation51_spill]] }
  0xf5   : > { %s5792_s6 = scalar_lea.vmem %s6728_s4, %s4033_s7  ;;  %s5796_s19 = scalar_lea.vmem [#allocation12], %s4028_s15 }
  0xf6   : > { %p4034_p13 = scmp.ne.s32.totalorder %s6721_s28, 0 }
  0xf7   : > { %s6729_s10 = sld [smem:[#allocation40_spill]] (!%p4034_p13)  ;;  %v879_v1 = vld [vmem:[%s851_s30] sm:$0xff] (!%p4034_p13)  ;;  %v880_v2 = vld [vmem:[%s851_s30 + $0x8] sm:$0xff] (!%p4034_p13)  ;;  %vm900_vm0 = vcmask (!%p4034_p13), 130048   ;;  %v881_v3 = vld [vmem:[%s851_s30 + $0x10] sm:$0xff] (!%p4034_p13)  ;;  %v5330_v6 = vmov (!%p4034_p13), 0  }
  0xf8   : > { %878 = sbr.rel (%p4034_p13) target bundleno = 482 (0x1e2), region = 116  ;;  %v883_v4 = vpack.c.bf16 (!%p4034_p13), %v880_v2, %v879_v1  ;;  %v882_v5 = vld [vmem:[%s851_s30 + $0x18] sm:$0xff] (!%p4034_p13)  ;;  %4600 = vset.pattern.permute.xlu1 (!%p4034_p13), %v5330_v6  ;;  %s6730_s4 = sld [smem:[#allocation38_spill]] (!%p4034_p13)  ;;  %4599 = vset.pattern.permute.xlu0 (!%p4034_p13), %v5330_v6  ;;  %v4039_v23 = vld [vmem:[%s5763_s1] ss:$0 sm:$0xff] (!%p4034_p13) }
  0xf9   : > { %v884_v9 = vpack.c.bf16 (!%p4034_p13), %v882_v5, %v881_v3  ;;  %s6731_s7 = sld [smem:[#allocation39_spill]] (!%p4034_p13)  ;;  %s6732_s9 = sld [smem:[#allocation41_spill]] (!%p4034_p13) }
  0xfa   : > { %s873_s14 = scalar_lea.vmem %s6727_s25, %s5758_s17  ;;  %4336 = vmatprep.mubr.msk.bf16.mxu0 (!%p4034_p13), %vm900_vm0, %v883_v4  ;;  %s6733_s26 = sld [smem:[#allocation37_spill]] (!%p4034_p13) }
  0xfd   : > { %v4601_v0 = vld [vmem:[%s6729_s10] sm:$0xff] (!%p4034_p13)  }
  0xfe   : > { %4334 = vmatprep.subr.bf16.mxu0 (!%p4034_p13), %v4601_v0  ;;  %v958_v7 = vld [vmem:[%s6730_s4 + $0x10] sm:$0xff] (!%p4034_p13)  ;;  %v956_v8 = vld [vmem:[%s6730_s4] sm:$0xff] (!%p4034_p13)  ;;  %v959_v10 = vld [vmem:[%s6730_s4 + $0x18] sm:$0xff] (!%p4034_p13) }
  0xff   : > { %4335 = vmatpush3.bf16.msra.mxu0 %v4601_v0  ;;  %972 = vperm.xlu1 %4600, %v958_v7   ;;  %v957_v11 = vld [vmem:[%s6730_s4 + $0x8] sm:$0xff]  ;;  %v985_v13 = vld [vmem:[%s6731_s7] sm:$0xff]  ;;  %v988_v14 = vld [vmem:[%s6731_s7 + $0x18] sm:$0xff] }
 0x100   : > { %962 = vperm.xlu0 %4599, %v956_v8   ;;  %v986_v12 = vld [vmem:[%s6731_s7 + $0x8] sm:$0xff]  ;;  %v987_v15 = vld [vmem:[%s6731_s7 + $0x10] sm:$0xff]  ;;  %v4035_v22 = vld [vmem:[%s6732_s9] ss:$0 sm:$0xff] }
 0x101   : > { %v1025_v36 = vld [vmem:[%s6733_s26 + $0x10] sm:$0xff]  ;;  %v1023_v41 = vld [vmem:[%s6733_s26] sm:$0xff]  ;;  %v1026_v45 = vld [vmem:[%s6733_s26 + $0x18] sm:$0xff] }
 0x102   : > { %4337 = vmatmul.mubr.msk.bf16.vlgmr.msra.gmra.mrb[0].mxu0 %vm900_vm0, %v884_v9  ;;  %v1024_v49 = vld [vmem:[%s6733_s26 + $0x8] sm:$0xff] }
 0x103   : > { %977 = vperm.xlu1 %4600, %v959_v10  }
 0x104   : > { %967 = vperm.xlu0 %4599, %v957_v11  }
 0x107   : > { %1002 = vperm.xlu1 %4600, %v986_v12  }
 0x108   : > { %997 = vperm.xlu0 %4599, %v985_v13  }
 0x10b   : > { %1012 = vperm.xlu1 %4600, %v988_v14  }
 0x10c   : > { %1007 = vperm.xlu0 %4599, %v987_v15  }
 0x17e   : > { %v973_v17 = vpop.permute.xlu1 %972 }
 0x17f   : > { %v963_v16 = vpop.permute.xlu0 %962 }
 0x182   : > { %v978_v19 = vpop.permute.xlu1 %977 }
 0x183   : > { %v968_v18 = vpop.permute.xlu0 %967 }
 0x186   : > { %v1003_v21 = vpop.permute.xlu1 %1002 }
 0x187   : > { %v998_v20 = vpop.permute.xlu0 %997  ;;  %v1016_v43 = vmul.f32 %v4039_v23, %v1003_v21 }
 0x188   : > { %v1015_v35 = vmul.f32 %v4039_v23, %v998_v20 }
 0x18a   : > { %v1013_v28 = vpop.permute.xlu1 %1012 }
 0x18b   : > { %v1008_v24 = vpop.permute.xlu0 %1007  ;;  %v1018_v39 = vmul.f32 %v4039_v23, %v1013_v28 }
 0x18c   : > { %v1017_v31 = vmul.f32 %v4039_v23, %v1008_v24 }
 0x1d5   : > { %v4338_v25 = vpop.f32.mrb[0].mxu0 }
 0x1d6   : > { %v950_v26 = vadd.f32 %v4338_v25, %v4035_v22  ;;  %v941_v27 = vpop.f32.mrb[1].mxu0 }
 0x1d7   : > { %v942_v29 = vadd.f32 %v4035_v22, %v941_v27  ;;  %v4339_v30 = vpop.f32.mrb[2].mxu0 }
 0x1d8   : > { %v982_v32 = vmul.f32 %v973_v17, %v950_v26  ;;  %v953_v33 = vadd.f32 %v4339_v30, %v4035_v22  ;;  %v944_v34 = vpop.f32.mrb[3].mxu0 }
 0x1d9   : > { %v980_v37 = vmul.f32 %v963_v16, %v942_v29  ;;  %v945_v38 = vadd.f32 %v4035_v22, %v944_v34 }
 0x1da   : > { %v1021_v40 = vadd.f32 %v1017_v31, %v982_v32  ;;  %v983_v42 = vmul.f32 %v978_v19, %v953_v33 }
 0x1db   : > { %v1019_v44 = vadd.f32 %v1015_v35, %v980_v37  ;;  %v981_v46 = vmul.f32 %v968_v18, %v945_v38 }
 0x1dc   : > { %v1029_v47 = vadd.f32 %v1025_v36, %v1021_v40  ;;  %v1022_v48 = vadd.f32 %v1018_v39, %v983_v42 }
 0x1dd   : > { %v1027_v50 = vadd.f32 %v1023_v41, %v1019_v44  ;;  %v1020_v51 = vadd.f32 %v1016_v43, %v981_v46 }
 0x1de   : > { %1033 = vst [vmem:[#allocation2 + $0x10] sm:$0xff] %v1029_v47  ;;  %v1030_v52 = vadd.f32 %v1026_v45, %v1022_v48 }
 0x1df   : > { %1031 = vst [vmem:[#allocation2] sm:$0xff] %v1027_v50  ;;  %v1028_v53 = vadd.f32 %v1024_v49, %v1020_v51 }
 0x1e0   : > { %1034 = vst [vmem:[#allocation2 + $0x18] sm:$0xff] %v1030_v52 }
 0x1e1   : > { %1032 = vst [vmem:[#allocation2 + $0x8] sm:$0xff] %v1028_v53 }
 0x1e2 PF: > { %v4722_v58 = vld [vmem:[%s5727_s20 + $0x4] ss:$24 sps:$4 sm:$0xff]   ;;  %v4724_v59 = vld [vmem:[%s5727_s20] ss:$24 sps:$4 sm:$0xff]   ;;  %v5331_v60 = vmov 0   ;;  %vm1990_vm1 = vcmask 261120  }
 0x1e3   : > { %1400 = vmatprep.mubr.bf16.mxu0 %v5331_v60  ;;  %1441 = vmatprep.mubr.bf16.mxu1 %v5331_v60  ;;  %v4725_v61 = vld [vmem:[%s5727_s20 + $0x34] ss:$24 sps:$4 sm:$0xff]   ;;  %v4727_v62 = vld [vmem:[%s5727_s20 + $0x30] ss:$24 sps:$4 sm:$0xff]   ;;  %v4728_v63 = vld [vmem:[%s5727_s20 + $0x64] ss:$24 sps:$4 sm:$0xff]  }
 0x1e4   : > { %1368 = vmatprep.subr.bf16.mxu0 %v4722_v58  ;;  %v4730_v0 = vld [vmem:[%s5727_s20 + $0x60] ss:$24 sps:$4 sm:$0xff]   ;;  %v4731_v1 = vld [vmem:[%s5727_s20 + $0x94] ss:$24 sps:$4 sm:$0xff]   ;;  %v4733_v2 = vld [vmem:[%s5727_s20 + $0x90] ss:$24 sps:$4 sm:$0xff]  }
 0x1e5   : > { %v5846_v55 = vld [vmem:[#allocation2 + $0x10] sm:$0xff]  ;;  %1369 = vmatpush1.bf16.msra.mxu0 %v4724_v59  ;;  %v4745_v3 = vld [vmem:[%s5727_s20 + $0xc] ss:$24 sps:$4 sm:$0xff]   ;;  %v4748_v4 = vld [vmem:[%s5727_s20 + $0x8] ss:$24 sps:$4 sm:$0xff]   ;;  %s6734_s25 = sld [smem:[#allocation36_spill]] }
 0x1e6   : > { %v5844_v54 = vld [vmem:[#allocation2] sm:$0xff]  ;;  %1495 = vadd.xlane.f32.xlu1 %v5846_v55  ;;  %1370 = vmatprep.subr.bf16.mxu0 %v4725_v61  ;;  %v4749_v5 = vld [vmem:[%s5727_s20 + $0x3c] ss:$24 sps:$4 sm:$0xff]   ;;  %v4754_v9 = vld [vmem:[%s5727_s20 + $0x38] ss:$24 sps:$4 sm:$0xff]   ;;  %vm2691_vm2 = vcmask 523264  }
 0x1e7   : > { %1491 = vadd.xlane.f32.xlu0 %v5844_v54  ;;  %v5852_v57 = vld [vmem:[#allocation2 + $0x18] sm:$0xff]  ;;  %1409 = vmatprep.subr.bf16.mxu1 %v4745_v3  ;;  %v1039_v7 = vld [vmem:[%s5763_s1] sm:$0x1]  ;;  %v4755_v10 = vld [vmem:[%s5727_s20 + $0x6c] ss:$24 sps:$4 sm:$0xff]   ;;  %vm2696_vm3 = vcmask 785408  }
 0x1e8   : > { %v5848_v56 = vld [vmem:[#allocation2 + $0x8] sm:$0xff]  ;;  %v4734_v6 = vld [vmem:[%s5727_s20 + $0xc4] ss:$24 sps:$4 sm:$0xff]   ;;  %1410 = vmatpush1.bf16.msra.mxu1 %v4748_v4  ;;  %v4040_v8 = vmul.f32 -1.442695, %v1039_v7  ;;  %s6738_s17 = sld [smem:[#allocation22_spill]] }
 0x1e9   : > { %1371 = vmatpush1.bf16.msra.mxu0 %v4727_v62  ;;  %1411 = vmatprep.subr.bf16.mxu1 %v4749_v5  ;;  %v4736_v11 = vld [vmem:[%s5727_s20 + $0xc0] ss:$24 sps:$4 sm:$0xff]   ;;  %v4737_v12 = vld [vmem:[%s5727_s20 + $0xf4] ss:$24 sps:$4 sm:$0xff]   ;;  %v4739_v15 = vld [vmem:[%s5727_s20 + $0xf0] ss:$24 sps:$4 sm:$0xff]  }
 0x1ea   : > { %1497 = vadd.xlane.f32.xlu1 %v5852_v57  ;;  %1372 = vmatprep.subr.bf16.mxu0 %v4728_v63  ;;  %4914 = vpow2.f32 %v4040_v8  ;;  %v4760_v13 = vld [vmem:[%s5727_s20 + $0x68] ss:$24 sps:$4 sm:$0xff]   ;;  %v4761_v14 = vld [vmem:[%s5727_s20 + $0x9c] ss:$24 sps:$4 sm:$0xff]   ;;  %v4766_v17 = vld [vmem:[%s5727_s20 + $0x98] ss:$24 sps:$4 sm:$0xff]  }
 0x1eb   : > { %1493 = vadd.xlane.f32.xlu0 %v5848_v56  ;;  %v4740_v16 = vld [vmem:[%s5727_s20 + $0x124] ss:$24 sps:$4 sm:$0xff]   ;;  %v4742_v19 = vld [vmem:[%s5727_s20 + $0x120] ss:$24 sps:$4 sm:$0xff]   ;;  %v4743_v20 = vld [vmem:[%s5727_s20 + $0x154] ss:$24 sps:$4 sm:$0xff]  }
 0x1ec   : > { %1412 = vmatpush1.bf16.msra.mxu1 %v4754_v9  ;;  %v4767_v18 = vld [vmem:[%s5727_s20 + $0xcc] ss:$24 sps:$4 sm:$0xff]   ;;  %v4772_v21 = vld [vmem:[%s5727_s20 + $0xc8] ss:$24 sps:$4 sm:$0xff]   ;;  %v4773_v23 = vld [vmem:[%s5727_s20 + $0xfc] ss:$24 sps:$4 sm:$0xff]  }
 0x1ed   : > { %1373 = vmatpush1.bf16.msra.mxu0 %v4730_v0  ;;  %1413 = vmatprep.subr.bf16.mxu1 %v4755_v10  ;;  %v4747_v25 = vld [vmem:[%s5727_s20 + $0x150] ss:$24 sps:$4 sm:$0xff]   ;;  %v4753_v26 = vld [vmem:[%s5727_s20 + $0x14] ss:$24 sps:$4 sm:$0xff]   ;;  %v4759_v35 = vld [vmem:[%s5727_s20 + $0x44] ss:$24 sps:$4 sm:$0xff]  }
 0x1ee   : > { %1374 = vmatprep.subr.bf16.mxu0 %v4731_v1  ;;  %v4778_v27 = vld [vmem:[%s5727_s20 + $0xf8] ss:$24 sps:$4 sm:$0xff]   ;;  %v4779_v28 = vld [vmem:[%s5727_s20 + $0x12c] ss:$24 sps:$4 sm:$0xff]   ;;  %v4784_v29 = vld [vmem:[%s5727_s20 + $0x128] ss:$24 sps:$4 sm:$0xff]  }
 0x1ef   : > { %v4785_v30 = vld [vmem:[%s5727_s20 + $0x15c] ss:$24 sps:$4 sm:$0xff]   ;;  %v4790_v31 = vld [vmem:[%s5727_s20 + $0x158] ss:$24 sps:$4 sm:$0xff]   ;;  %v4794_v50 = vld [vmem:[%s5735_s27] ss:$12 sps:$4 sm:$0xff]  }
 0x1f0   : > { %1414 = vmatpush1.bf16.msra.mxu1 %v4760_v13  ;;  %v4751_v33 = vld [vmem:[%s5727_s20 + $0x10] ss:$24 sps:$4 sm:$0xff]   ;;  %v4757_v37 = vld [vmem:[%s5727_s20 + $0x40] ss:$24 sps:$4 sm:$0xff]   ;;  %v4765_v38 = vld [vmem:[%s5727_s20 + $0x74] ss:$24 sps:$4 sm:$0xff]  }
 0x1f1   : > { %1375 = vmatpush1.bf16.msra.mxu0 %v4733_v2  ;;  %1415 = vmatprep.subr.bf16.mxu1 %v4761_v14  ;;  %v4763_v39 = vld [vmem:[%s5727_s20 + $0x70] ss:$24 sps:$4 sm:$0xff]   ;;  %v4771_v40 = vld [vmem:[%s5727_s20 + $0xa4] ss:$24 sps:$4 sm:$0xff]   ;;  %v4769_v41 = vld [vmem:[%s5727_s20 + $0xa0] ss:$24 sps:$4 sm:$0xff]  }
 0x1f2   : > { %1376 = vmatprep.subr.bf16.mxu0 %v4734_v6  ;;  %v4777_v42 = vld [vmem:[%s5727_s20 + $0xd4] ss:$24 sps:$4 sm:$0xff]   ;;  %v4775_v43 = vld [vmem:[%s5727_s20 + $0xd0] ss:$24 sps:$4 sm:$0xff]   ;;  %v4783_v44 = vld [vmem:[%s5727_s20 + $0x104] ss:$24 sps:$4 sm:$0xff]  }
 0x1f3   : > { %v4781_v45 = vld [vmem:[%s5727_s20 + $0x100] ss:$24 sps:$4 sm:$0xff]   ;;  %v4789_v46 = vld [vmem:[%s5727_s20 + $0x134] ss:$24 sps:$4 sm:$0xff]   ;;  %v4787_v47 = vld [vmem:[%s5727_s20 + $0x130] ss:$24 sps:$4 sm:$0xff]  }
 0x1f4   : > { %1416 = vmatpush1.bf16.msra.mxu1 %v4766_v17  ;;  %v4915_v22 = vpop.eup %4914  ;;  %v4793_v48 = vld [vmem:[%s5727_s20 + $0x164] ss:$24 sps:$4 sm:$0xff]   ;;  %v4791_v49 = vld [vmem:[%s5727_s20 + $0x160] ss:$24 sps:$4 sm:$0xff]   ;;  %v4800_v53 = vld [vmem:[%s5735_s27 + $0x8] ss:$12 sps:$4 sm:$0xff]  }
 0x1f5   : > { %1377 = vmatpush1.bf16.msra.mxu0 %v4736_v11  ;;  %1417 = vmatprep.subr.bf16.mxu1 %v4767_v18  ;;  %v1043_v24 = vadd.f32 1.0, %v4915_v22  ;;  %v4796_v51 = vld [vmem:[%s5735_s27 + $0x4] ss:$12 sps:$4 sm:$0xff]   ;;  %v4799_v52 = vld [vmem:[%s5735_s27 + $0x1c] ss:$12 sps:$4 sm:$0xff]   ;;  %s5332_s20 = smov 96  }
 0x1f6   : > { %1378 = vmatprep.subr.bf16.mxu0 %v4737_v12  ;;  %v4797_v58 = vld [vmem:[%s5735_s27 + $0x18] ss:$12 sps:$4 sm:$0xff]   ;;  %v4804_v10 = vld [vmem:[%s5735_s27 + $0x20] ss:$12 sps:$4 sm:$0xff]   ;;  %v4805_v13 = vld [vmem:[%s5735_s27 + $0x48] ss:$12 sps:$4 sm:$0xff]  }
 0x1f7   : > { %4916 = vrcp.f32 %v1043_v24  ;;  %v4807_v11 = vld [vmem:[%s5735_s27 + $0x4c] ss:$12 sps:$4 sm:$0xff]   ;;  %v4811_v14 = vld [vmem:[%s5735_s27 + $0x64] ss:$12 sps:$4 sm:$0xff]   ;;  %v4815_v17 = vld [vmem:[%s5735_s27 + $0x7c] ss:$12 sps:$4 sm:$0xff]  }
 0x1f8   : > { %1418 = vmatpush1.bf16.msra.mxu1 %v4772_v21  ;;  %v4808_v12 = vld [vmem:[%s5735_s27 + $0x38] ss:$12 sps:$4 sm:$0xff]   ;;  %v4816_v18 = vld [vmem:[%s5735_s27 + $0x68] ss:$12 sps:$4 sm:$0xff]   ;;  %v4820_v21 = vld [vmem:[%s5735_s27 + $0x80] ss:$12 sps:$4 sm:$0xff]  }
 0x1f9   : > { %1379 = vmatpush1.bf16.msra.mxu0 %v4739_v15  ;;  %1419 = vmatprep.subr.bf16.mxu1 %v4773_v23  ;;  %v4812_v15 = vld [vmem:[%s5735_s27 + $0x50] ss:$12 sps:$4 sm:$0xff]   ;;  %v4823_v23 = vld [vmem:[%s5735_s27 + $0xac] ss:$12 sps:$4 sm:$0xff]   ;;  %p4203_p7 = scmp.ne.s32.totalorder %s6738_s17, 1 }
 0x1fa   : > { %1380 = vmatprep.subr.bf16.mxu0 %v4740_v16  ;;  %v4809_v16 = vld [vmem:[%s5735_s27 + $0x60] ss:$12 sps:$4 sm:$0xff]   ;;  %v4817_v22 = vld [vmem:[%s5735_s27 + $0x90] ss:$12 sps:$4 sm:$0xff]   ;;  %v4824_v24 = vld [vmem:[%s5735_s27 + $0x98] ss:$12 sps:$4 sm:$0xff]  }
 0x1fc   : > { %1420 = vmatpush1.bf16.msra.mxu1 %v4778_v27 }
 0x1fd   : > { %1381 = vmatpush1.bf16.msra.mxu0 %v4742_v19  ;;  %1421 = vmatprep.subr.bf16.mxu1 %v4779_v28  ;;  %v4813_v19 = vld [vmem:[%s5735_s27 + $0x78] ss:$12 sps:$4 sm:$0xff]  }
 0x1fe   : > { %1382 = vmatprep.subr.bf16.mxu0 %v4743_v20  ;;  %v4819_v20 = vld [vmem:[%s5735_s27 + $0x94] ss:$12 sps:$4 sm:$0xff]  }
 0x200   : > { %1422 = vmatpush1.bf16.msra.mxu1 %v4784_v29 }
 0x201   : > { %1383 = vmatpush1.bf16.msra.mxu0 %v4747_v25  ;;  %1423 = vmatprep.subr.bf16.mxu1 %v4785_v30  ;;  %v4917_v32 = vpop.eup %4916  ;;  %v4821_v25 = vld [vmem:[%s5735_s27 + $0xa8] ss:$12 sps:$4 sm:$0xff]  }
 0x202   : > { %1450 = vmatprep.subr.bf16.mxu0 %v4753_v26  ;;  %v1046_v34 = vmul.f32 %v4917_v32, %v1039_v7  ;;  %v4825_v26 = vld [vmem:[%s5735_s27 + $0xb0] ss:$12 sps:$4 sm:$0xff]  }
 0x204   : > { %1424 = vmatpush1.bf16.msra.mxu1 %v4790_v31  ;;  %v1047_v36 = vpack.c.bf16 %v1046_v34, %v1046_v34 }
 0x205   : > { %1732 = vmatprep.subr.bf16.mxu1 %v4796_v51 }
 0x206   : > { %1401 = vmatmul.mubr.bf16.vlgmr.msra.gmra.mrb[0].mxu0 %v1047_v36 }
 0x207   : > { %1442 = vmatmul.mubr.bf16.vlgmr.msra.gmra.mrb[0].mxu1 %v1047_v36  ;;  %1451 = vmatpush1.bf16.msra.mxu0 %v4751_v33 }
 0x208   : > { %1482 = vmatprep.mubr.bf16.mxu0 %v5331_v60  ;;  %1452 = vmatprep.subr.bf16.mxu0 %v4759_v35  ;;  %v1338_v35 = vlaneseq }
 0x209   : > { %1764 = vmatprep.mubr.bf16.mxu1 %v5331_v60  ;;  %1733 = vmatpush1.bf16.msra.mxu1 %v4794_v50 }
 0x20a   : > { %1734 = vmatprep.subr.bf16.mxu1 %v4799_v52 }
 0x20b   : > { %1453 = vmatpush1.bf16.msra.mxu0 %v4757_v37 }
 0x20c   : > { %1454 = vmatprep.subr.bf16.mxu0 %v4765_v38 }
 0x20d   : > { %1735 = vmatpush1.bf16.msra.mxu1 %v4797_v58 }
 0x20f   : > { %1455 = vmatpush1.bf16.msra.mxu0 %v4763_v39 }
 0x210   : > { %1456 = vmatprep.subr.bf16.mxu0 %v4771_v40 }
 0x213   : > { %1457 = vmatpush1.bf16.msra.mxu0 %v4769_v41  ;;  %v1096_v41 = vld [vmem:[%s5777_s11] sm:$0x3f] }
 0x214   : > { %1458 = vmatprep.subr.bf16.mxu0 %v4777_v42 }
 0x217   : > { %1459 = vmatpush1.bf16.msra.mxu0 %v4775_v43 }
 0x218   : > { %1460 = vmatprep.subr.bf16.mxu0 %v4783_v44 }
 0x21b   : > { %1461 = vmatpush1.bf16.msra.mxu0 %v4781_v45 }
 0x21c   : > { %1462 = vmatprep.subr.bf16.mxu0 %v4789_v46 }
 0x21f   : > { %1463 = vmatpush1.bf16.msra.mxu0 %v4787_v47 }
 0x220   : > { %1464 = vmatprep.subr.bf16.mxu0 %v4793_v48 }
 0x223   : > { %1465 = vmatpush1.bf16.msra.mxu0 %v4791_v49 }
 0x224   : > { %4340 = vmatprep.subr.bf16.mxu0 %v4800_v53 }
 0x226   : > { %1483 = vmatmul.mubr.bf16.vlgmr.msra.gmra.mrb[4].mxu0 %v1047_v36  ;;  %v5959_v36 = vshrl.u32 %v1338_v35, 7 }
 0x227   : > { %4341 = vmatpush3.bf16.msra.mxu0 %v4800_v53 }
 0x228   : > { %4342 = vmatprep.subr.bf16.mxu0 %v4804_v10  ;;  %v5962_v37 = vsub.s32 2, %v5959_v36  ;;  %v1356_v49 = vsub.s32 4, %v5959_v36 }
 0x22a   : > { %v1349_v44 = vrot.slane %v1096_v41, %v5962_v37 }
 0x22b   : > { %4343 = vmatpush3.bf16.msra.mxu0 %v4804_v10 }
 0x22c   : > { %4344 = vmatprep.subr.bf16.mxu0 %v4808_v12 }
 0x22f   : > { %4345 = vmatpush3.bf16.msra.mxu0 %v4808_v12 }
 0x230   : > { %4346 = vmatprep.subr.bf16.mxu0 %v4812_v15 }
 0x233   : > { %4347 = vmatpush3.bf16.msra.mxu0 %v4812_v15 }
 0x234   : > { %4348 = vmatprep.subr.bf16.mxu0 %v4816_v18 }
 0x237   : > { %4349 = vmatpush3.bf16.msra.mxu0 %v4816_v18 }
 0x238   : > { %4350 = vmatprep.subr.bf16.mxu0 %v4820_v21 }
 0x23b   : > { %4351 = vmatpush3.bf16.msra.mxu0 %v4820_v21 }
 0x23c   : > { %4352 = vmatprep.subr.bf16.mxu0 %v4824_v24 }
 0x23f   : > { %4353 = vmatpush3.bf16.msra.mxu0 %v4824_v24 }
 0x240   : > { %4354 = vmatprep.subr.bf16.mxu0 %v4825_v26 }
 0x243   : > { %4355 = vmatpush3.bf16.msra.mxu0 %v4825_v26 }
 0x273   : > { %v1496_v61 = vpop.xlane.xlu1 %1495 }
 0x274   : > { %v1492_v59 = vpop.xlane.xlu0 %1491  ;;  %v1502_v63 = vmul.f32 0.0078125, %v1496_v61  ;;  %v1357_v61 = vrot.slane %v1096_v41, %v1356_v49 }
 0x275   : > { %v1500_v62 = vmul.f32 0.0078125, %v1492_v59 }
 0x276   : > { %v5918_v1 = vsub.f32 %v5846_v55, %v1502_v63 }
 0x277   : > { %v5915_v0 = vsub.f32 %v5844_v54, %v1500_v62  ;;  %v1498_v3 = vpop.xlane.xlu1 %1497 }
 0x278   : > { %v1494_v2 = vpop.xlane.xlu0 %1493  ;;  %v1503_v6 = vmul.f32 0.0078125, %v1498_v3  ;;  %v1510_v55 = vmul.f32 %v5918_v1, %v5918_v1  ;;  %v5970_v3 = vsub.s32 0, %v5959_v36 }
 0x279   : > { %v1501_v4 = vmul.f32 0.0078125, %v1494_v2  ;;  %v1508_v5 = vmul.f32 %v5915_v0, %v5915_v0 }
 0x27a   : > { %v5926_v54 = vsub.f32 %v5852_v57, %v1503_v6  ;;  %v4801_v57 = vld [vmem:[%s5735_s27 + $0x30] ss:$12 sps:$4 sm:$0xff]  }
 0x27b   : > { %v5923_v7 = vsub.f32 %v5848_v56, %v1501_v4  ;;  %1512 = vadd.xlane.f32.xlu0 %v1508_v5  ;;  %v4803_v56 = vld [vmem:[%s5735_s27 + $0x34] ss:$12 sps:$4 sm:$0xff]   ;;  %s5333_s27 = smov 64  }
 0x27c   : > { %v1511_v9 = vmul.f32 %v5926_v54, %v5926_v54  ;;  %1736 = vmatprep.subr.bf16.mxu1 %v4803_v56 }
 0x27d   : > { %v1509_v8 = vmul.f32 %v5923_v7, %v5923_v7  ;;  %1737 = vmatpush1.bf16.msra.mxu1 %v4801_v57 }
 0x27e   : > { %1738 = vmatprep.subr.bf16.mxu1 %v4807_v11 }
 0x27f   : > { %1516 = vadd.xlane.f32.xlu0 %v1510_v55  ;;  %1514 = vadd.xlane.f32.xlu1 %v1509_v8 }
 0x281   : > { %1739 = vmatpush1.bf16.msra.mxu1 %v4805_v13 }
 0x282   : > { %1740 = vmatprep.subr.bf16.mxu1 %v4811_v14 }
 0x283   : > { %1518 = vadd.xlane.f32.xlu1 %v1511_v9 }
 0x285   : > { %1741 = vmatpush1.bf16.msra.mxu1 %v4809_v16 }
 0x286   : > { %1742 = vmatprep.subr.bf16.mxu1 %v4815_v17 }
 0x289   : > { %1743 = vmatpush1.bf16.msra.mxu1 %v4813_v19 }
 0x28a   : > { %1744 = vmatprep.subr.bf16.mxu1 %v4819_v20 }
 0x28d   : > { %1745 = vmatpush1.bf16.msra.mxu1 %v4817_v22  ;;  %v5982_v22 = vsub.s32 1, %v5959_v36 }
 0x28e   : > { %1746 = vmatprep.subr.bf16.mxu1 %v4823_v23 }
 0x291   : > { %1747 = vmatpush1.bf16.msra.mxu1 %v4821_v25 }
 0x2d9   : > { %v5953_v27 = vpop.f32.mrb[0].mxu0 }
 0x2da   : > { %v1443_v28 = vpop.f32.mrb[0].mxu1  ;;  %v5955_v29 = vpop.f32.mrb[1].mxu0 }
 0x2db   : > { %v5957_v30 = vpop.f32.mrb[1].mxu1  ;;  %v1406_v31 = vpop.f32.mrb[2].mxu0  ;;  %v1444_v52 = vadd.f32 %v1443_v28, %v1349_v44 }
 0x2dc   : > { %v1447_v32 = vpop.f32.mrb[2].mxu1  ;;  %v1407_v33 = vpop.f32.mrb[3].mxu0 }
 0x2dd   : > { %v1448_v34 = vpop.f32.mrb[3].mxu1  ;;  %v1536_v63 = vadd.f32 1.0, %v1444_v52 }
 0x2df   : > { %v1540_v5 = vrot.slane %v1536_v63, %v5970_v3 }
 0x2f9   : > { %v1484_v38 = vpop.f32.mrb[4].mxu0 }
 0x2fa   : > { %v5964_v40 = vpop.f32.mrb[5].mxu0  ;;  %v1485_v4 = vadd.f32 %v1484_v38, %v1357_v61 }
 0x2fb   : > { %v1488_v43 = vpop.f32.mrb[6].mxu0 }
 0x2fc   : > { %v1489_v45 = vpop.f32.mrb[7].mxu0  ;;  %v1548_v8 = vrot.slane %v1485_v4, %v5970_v3 }
 0x308   : > { %v1513_v39 = vpop.xlane.xlu0 %1512 }
 0x309   : > { %v1520_v42 = vmul.f32 0.0078125, %v1513_v39 }
 0x30b   : > { %v1524_v46 = vadd.f32 1e-06, %v1520_v42 }
 0x30c   : > { %v1515_v47 = vpop.xlane.xlu1 %1514  ;;  %v1517_v48 = vpop.xlane.xlu0 %1516 }
 0x30d   : > { %4918 = vrsqrt.f32 %v1524_v46  ;;  %v1521_v50 = vmul.f32 0.0078125, %v1515_v47  ;;  %v1522_v51 = vmul.f32 0.0078125, %v1517_v48 }
 0x30f   : > { %v1525_v53 = vadd.f32 1e-06, %v1521_v50  ;;  %v1526_v58 = vadd.f32 1e-06, %v1522_v51 }
 0x310   : > { %v1519_v59 = vpop.xlane.xlu1 %1518 }
 0x311   : > { %4920 = vrsqrt.f32 %v1525_v53  ;;  %v1523_v62 = vmul.f32 0.0078125, %v1519_v59 }
 0x312   : > { %4922 = vrsqrt.f32 %v1526_v58 }
 0x313   : > { %v1527_v2 = vadd.f32 1e-06, %v1523_v62 }
 0x315   : > { %4924 = vrsqrt.f32 %v1527_v2 }
 0x317   : > { %v4919_v6 = vpop.eup %4918 }
 0x318   : > { %v1532_v55 = vmul.f32 %v4919_v6, %v5915_v0 }
 0x31a   : > { %v1541_v9 = vmul.f32 %v1540_v5, %v1532_v55 }
 0x31b   : > { %v4921_v56 = vpop.eup %4920 }
 0x31c   : > { %v4923_v10 = vpop.eup %4922  ;;  %v1533_v57 = vmul.f32 %v4921_v56, %v5923_v7  ;;  %v1549_v11 = vadd.f32 %v1548_v8, %v1541_v9  ;;  %v1587_v7 = vld [vmem:[%s5743_s18] sm:$0x7]  ;;  %s5334_s18 = smov 32  }
 0x31d   : > { %v1534_v12 = vmul.f32 %v4923_v10, %v5918_v1  ;;  %v1592_v1 = vrot.slane %v1587_v7, %v5970_v3  ;;  %v1600_v26 = vrot.slane %v1587_v7, %v5962_v37 }
 0x31e   : > { %v1542_v13 = vmul.f32 %v1540_v5, %v1533_v57 }
 0x31f   : > { %v4925_v14 = vpop.eup %4924  ;;  %v1543_v15 = vmul.f32 %v1540_v5, %v1534_v12 }
 0x320   : > { %v1535_v16 = vmul.f32 %v4925_v14, %v5926_v54  ;;  %v1550_v17 = vadd.f32 %v1548_v8, %v1542_v13  ;;  %v1596_v54 = vrot.slane %v1587_v7, %v5982_v22 }
 0x321   : > { %v1551_v18 = vadd.f32 %v1548_v8, %v1543_v15 }
 0x322   : > { %v1544_v19 = vmul.f32 %v1540_v5, %v1535_v16  ;;  %v1553_v0 = vpack.c.bf16 %v1550_v17, %v1549_v11 }
 0x324   : > { %1765 = vmatmul.mubr.bf16.vlgmr.msra.gmra.mrb[4].mxu1 %v1553_v0  ;;  %4356 = vmatprep.mubr.bf16.mxu0 %v1553_v0  ;;  %v1552_v20 = vadd.f32 %v1548_v8, %v1544_v19 }
 0x325   : > { %1774 = vmatprep.mubr.bf16.mxu1 %v5331_v60 }
 0x326   : > { %v1554_v21 = vpack.c.bf16 %v1552_v20, %v1551_v18 }
 0x328   : > { %4357 = vmatmul.mubr.bf16.vlgmr.msra.gmra.mrb[8].mxu0 %v1554_v21 }
 0x32c   : > { %1775 = vmatmul.mubr.bf16.gmra.mrb[8].mxu1 %v1554_v21 }
 0x3f7   : > { %v1766_v23 = vpop.f32.mrb[4].mxu1 }
 0x3f8   : > { %v1767_v24 = vadd.f32 %v1766_v23, %v1592_v1  ;;  %v1768_v25 = vpop.f32.mrb[5].mxu1 }
 0x3f9   : > { %v1770_v28 = vpop.f32.mrb[6].mxu1  ;;  %v1769_v33 = vadd.f32 %v1768_v25, %v1596_v54 }
 0x3fa   : > { %v1771_v31 = vadd.f32 %v1770_v28, %v1592_v1  ;;  %v1772_v32 = vpop.f32.mrb[7].mxu1  ;;  %v1834_v38 = vmul.f32 0.17677669, %v1767_v24 }
 0x3fb   : > { %v1773_v34 = vadd.f32 %v1772_v32, %v1596_v54  ;;  %v4358_v35 = vpop.f32.mrb[8].mxu0 }
 0x3fc   : > { %v1835_v39 = vmul.f32 0.17677669, %v1771_v31  ;;  %v1828_v41 = vadd.f32 %v4358_v35, %v1600_v26  ;;  %v1819_v42 = vpop.f32.mrb[9].mxu0 }
 0x3fd   : > { %v1820_v43 = vadd.f32 %v1819_v42, %v1600_v26  ;;  %v4359_v44 = vpop.f32.mrb[10].mxu0  ;;  %v4602_v45 = vpack.i.bf16 %v1773_v34, %v1769_v33  ;;  %v1926_v46 = vpack.c.bf16 %v1773_v34, %v1769_v33 }
 0x3fe   : > { %v1831_v47 = vadd.f32 %v4359_v44, %v1600_v26  ;;  %v1822_v48 = vpop.f32.mrb[11].mxu0  ;;  %v1878_v49 = vpack.c.bf16 %v1835_v39, %v1834_v38  ;;  %v4612_v50 = vpack.i.bf16 %v1835_v39, %v1834_v38 }
 0x3ff   : > { %v1823_v51 = vadd.f32 %v1822_v48, %v1600_v26  ;;  %4603 = vrot.lane.b32.xlu0 %v4602_v45, %s5332_s20  ;;  %v1776_v52 = vpop.f32.mrb[8].mxu1  ;;  %4444 = vmatprep.subr.msk.bf16.mxu1 %vm1990_vm1, %v1926_v46  ;;  %v1998_v53 = vsel %vm1990_vm1, %v1926_v46, 0 }
 0x400   : > { %v1777_v58 = vadd.f32 %v1776_v52, %v1592_v1  ;;  %v1778_v59 = vpop.f32.mrb[9].mxu1  ;;  %4361 = vmatpush3.bf16.xpose.msra.mxu1 %v1998_v53  ;;  %4364 = vmatprep.mubr.msk.bf16.mxu1 %vm1990_vm1, %v1878_v49  ;;  %v1975_v61 = vpack.c.bf16 %v1831_v47, %v1828_v41  ;;  %v5990_v62 = vpack.i.bf16 %v1831_v47, %v1828_v41 }
 0x401   : > { %v1780_v63 = vpop.f32.mrb[10].mxu1  ;;  %v1974_v2 = vpack.c.bf16 %v1823_v51, %v1820_v43  ;;  %v5992_v4 = vpack.i.bf16 %v1823_v51, %v1820_v43  ;;  %v1779_v55 = vadd.f32 %v1778_v59, %v1596_v54 }
 0x402   : > { %v1781_v5 = vadd.f32 %v1780_v63, %v1592_v1  ;;  %v1782_v6 = vpop.f32.mrb[11].mxu1  ;;  %v1836_v9 = vmul.f32 0.17677669, %v1777_v58 }
 0x403   : > { %v1783_v8 = vadd.f32 %v1782_v6, %v1596_v54  ;;  %4392 = vmatprep.subr.bf16.mxu0 %v1974_v2 }
 0x404   : > { %v1837_v56 = vmul.f32 0.17677669, %v1781_v5  ;;  %4393 = vmatpush3.bf16.msra.mxu0 %v1974_v2 }
 0x405   : > { %4394 = vmatprep.subr.bf16.mxu0 %v1975_v61  ;;  %v4607_v10 = vpack.i.bf16 %v1783_v8, %v1779_v55  ;;  %v1927_v57 = vpack.c.bf16 %v1783_v8, %v1779_v55 }
 0x406   : > { %v1879_v11 = vpack.c.bf16 %v1837_v56, %v1836_v9  ;;  %v4622_v12 = vpack.i.bf16 %v1837_v56, %v1836_v9 }
 0x407   : > { %4608 = vrot.lane.b32.xlu1 %v4607_v10, %s5332_s20  ;;  %4445 = vmatprep.subr.msk.bf16.mxu1 %vm1990_vm1, %v1927_v57  ;;  %v2001_v13 = vsel %vm1990_vm1, %v1927_v57, 0 }
 0x408   : > { %4363 = vmatpush3.bf16.xpose.msra.mxu1 %v2001_v13  ;;  %4395 = vmatpush3.bf16.msra.mxu0 %v1975_v61 }
 0x409   : > { %4623 = vrot.lane.b32.xlu0 %v4622_v12, %s5332_s20 }
 0x40b   : > { %4613 = vrot.lane.b32.xlu1 %v4612_v50, %s5332_s20 }
 0x40d   : > { %4633 = vrot.lane.b32.xlu0 %v4612_v50, %s5333_s27 }
 0x40f   : > { %4618 = vrot.lane.b32.xlu1 %v4602_v45, %s5333_s27  ;;  %4365 = vmatmul.mubr.msk.bf16.vlgmr.msra.gmra.mrb[12].mxu1 %vm1990_vm1, %v1879_v11 }
 0x411   : > { %4643 = vrot.lane.b32.xlu0 %v4622_v12, %s5333_s27 }
 0x413   : > { %4628 = vrot.lane.b32.xlu1 %v4607_v10, %s5333_s27 }
 0x415   : > { %4653 = vrot.lane.b32.xlu0 %v4612_v50, %s5334_s18 }
 0x417   : > { %4638 = vrot.lane.b32.xlu1 %v4602_v45, %s5334_s18 }
 0x41b   : > { %4648 = vrot.lane.b32.xlu1 %v4607_v10, %s5334_s18 }
 0x41f   : > { %4658 = vrot.lane.b32.xlu1 %v4622_v12, %s5334_s18 }
 0x471   : > { %v4604_v14 = vpop.permute.xlu0 %4603 }
 0x472   : > { %v4606_v15 = vunpack.i.h.bf16 %v4604_v14  ;;  %v4605_v16 = vunpack.i.l.bf16 %v4604_v14 }
 0x474   : > { %v1928_v17 = vpack.c.bf16 %v4606_v15, %v4605_v16  ;;  %v4222_v15 = vld [vmem:[%s6734_s25 + $0x8] sm:$0xff]   ;;  %v4215_v16 = vld [vmem:[%s6734_s25] sm:$0xff]  }
 0x476   : > { %4446 = vmatprep.subr.msk.bf16.mxu1 %vm1990_vm1, %v1928_v17  ;;  %v2059_v18 = vsel %vm1990_vm1, %v1928_v17, 0  ;;  %v4220_v17 = vunpack.c.l.bf16 %v4222_v15 }
 0x477   : > { %4369 = vmatpush3.bf16.xpose.msra.mxu1 %v2059_v18  ;;  %v4216_v18 = vunpack.c.l.bf16 %v4215_v16 }
 0x479   : > { %v4609_v19 = vpop.permute.xlu1 %4608 }
 0x47a   : > { %v4611_v0 = vunpack.i.h.bf16 %v4609_v19  ;;  %v4610_v20 = vunpack.i.l.bf16 %v4609_v19 }
 0x47b   : > { %v4624_v21 = vpop.permute.xlu0 %4623 }
 0x47c   : > { %v1929_v7 = vpack.c.bf16 %v4611_v0, %v4610_v20  ;;  %v4626_v26 = vunpack.i.h.bf16 %v4624_v21  ;;  %v4625_v28 = vunpack.i.l.bf16 %v4624_v21  ;;  %v6032_v0 = vunpack.c.h.bf16 %v4215_v16 }
 0x47d   : > { %v4614_v1 = vpop.permute.xlu1 %4613 }
 0x47e   : > { %v4616_v23 = vunpack.i.h.bf16 %v4614_v1  ;;  %v4615_v54 = vunpack.i.l.bf16 %v4614_v1  ;;  %4447 = vmatprep.subr.msk.bf16.mxu1 %vm1990_vm1, %v1929_v7  ;;  %v2062_v24 = vsel %vm1990_vm1, %v1929_v7, 0  ;;  %v1881_v39 = vpack.c.bf16 %v4626_v26, %v4625_v28 }
 0x47f   : > { %v4634_v25 = vpop.permute.xlu0 %4633  ;;  %4371 = vmatpush3.bf16.xpose.msra.mxu1 %v2062_v24 }
 0x480   : > { %v1880_v31 = vpack.c.bf16 %v4616_v23, %v4615_v54  ;;  %v4636_v32 = vunpack.i.h.bf16 %v4634_v25  ;;  %v4635_v33 = vunpack.i.l.bf16 %v4634_v25  ;;  %v4221_v23 = vunpack.c.h.bf16 %v4222_v15 }
 0x481   : > { %v4619_v34 = vpop.permute.xlu1 %4618 }
 0x482   : > { %v4621_v35 = vunpack.i.h.bf16 %v4619_v34  ;;  %v4620_v38 = vunpack.i.l.bf16 %v4619_v34  ;;  %4372 = vmatprep.mubr.msk.bf16.mxu1 %vm1990_vm1, %v1880_v31  ;;  %v1882_v42 = vpack.c.bf16 %v4636_v32, %v4635_v33 }
 0x483   : > { %v4644_v47 = vpop.permute.xlu0 %4643 }
 0x484   : > { %v1930_v41 = vpack.c.bf16 %v4621_v35, %v4620_v38  ;;  %v4646_v61 = vunpack.i.h.bf16 %v4644_v47  ;;  %v4645_v63 = vunpack.i.l.bf16 %v4644_v47 }
 0x485   : > { %v4629_v43 = vpop.permute.xlu1 %4628 }
 0x486   : > { %v4631_v44 = vunpack.i.h.bf16 %v4629_v43  ;;  %v4630_v45 = vunpack.i.l.bf16 %v4629_v43  ;;  %4373 = vmatmul.mubr.msk.bf16.vlgmr.msra.gmra.mrb[16].mxu1 %vm1990_vm1, %v1881_v39  ;;  %4448 = vmatprep.subr.msk.bf16.mxu1 %vm1990_vm1, %v1930_v41  ;;  %v2120_v46 = vsel %vm1990_vm1, %v1930_v41, 0  ;;  %v1883_v8 = vpack.c.bf16 %v4646_v61, %v4645_v63 }
 0x487   : > { %4377 = vmatpush3.bf16.xpose.msra.mxu1 %v2120_v46  ;;  %4380 = vmatprep.mubr.msk.bf16.mxu1 %vm1990_vm1, %v1882_v42  ;;  %v4654_v52 = vpop.permute.xlu0 %4653 }
 0x488   : > { %v1931_v48 = vpack.c.bf16 %v4631_v44, %v4630_v45  ;;  %v4656_v2 = vunpack.i.h.bf16 %v4654_v52  ;;  %v4655_v5 = vunpack.i.l.bf16 %v4654_v52 }
 0x489   : > { %v4639_v49 = vpop.permute.xlu1 %4638 }
 0x48a   : > { %v4641_v50 = vunpack.i.h.bf16 %v4639_v49  ;;  %v4640_v51 = vunpack.i.l.bf16 %v4639_v49  ;;  %4449 = vmatprep.subr.msk.bf16.mxu1 %vm1990_vm1, %v1931_v48  ;;  %v2123_v58 = vsel %vm1990_vm1, %v1931_v48, 0  ;;  %v1884_v9 = vpack.c.bf16 %v4656_v2, %v4655_v5 }
 0x48c   : > { %v1932_v53 = vpack.c.bf16 %v4641_v50, %v4640_v51 }
 0x48d   : > { %v4649_v59 = vpop.permute.xlu1 %4648 }
 0x48e   : > { %v4651_v6 = vunpack.i.h.bf16 %v4649_v59  ;;  %v4650_v55 = vunpack.i.l.bf16 %v4649_v59  ;;  %v2181_v10 = vsel %vm1990_vm1, %v1932_v53, 0 }
 0x48f   : > { %4379 = vmatpush3.bf16.xpose.msra.mxu1 %v2123_v58 }
 0x490   : > { %4450 = vmatprep.subr.msk.bf16.mxu1 %vm1990_vm1, %v1932_v53  ;;  %v1933_v56 = vpack.c.bf16 %v4651_v6, %v4650_v55 }
 0x491   : > { %v4659_v57 = vpop.permute.xlu1 %4658 }
 0x492   : > { %v2184_v11 = vsel %vm1990_vm1, %v1933_v56, 0  ;;  %v4661_v12 = vunpack.i.h.bf16 %v4659_v57  ;;  %v4660_v13 = vunpack.i.l.bf16 %v4659_v57 }
 0x494   : > { %v1885_v14 = vpack.c.bf16 %v4661_v12, %v4660_v13 }
 0x496   : > { %4381 = vmatmul.mubr.msk.bf16.vlgmr.msra.gmra.mrb[20].mxu1 %vm1990_vm1, %v1883_v8 }
 0x497   : > { %4385 = vmatpush3.bf16.xpose.msra.mxu1 %v2181_v10  ;;  %4388 = vmatprep.mubr.msk.bf16.mxu1 %vm1990_vm1, %v1884_v9 }
 0x498   : > { %4451 = vmatprep.subr.msk.bf16.mxu1 %vm1990_vm1, %v1933_v56 }
 0x49f   : > { %4387 = vmatpush3.bf16.xpose.msra.mxu1 %v2184_v11 }
 0x4a6   : > { %4389 = vmatmul.mubr.msk.bf16.vlgmr.msra.gmra.mrb[24].mxu1 %vm1990_vm1, %v1885_v14 }
 0x4e2   : > { %v4366_v19 = vpop.f32.mrb[12].mxu1 }
 0x4e3   : > { %v6034_v20 = vadd.f32 %v4366_v19, %v4220_v17  ;;  %v2037_v21 = vpop.f32.mrb[13].mxu1 }
 0x4e4   : > { %v4367_v7 = vpop.f32.mrb[14].mxu1  ;;  %v6036_v1 = vadd.f32 %v4216_v18, %v2037_v21 }
 0x4e5   : > { %v2040_v54 = vpop.f32.mrb[15].mxu1  ;;  %v2241_v24 = vsel %vm1990_vm1, %v6034_v20, -inf  ;;  %v6045_v28 = vadd.f32 %v4367_v7, %v4221_v23 }
 0x4e6   : > { %v6041_v25 = vadd.f32 %v6032_v0, %v2040_v54  ;;  %2242 = vmax.xlane.f32.xlu0 %v2241_v24  ;;  %v2235_v31 = vsel %vm1990_vm1, %v6036_v1, -inf }
 0x4e7   : > { %v2244_v32 = vsel %vm1990_vm1, %v6045_v28, -inf }
 0x4e8   : > { %v2238_v26 = vsel %vm1990_vm1, %v6041_v25, -inf }
 0x4e9   : > { %2239 = vmax.xlane.f32.xlu1 %v2238_v26 }
 0x4ea   : > { %2236 = vmax.xlane.f32.xlu0 %v2235_v31 }
 0x4ee   : > { %2245 = vmax.xlane.f32.xlu0 %v2244_v32 }
 0x559   : > { %v4374_v33 = vpop.f32.mrb[16].mxu1 }
 0x55a   : > { %v6051_v34 = vadd.f32 %v4374_v33, %v4220_v17  ;;  %v2098_v35 = vpop.f32.mrb[17].mxu1 }
 0x55b   : > { %v4375_v38 = vpop.f32.mrb[18].mxu1  ;;  %v6053_v39 = vadd.f32 %v4216_v18, %v2098_v35 }
 0x55c   : > { %v6055_v41 = vadd.f32 %v4375_v38, %v4221_v23  ;;  %v2101_v42 = vpop.f32.mrb[19].mxu1  ;;  %v2253_v43 = vsel %vm1990_vm1, %v6051_v34, -inf }
 0x55d   : > { %2254 = vmax.xlane.f32.xlu0 %v2253_v43  ;;  %v6060_v44 = vadd.f32 %v6032_v0, %v2101_v42  ;;  %v2247_v46 = vsel %vm1990_vm1, %v6053_v39, -inf }
 0x55e   : > { %v2256_v45 = vsel %vm1990_vm1, %v6055_v41, -inf }
 0x55f   : > { %2257 = vmax.xlane.f32.xlu1 %v2256_v45  ;;  %v2250_v47 = vsel %vm1990_vm1, %v6060_v44, -inf }
 0x561   : > { %2248 = vmax.xlane.f32.xlu0 %v2247_v46 }
 0x563   : > { %2251 = vmax.xlane.f32.xlu1 %v2250_v47 }
 0x569   : > { %v4382_v48 = vpop.f32.mrb[20].mxu1 }
 0x56a   : > { %v6068_v49 = vadd.f32 %v4382_v48, %v4220_v17  ;;  %v2159_v50 = vpop.f32.mrb[21].mxu1 }
 0x56b   : > { %v4383_v51 = vpop.f32.mrb[22].mxu1  ;;  %v6070_v52 = vadd.f32 %v4216_v18, %v2159_v50 }
 0x56c   : > { %v6072_v53 = vadd.f32 %v4383_v51, %v4221_v23  ;;  %v2162_v58 = vpop.f32.mrb[23].mxu1  ;;  %v2265_v59 = vsel %vm1990_vm1, %v6068_v49, -inf }
 0x56d   : > { %2266 = vmax.xlane.f32.xlu0 %v2265_v59  ;;  %v6077_v61 = vadd.f32 %v6032_v0, %v2162_v58  ;;  %v2259_v2 = vsel %vm1990_vm1, %v6070_v52, -inf }
 0x56e   : > { %v2268_v63 = vsel %vm1990_vm1, %v6072_v53, -inf }
 0x56f   : > { %2269 = vmax.xlane.f32.xlu1 %v2268_v63  ;;  %v2262_v5 = vsel %vm1990_vm1, %v6077_v61, -inf }
 0x571   : > { %2260 = vmax.xlane.f32.xlu0 %v2259_v2 }
 0x573   : > { %2263 = vmax.xlane.f32.xlu1 %v2262_v5  ;;  %v2243_v12 = vpop.xlane.xlu0 %2242 }
 0x574   : > { %v2285_v13 = vsub.f32 %v6034_v20, %v2243_v12 }
 0x576   : > { %v2303_v15 = vmul.f32 1.442695, %v2285_v13  ;;  %v2240_v26 = vpop.xlane.xlu1 %2239 }
 0x577   : > { %v2237_v14 = vpop.xlane.xlu0 %2236  ;;  %v2284_v31 = vsub.f32 %v6041_v25, %v2240_v26 }
 0x578   : > { %v2283_v16 = vsub.f32 %v6036_v1, %v2237_v14  ;;  %4926 = vpow2.f32 %v2303_v15 }
 0x579   : > { %v4390_v6 = vpop.f32.mrb[24].mxu1  ;;  %v2301_v33 = vmul.f32 1.442695, %v2284_v31 }
 0x57a   : > { %v6085_v55 = vadd.f32 %v4390_v6, %v4220_v17  ;;  %v2220_v8 = vpop.f32.mrb[25].mxu1 }
 0x57b   : > { %v4391_v9 = vpop.f32.mrb[26].mxu1  ;;  %v6087_v56 = vadd.f32 %v4216_v18, %v2220_v8  ;;  %v2299_v18 = vmul.f32 1.442695, %v2283_v16  ;;  %v2246_v54 = vpop.xlane.xlu0 %2245 }
 0x57c   : > { %v2223_v10 = vpop.f32.mrb[27].mxu1  ;;  %v2277_v57 = vsel %vm1990_vm1, %v6085_v55, -inf  ;;  %v6101_v17 = vadd.f32 %v4391_v9, %v4221_v23  ;;  %v2286_v24 = vsub.f32 %v6045_v28, %v2246_v54 }
 0x57d   : > { %2278 = vmax.xlane.f32.xlu0 %v2277_v57  ;;  %v2271_v11 = vsel %vm1990_vm1, %v6087_v56, -inf  ;;  %v6104_v19 = vadd.f32 %v6032_v0, %v2223_v10  ;;  %4928 = vpow2.f32 %v2299_v18 }
 0x57e   : > { %v2280_v21 = vsel %vm1990_vm1, %v6101_v17, -inf  ;;  %v2305_v32 = vmul.f32 1.442695, %v2286_v24 }
 0x57f   : > { %v2274_v7 = vsel %vm1990_vm1, %v6104_v19, -inf }
 0x580   : > { %4930 = vpow2.f32 %v2305_v32 }
 0x581   : > { %2272 = vmax.xlane.f32.xlu0 %v2271_v11  ;;  %4932 = vpow2.f32 %v2301_v33 }
 0x582   : > { %v6110_v20 = vpop.eup %4926 }
 0x583   : > { %v2337_v1 = vsel %vm1990_vm1, %v6110_v20, 0.0 }
 0x584   : > { %4668 = vrot.lane.b32.xlu1 %v5990_v62, %s5332_s20 }
 0x587   : > { %v6114_v23 = vpop.eup %4928 }
 0x588   : > { %4673 = vrot.lane.b32.xlu1 %v5992_v4, %s5333_s27  ;;  %v2331_v0 = vsel %vm1990_vm1, %v6114_v23, 0.0 }
 0x58a   : > { %v6122_v35 = vpop.eup %4930 }
 0x58b   : > { %v2340_v38 = vsel %vm1990_vm1, %v6122_v35, 0.0  ;;  %v6126_v42 = vpop.eup %4932 }
 0x597   : > { %4663 = vrot.lane.b32.xlu0 %v5992_v4, %s5332_s20 }
 0x5ac   : > { %2281 = vmax.xlane.f32.xlu1 %v2280_v21 }
 0x5b0   : > { %2275 = vmax.xlane.f32.xlu1 %v2274_v7 }
 0x5b6   : > { %2338 = vadd.xlane.f32.xlu0 %v2337_v1 }
 0x5ba   : > { %2332 = vadd.xlane.f32.xlu0 %v2331_v0 }
 0x5c1   : > { %4678 = vrot.lane.b32.xlu1 %v5992_v4, %s5334_s18  ;;  %v2334_v4 = vsel %vm1990_vm1, %v6126_v42, 0.0 }
 0x5e5   : > { %2341 = vadd.xlane.f32.xlu1 %v2340_v38 }
 0x5e9   : > { %2335 = vadd.xlane.f32.xlu1 %v2334_v4 }
 0x5ea   : > { %v2255_v28 = vpop.xlane.xlu0 %2254 }
 0x5eb   : > { %v2289_v43 = vsub.f32 %v6051_v34, %v2255_v28 }
 0x5ec   : > { %v2258_v25 = vpop.xlane.xlu1 %2257 }
 0x5ed   : > { %v2311_v45 = vmul.f32 1.442695, %v2289_v43  ;;  %v2290_v46 = vsub.f32 %v6055_v41, %v2258_v25 }
 0x5ee   : > { %v2249_v47 = vpop.xlane.xlu0 %2248 }
 0x5ef   : > { %4934 = vpow2.f32 %v2311_v45  ;;  %v2313_v48 = vmul.f32 1.442695, %v2290_v46  ;;  %v2287_v50 = vsub.f32 %v6053_v39, %v2249_v47 }
 0x5f0   : > { %v2252_v51 = vpop.xlane.xlu1 %2251 }
 0x5f1   : > { %4936 = vpow2.f32 %v2313_v48  ;;  %v2307_v58 = vmul.f32 1.442695, %v2287_v50  ;;  %v2288_v59 = vsub.f32 %v6060_v44, %v2252_v51 }
 0x5f3   : > { %4938 = vpow2.f32 %v2307_v58  ;;  %v2309_v63 = vmul.f32 1.442695, %v2288_v59 }
 0x5f5   : > { %4940 = vpow2.f32 %v2309_v63 }
 0x5f9   : > { %v6134_v2 = vpop.eup %4934 }
 0x5fa   : > { %v2267_v34 = vpop.xlane.xlu0 %2266  ;;  %v2349_v5 = vsel %vm1990_vm1, %v6134_v2, 0.0 }
 0x5fb   : > { %v6138_v41 = vpop.eup %4936  ;;  %v2293_v6 = vsub.f32 %v6068_v49, %v2267_v34  ;;  %2350 = vadd.xlane.f32.xlu0 %v2349_v5 }
 0x5fc   : > { %v2270_v39 = vpop.xlane.xlu1 %2269  ;;  %v2352_v8 = vsel %vm1990_vm1, %v6138_v41, 0.0 }
 0x5fd   : > { %v6143_v9 = vpop.eup %4938  ;;  %v2319_v44 = vmul.f32 1.442695, %v2293_v6  ;;  %v2294_v10 = vsub.f32 %v6072_v53, %v2270_v39  ;;  %2353 = vadd.xlane.f32.xlu1 %v2352_v8 }
 0x5fe   : > { %v2261_v57 = vpop.xlane.xlu0 %2260  ;;  %v2343_v11 = vsel %vm1990_vm1, %v6143_v9, 0.0 }
 0x5ff   : > { %v6148_v12 = vpop.eup %4940  ;;  %4942 = vpow2.f32 %v2319_v44  ;;  %v2321_v13 = vmul.f32 1.442695, %v2294_v10  ;;  %v2291_v49 = vsub.f32 %v6070_v52, %v2261_v57  ;;  %2344 = vadd.xlane.f32.xlu0 %v2343_v11 }
 0x600   : > { %v2264_v14 = vpop.xlane.xlu1 %2263  ;;  %v2346_v15 = vsel %vm1990_vm1, %v6148_v12, 0.0 }
 0x601   : > { %4944 = vpow2.f32 %v2321_v13  ;;  %v2315_v16 = vmul.f32 1.442695, %v2291_v49  ;;  %v2292_v53 = vsub.f32 %v6077_v61, %v2264_v14  ;;  %2347 = vadd.xlane.f32.xlu1 %v2346_v15 }
 0x603   : > { %4946 = vpow2.f32 %v2315_v16  ;;  %v2317_v18 = vmul.f32 1.442695, %v2292_v53 }
 0x604   : > { %v4669_v21 = vpop.permute.xlu1 %4668 }
 0x605   : > { %4948 = vpow2.f32 %v2317_v18  ;;  %v4671_v46 = vunpack.i.h.bf16 %v4669_v21  ;;  %v4670_v48 = vunpack.i.l.bf16 %v4669_v21 }
 0x607   : > { %v1977_v59 = vpack.c.bf16 %v4671_v46, %v4670_v48 }
 0x608   : > { %v4674_v7 = vpop.permute.xlu1 %4673 }
 0x609   : > { %v6154_v1 = vpop.eup %4942  ;;  %v4676_v0 = vunpack.i.h.bf16 %v4674_v7  ;;  %v4675_v54 = vunpack.i.l.bf16 %v4674_v7 }
 0x60a   : > { %v2279_v52 = vpop.xlane.xlu0 %2278  ;;  %v2361_v24 = vsel %vm1990_vm1, %v6154_v1, 0.0 }
 0x60b   : > { %v6158_v26 = vpop.eup %4944  ;;  %v6160_v31 = vpack.c.bf16 %v4676_v0, %v4675_v54  ;;  %v2297_v61 = vsub.f32 %v6085_v55, %v2279_v52  ;;  %2362 = vadd.xlane.f32.xlu0 %v2361_v24 }
 0x60c   : > { %v2364_v32 = vsel %vm1990_vm1, %v6158_v26, 0.0 }
 0x60d   : > { %v6165_v33 = vpop.eup %4946  ;;  %v2327_v38 = vmul.f32 1.442695, %v2297_v61  ;;  %2365 = vadd.xlane.f32.xlu1 %v2364_v32  ;;  %4408 = vmatprep.subr.bf16.mxu0 %v6160_v31 }
 0x60e   : > { %v2273_v4 = vpop.xlane.xlu0 %2272  ;;  %v2355_v28 = vsel %vm1990_vm1, %v6165_v33, 0.0 }
 0x60f   : > { %v6170_v43 = vpop.eup %4948  ;;  %4950 = vpow2.f32 %v2327_v38  ;;  %v2295_v25 = vsub.f32 %v6087_v56, %v2273_v4  ;;  %2356 = vadd.xlane.f32.xlu0 %v2355_v28 }
 0x610   : > { %v2358_v55 = vsel %vm1990_vm1, %v6170_v43, 0.0 }
 0x611   : > { %v2323_v45 = vmul.f32 1.442695, %v2295_v25  ;;  %2359 = vadd.xlane.f32.xlu1 %v2358_v55 }
 0x612   : > { %v4664_v47 = vpop.permute.xlu0 %4663 }
 0x613   : > { %4952 = vpow2.f32 %v2323_v45  ;;  %v4666_v50 = vunpack.i.h.bf16 %v4664_v47  ;;  %v4665_v51 = vunpack.i.l.bf16 %v4664_v47 }
 0x615   : > { %v1976_v58 = vpack.c.bf16 %v4666_v50, %v4665_v51 }
 0x617   : > { %4400 = vmatprep.subr.bf16.mxu1 %v1976_v58 }
 0x618   : > { %4401 = vmatpush3.bf16.msra.mxu1 %v1976_v58 }
 0x619   : > { %v6175_v63 = vpop.eup %4950  ;;  %4402 = vmatprep.subr.bf16.mxu1 %v1977_v59 }
 0x61a   : > { %v2373_v56 = vsel %vm1990_vm1, %v6175_v63, 0.0 }
 0x61b   : > { %2374 = vadd.xlane.f32.xlu0 %v2373_v56 }
 0x61c   : > { %4403 = vmatpush3.bf16.msra.mxu1 %v1977_v59 }
 0x61d   : > { %v6179_v34 = vpop.eup %4952 }
 0x61e   : > { %v2367_v5 = vsel %vm1990_vm1, %v6179_v34, 0.0 }
 0x61f   : > { %2368 = vadd.xlane.f32.xlu0 %v2367_v5 }
 0x635   : > { %4683 = vrot.lane.b32.xlu0 %v5990_v62, %s5333_s27 }
 0x639   : > { %v2282_v6 = vpop.xlane.xlu1 %2281 }
 0x63a   : > { %v2298_v39 = vsub.f32 %v6101_v17, %v2282_v6 }
 0x63c   : > { %v2329_v8 = vmul.f32 1.442695, %v2298_v39 }
 0x63d   : > { %v2276_v44 = vpop.xlane.xlu1 %2275 }
 0x63e   : > { %4954 = vpow2.f32 %v2329_v8  ;;  %v2296_v10 = vsub.f32 %v6104_v19, %v2276_v44 }
 0x640   : > { %v2325_v57 = vmul.f32 1.442695, %v2296_v10 }
 0x641   : > { %v4679_v11 = vpop.permute.xlu1 %4678 }
 0x642   : > { %4956 = vpow2.f32 %v2325_v57  ;;  %v4681_v13 = vunpack.i.h.bf16 %v4679_v11  ;;  %v4680_v49 = vunpack.i.l.bf16 %v4679_v11 }
 0x643   : > { %v2339_v19 = vpop.xlane.xlu0 %2338 }
 0x644   : > { %v1980_v14 = vpack.c.bf16 %v4681_v13, %v4680_v49 }
 0x646   : > { %4416 = vmatprep.subr.bf16.mxu1 %v1980_v14 }
 0x647   : > { %v2333_v18 = vpop.xlane.xlu0 %2332 }
 0x648   : > { %v6187_v15 = vpop.eup %4954 }
 0x649   : > { %v2376_v16 = vsel %vm1990_vm1, %v6187_v15, 0.0 }
 0x64a   : > { %2377 = vadd.xlane.f32.xlu1 %v2376_v16 }
 0x64c   : > { %v6191_v53 = vpop.eup %4956 }
 0x64d   : > { %v2370_v17 = vsel %vm1990_vm1, %v6191_v53, 0.0 }
 0x64e   : > { %2371 = vadd.xlane.f32.xlu1 %v2370_v17 }
 0x65f   : > { %4688 = vrot.lane.b32.xlu1 %v5990_v62, %s5334_s18 }
 0x672   : > { %v2342_v21 = vpop.xlane.xlu1 %2341 }
 0x673   : > { %4958 = vrcp.f32 %v2342_v21 }
 0x674   : > { %4960 = vrcp.f32 %v2333_v18 }
 0x675   : > { %4962 = vrcp.f32 %v2339_v19 }
 0x676   : > { %v2336_v7 = vpop.xlane.xlu1 %2335 }
 0x677   : > { %4964 = vrcp.f32 %v2336_v7 }
 0x67d   : > { %v4959_v0 = vpop.eup %4958 }
 0x67e   : > { %v4961_v54 = vpop.eup %4960  ;;  %v2398_v61 = vmul.f32 %v4959_v0, %v6122_v35 }
 0x67f   : > { %v4963_v52 = vpop.eup %4962  ;;  %v2395_v32 = vmul.f32 %v4961_v54, %v6114_v23 }
 0x680   : > { %v2397_v62 = vmul.f32 %v4963_v52, %v6110_v20 }
 0x681   : > { %v4965_v24 = vpop.eup %4964 }
 0x682   : > { %v2396_v38 = vmul.f32 %v4965_v24, %v6126_v42  ;;  %v2412_v28 = vpack.c.bf16 %v2398_v61, %v2397_v62 }
 0x684   : > { %v2411_v4 = vpack.c.bf16 %v2396_v38, %v2395_v32 }
 0x686   : > { %4396 = vmatprep.mubr.msk.bf16.mxu0 %vm1990_vm1, %v2411_v4 }
 0x687   : > { %4397 = vmatmul.mubr.msk.bf16.vlgmr.msra.gmra.mrb[12].mxu0 %vm1990_vm1, %v2412_v28 }
 0x688   : > { %4409 = vmatpush3.bf16.msra.mxu0 %v6160_v31  ;;  %v2351_v25 = vpop.xlane.xlu0 %2350 }
 0x68a   : > { %v2354_v55 = vpop.xlane.xlu1 %2353 }
 0x68b   : > { %4966 = vrcp.f32 %v2354_v55 }
 0x68c   : > { %v2345_v45 = vpop.xlane.xlu0 %2344 }
 0x68d   : > { %4968 = vrcp.f32 %v2345_v45 }
 0x68e   : > { %4970 = vrcp.f32 %v2351_v25  ;;  %v2348_v35 = vpop.xlane.xlu1 %2347 }
 0x68f   : > { %4972 = vrcp.f32 %v2348_v35 }
 0x695   : > { %v4967_v23 = vpop.eup %4966 }
 0x696   : > { %v2402_v48 = vmul.f32 %v4967_v23, %v6138_v41 }
 0x697   : > { %v4969_v42 = vpop.eup %4968 }
 0x698   : > { %v4971_v46 = vpop.eup %4970  ;;  %v2363_v20 = vpop.xlane.xlu0 %2362  ;;  %v2399_v51 = vmul.f32 %v4969_v42, %v6143_v9  ;;  %v4826_v42 = vld [vmem:[%s5782_s8] sm:$0xff]  }
 0x699   : > { %v4973_v47 = vpop.eup %4972  ;;  %v2401_v58 = vmul.f32 %v4971_v46, %v6134_v2  ;;  %v4827_v46 = vld [vmem:[%s5782_s8 + $0x8] sm:$0xff]  }
 0x69a   : > { %v2366_v50 = vpop.xlane.xlu1 %2365  ;;  %v2400_v31 = vmul.f32 %v4973_v47, %v6148_v12 }
 0x69b   : > { %v2414_v5 = vpack.c.bf16 %v2402_v48, %v2401_v58  ;;  %v4829_v58 = vld [vmem:[%s5782_s8 + $0x18] sm:$0xff]  }
 0x69c   : > { %v2357_v59 = vpop.xlane.xlu0 %2356  ;;  %v2413_v56 = vpack.c.bf16 %v2400_v31, %v2399_v51 }
 0x69d   : > { %4974 = vrcp.f32 %v2357_v59 }
 0x69e   : > { %v2360_v6 = vpop.xlane.xlu1 %2359  ;;  %4404 = vmatprep.mubr.msk.bf16.mxu1 %vm1990_vm1, %v2413_v56  ;;  %v4830_v56 = vld [vmem:[%s5782_s8 + $0x20] sm:$0xff]  }
 0x69f   : > { %4976 = vrcp.f32 %v2360_v6  ;;  %4405 = vmatmul.mubr.msk.bf16.vlgmr.msra.gmra.mrb[28].mxu1 %vm1990_vm1, %v2414_v5  ;;  %v4831_v5 = vld [vmem:[%s5782_s8 + $0x28] sm:$0xff]   ;;  %v4832_v6 = vld [vmem:[%s5782_s8 + $0x30] sm:$0xff]  }
 0x6a0   : > { %4417 = vmatpush3.bf16.msra.mxu1 %v1980_v14  ;;  %4978 = vrcp.f32 %v2366_v50 }
 0x6a1   : > { %4980 = vrcp.f32 %v2363_v20  ;;  %v4828_v20 = vld [vmem:[%s5782_s8 + $0x10] sm:$0xff]  }
 0x6a7   : > { %v4975_v41 = vpop.eup %4974 }
 0x6a8   : > { %v2375_v39 = vpop.xlane.xlu0 %2374  ;;  %v2403_v12 = vmul.f32 %v4975_v41, %v6165_v33  ;;  %v4833_v41 = vld [vmem:[%s5782_s8 + $0x38] sm:$0xff]  }
 0x6a9   : > { %v4977_v9 = vpop.eup %4976 }
 0x6aa   : > { %v2404_v2 = vmul.f32 %v4977_v9, %v6170_v43  ;;  %v4979_v10 = vpop.eup %4978 }
 0x6ab   : > { %v4981_v49 = vpop.eup %4980  ;;  %v2406_v14 = vmul.f32 %v4979_v10, %v6158_v26 }
 0x6ac   : > { %v2369_v8 = vpop.xlane.xlu0 %2368  ;;  %v2415_v44 = vpack.c.bf16 %v2404_v2, %v2403_v12  ;;  %v2405_v17 = vmul.f32 %v4981_v49, %v6154_v1 }
 0x6ae   : > { %4412 = vmatprep.mubr.msk.bf16.mxu0 %vm1990_vm1, %v2415_v44  ;;  %v2416_v19 = vpack.c.bf16 %v2406_v14, %v2405_v17 }
 0x6b0   : > { %v4684_v57 = vpop.permute.xlu0 %4683 }
 0x6b1   : > { %v4686_v11 = vunpack.i.h.bf16 %v4684_v57  ;;  %v4685_v13 = vunpack.i.l.bf16 %v4684_v57 }
 0x6b3   : > { %v1979_v16 = vpack.c.bf16 %v4686_v11, %v4685_v13 }
 0x6b5   : > { %4410 = vmatprep.subr.bf16.mxu0 %v1979_v16 }
 0x6b6   : > { %4411 = vmatpush3.bf16.msra.mxu0 %v1979_v16 }
 0x6b7   : > { %4424 = vmatprep.subr.bf16.mxu0 %v4826_v42 }
 0x6b9   : > { %4413 = vmatmul.mubr.msk.bf16.vlgmr.msra.gmra.mrb[16].mxu0 %vm1990_vm1, %v2416_v19 }
 0x6ba   : > { %4425 = vmatpush3.bf16.msra.mxu0 %v4826_v42  ;;  %v4129_v42 = vld [vmem:[%s866_s12] ss:$0 sm:$0xff] }
 0x6bb   : > { %4426 = vmatprep.subr.bf16.mxu0 %v4827_v46 }
 0x6be   : > { %4427 = vmatpush3.bf16.msra.mxu0 %v4827_v46 }
 0x6bf   : > { %4428 = vmatprep.subr.bf16.mxu0 %v4828_v20 }
 0x6c2   : > { %4429 = vmatpush3.bf16.msra.mxu0 %v4828_v20 }
 0x6c3   : > { %4430 = vmatprep.subr.bf16.mxu0 %v4829_v58 }
 0x6c6   : > { %4431 = vmatpush3.bf16.msra.mxu0 %v4829_v58 }
 0x6c7   : > { %4432 = vmatprep.subr.bf16.mxu0 %v4830_v56 }
 0x6ca   : > { %4433 = vmatpush3.bf16.msra.mxu0 %v4830_v56 }
 0x6cb   : > { %4434 = vmatprep.subr.bf16.mxu0 %v4831_v5 }
 0x6ce   : > { %4435 = vmatpush3.bf16.msra.mxu0 %v4831_v5 }
 0x6cf   : > { %4436 = vmatprep.subr.bf16.mxu0 %v4832_v6 }
 0x6d2   : > { %4437 = vmatpush3.bf16.msra.mxu0 %v4832_v6 }
 0x6d3   : > { %4438 = vmatprep.subr.bf16.mxu0 %v4833_v41 }
 0x6d6   : > { %4439 = vmatpush3.bf16.msra.mxu0 %v4833_v41  ;;  %v5031_v41 = vld [vmem:[#allocation2] sm:$0xff] }
 0x6d7   : > { %v2378_v33 = vpop.xlane.xlu1 %2377 }
 0x6d8   : > { %4982 = vrcp.f32 %v2378_v33 }
 0x6d9   : > { %4984 = vrcp.f32 %v2369_v8 }
 0x6da   : > { %4986 = vrcp.f32 %v2375_v39 }
 0x6db   : > { %v2372_v43 = vpop.xlane.xlu1 %2371 }
 0x6dc   : > { %4988 = vrcp.f32 %v2372_v43 }
 0x6df   : > { %v4689_v18 = vpop.permute.xlu1 %4688 }
 0x6e0   : > { %v4691_v21 = vunpack.i.h.bf16 %v4689_v18  ;;  %v4690_v7 = vunpack.i.l.bf16 %v4689_v18 }
 0x6e2   : > { %v1981_v0 = vpack.c.bf16 %v4691_v21, %v4690_v7  ;;  %v4983_v54 = vpop.eup %4982 }
 0x6e3   : > { %v4985_v26 = vpop.eup %4984  ;;  %v2410_v24 = vmul.f32 %v4983_v54, %v6187_v15 }
 0x6e4   : > { %4418 = vmatprep.subr.bf16.mxu1 %v1981_v0  ;;  %v4987_v52 = vpop.eup %4986  ;;  %v2407_v61 = vmul.f32 %v4985_v26, %v6179_v34 }
 0x6e5   : > { %4419 = vmatpush3.bf16.msra.mxu1 %v1981_v0  ;;  %v2409_v38 = vmul.f32 %v4987_v52, %v6175_v63 }
 0x6e6   : > { %v4989_v1 = vpop.eup %4988 }
 0x6e7   : > { %v2408_v32 = vmul.f32 %v4989_v1, %v6191_v53  ;;  %v2418_v4 = vpack.c.bf16 %v2410_v24, %v2409_v38 }
 0x6e9   : > { %v2417_v62 = vpack.c.bf16 %v2408_v32, %v2407_v61 }
 0x6eb   : > { %4420 = vmatprep.mubr.msk.bf16.mxu1 %vm1990_vm1, %v2417_v62 }
 0x6ec   : > { %4421 = vmatmul.mubr.msk.bf16.vlgmr.msra.gmra.mrb[32].mxu1 %vm1990_vm1, %v2418_v4 }
 0x6ed   : > { %3144 = vmatprep.mubr.bf16.mxu1 %v5331_v60 }
 0x75a   : > { %v6223_v28 = vpop.f32.mrb[12].mxu0 }
 0x75b   : > { %v6225_v25 = vpop.f32.mrb[13].mxu0 }
 0x75c   : > { %v6227_v34 = vpop.f32.mrb[14].mxu0 }
 0x75d   : > { %v6229_v15 = vpop.f32.mrb[15].mxu0 }
 0x772   : > { %v4406_v63 = vpop.f32.mrb[28].mxu1 }
 0x773   : > { %v2514_v53 = vpop.f32.mrb[29].mxu1 }
 0x774   : > { %v4407_v55 = vpop.f32.mrb[30].mxu1 }
 0x775   : > { %v4692_v45 = vpack.i.bf16 %v4407_v55, %v4406_v63  ;;  %v2517_v35 = vpop.f32.mrb[31].mxu1 }
 0x776   : > { %v4697_v23 = vpack.i.bf16 %v2517_v35, %v2514_v53 }
 0x777   : > { %4693 = vrot.lane.b32.xlu1 %v4692_v45, %s5334_s18  ;;  %v6263_v45 = vld [vmem:[%s5777_s11] sm:$0x3f]  ;;  %s6736_s11 = sld [smem:[#allocation33_spill]] }
 0x778   : > { %4698 = vrot.lane.b32.xlu0 %v4697_v23, %s5334_s18  ;;  %v1341_v35 = vrot.slane %v6263_v45, %v5970_v3 }
 0x77a   : > { %v1403_v23 = vadd.f32 %v5953_v27, %v1341_v35 }
 0x77c   : > { %v2826_v20 = vrot.slane %v1403_v23, %v5970_v3 }
 0x77d   : > { %v4855_v35 = vld [vmem:[%s6736_s11 + $0x68] ss:$16 sps:$4 sm:$0xff]   ;;  %v4860_v23 = vld [vmem:[%s6736_s11 + $0x84] ss:$16 sps:$4 sm:$0xff]  }
 0x78c   : > { %v4414_v47 = vpop.f32.mrb[16].mxu0 }
 0x78d   : > { %v2569_v48 = vpop.f32.mrb[17].mxu0 }
 0x78e   : > { %v4415_v50 = vpop.f32.mrb[18].mxu0 }
 0x78f   : > { %v4702_v51 = vpack.i.bf16 %v4415_v50, %v4414_v47  ;;  %v2572_v31 = vpop.f32.mrb[19].mxu0 }
 0x790   : > { %v4707_v59 = vpack.i.bf16 %v2572_v31, %v2569_v48 }
 0x791   : > { %4703 = vrot.lane.b32.xlu1 %v4702_v51, %s5333_s27 }
 0x792   : > { %4708 = vrot.lane.b32.xlu0 %v4707_v59, %s5333_s27 }
 0x7bf   : > { %v4422_v39 = vpop.f32.mrb[32].mxu1 }
 0x7c0   : > { %v2624_v9 = vpop.f32.mrb[33].mxu1 }
 0x7c1   : > { %v4423_v12 = vpop.f32.mrb[34].mxu1 }
 0x7c2   : > { %v4717_v2 = vpack.i.bf16 %v4423_v12, %v4422_v39  ;;  %v2627_v8 = vpop.f32.mrb[35].mxu1 }
 0x7c3   : > { %v4712_v44 = vpack.i.bf16 %v2627_v8, %v2624_v9  ;;  %v5032_v9 = vld [vmem:[#allocation2 + $0x8] sm:$0xff] }
 0x7c4   : > { %4718 = vrot.lane.b32.xlu1 %v4717_v2, %s5332_s20  ;;  %v5033_v2 = vld [vmem:[#allocation2 + $0x10] sm:$0xff] }
 0x7c5   : > { %4713 = vrot.lane.b32.xlu0 %v4712_v44, %s5332_s20  ;;  %v5034_v44 = vld [vmem:[#allocation2 + $0x18] sm:$0xff] }
 0x7e9   : > { %v4694_v10 = vpop.permute.xlu1 %4693 }
 0x7ea   : > { %v4699_v57 = vpop.permute.xlu0 %4698  ;;  %v4696_v13 = vunpack.i.h.bf16 %v4694_v10  ;;  %v4695_v49 = vunpack.i.l.bf16 %v4694_v10 }
 0x7eb   : > { %v4701_v16 = vunpack.i.h.bf16 %v4699_v57  ;;  %v4700_v17 = vunpack.i.l.bf16 %v4699_v57  ;;  %v4834_v57 = vld [vmem:[%s6736_s11] ss:$16 sps:$4 sm:$0xff]  }
 0x7ec   : > { %v2690_v21 = vsel %vm1990_vm1, %v6227_v34, %v4696_v13  ;;  %v2689_v7 = vsel %vm1990_vm1, %v6223_v28, %v4695_v49  ;;  %v4837_v13 = vld [vmem:[%s6736_s11 + $0x8] ss:$16 sps:$4 sm:$0xff]   ;;  %v4839_v49 = vld [vmem:[%s6736_s11 + $0xc] ss:$16 sps:$4 sm:$0xff]  }
 0x7ed   : > { %v2688_v54 = vsel %vm1990_vm1, %v6229_v15, %v4701_v16  ;;  %v2687_v26 = vsel %vm1990_vm1, %v6225_v25, %v4700_v17  ;;  %v4845_v16 = vld [vmem:[%s6736_s11 + $0x2c] ss:$16 sps:$4 sm:$0xff]   ;;  %3165 = vmatprep.subr.bf16.mxu0 %v4839_v49  ;;  %v4840_v17 = vld [vmem:[%s6736_s11 + $0x20] ss:$16 sps:$4 sm:$0xff]  }
 0x803   : > { %v4704_v11 = vpop.permute.xlu1 %4703 }
 0x804   : > { %v4709_v14 = vpop.permute.xlu0 %4708  ;;  %v4706_v19 = vunpack.i.h.bf16 %v4704_v11  ;;  %v4705_v33 = vunpack.i.l.bf16 %v4704_v11  ;;  %v4836_v11 = vld [vmem:[%s6736_s11 + $0x4] ss:$16 sps:$4 sm:$0xff]  }
 0x805   : > { %v4711_v43 = vunpack.i.h.bf16 %v4709_v14  ;;  %v4710_v18 = vunpack.i.l.bf16 %v4709_v14  ;;  %v4842_v14 = vld [vmem:[%s6736_s11 + $0x24] ss:$16 sps:$4 sm:$0xff]   ;;  %3112 = vmatprep.subr.bf16.mxu1 %v4836_v11 }
 0x806   : > { %v2694_v61 = vsel %vm2691_vm2, %v2689_v7, %v4705_v33  ;;  %v2695_v32 = vsel %vm2691_vm2, %v2690_v21, %v4706_v19  ;;  %3113 = vmatpush1.bf16.msra.mxu1 %v4834_v57  ;;  %v4843_v19 = vld [vmem:[%s6736_s11 + $0x28] ss:$16 sps:$4 sm:$0xff]  }
 0x807   : > { %v2692_v4 = vsel %vm2691_vm2, %v2687_v26, %v4710_v18  ;;  %v2693_v28 = vsel %vm2691_vm2, %v2688_v54, %v4711_v43  ;;  %3114 = vmatprep.subr.bf16.mxu1 %v4842_v14 }
 0x80a   : > { %3115 = vmatpush1.bf16.msra.mxu1 %v4840_v17 }
 0x836   : > { %v4719_v0 = vpop.permute.xlu1 %4718 }
 0x837   : > { %v4721_v52 = vunpack.i.h.bf16 %v4719_v0  ;;  %v4720_v1 = vunpack.i.l.bf16 %v4719_v0  ;;  %v4714_v24 = vpop.permute.xlu0 %4713 }
 0x838   : > { %v4716_v38 = vunpack.i.h.bf16 %v4714_v24  ;;  %v4715_v62 = vunpack.i.l.bf16 %v4714_v24 }
 0x839   : > { %v2700_v34 = vsel %vm2696_vm3, %v2695_v32, %v4721_v52  ;;  %v2699_v15 = vsel %vm2696_vm3, %v2694_v61, %v4720_v1 }
 0x83a   : > { %v2702_v25 = vpack.c.bf16 %v2700_v34, %v2699_v15  ;;  %v2697_v63 = vsel %vm2696_vm3, %v2692_v4, %v4715_v62  ;;  %v2698_v53 = vsel %vm2696_vm3, %v2693_v28, %v4716_v38  ;;  %v4848_v28 = vld [vmem:[%s6736_s11 + $0x44] ss:$16 sps:$4 sm:$0xff]   ;;  %v4851_v34 = vld [vmem:[%s6736_s11 + $0x4c] ss:$16 sps:$4 sm:$0xff]   ;;  %v4846_v15 = vld [vmem:[%s6736_s11 + $0x40] ss:$16 sps:$4 sm:$0xff]  }
 0x83b   : > { %v2701_v55 = vpack.c.bf16 %v2698_v53, %v2697_v63  ;;  %3116 = vmatprep.subr.bf16.mxu1 %v4848_v28  ;;  %v4854_v63 = vld [vmem:[%s6736_s11 + $0x64] ss:$16 sps:$4 sm:$0xff]   ;;  %v4857_v53 = vld [vmem:[%s6736_s11 + $0x6c] ss:$16 sps:$4 sm:$0xff]  }
 0x83c   : > { %3117 = vmatpush1.bf16.msra.mxu1 %v4846_v15 }
 0x83d   : > { %4440 = vmatprep.mubr.bf16.mxu0 %v2701_v55  ;;  %v4852_v55 = vld [vmem:[%s6736_s11 + $0x60] ss:$16 sps:$4 sm:$0xff]   ;;  %3118 = vmatprep.subr.bf16.mxu1 %v4854_v63 }
 0x83e   : > { %4441 = vmatmul.mubr.bf16.vlgmr.msra.gmra.mrb[20].mxu0 %v2702_v25  ;;  %v4849_v25 = vld [vmem:[%s6736_s11 + $0x48] ss:$16 sps:$4 sm:$0xff]  }
 0x83f   : > { %3197 = vmatprep.mubr.bf16.mxu0 %v5331_v60  ;;  %3166 = vmatpush1.bf16.msra.mxu0 %v4837_v13 }
 0x840   : > { %3167 = vmatprep.subr.bf16.mxu0 %v4845_v16  ;;  %3119 = vmatpush1.bf16.msra.mxu1 %v4852_v55 }
 0x841   : > { %3120 = vmatprep.subr.bf16.mxu1 %v4860_v23 }
 0x843   : > { %3168 = vmatpush1.bf16.msra.mxu0 %v4843_v19  ;;  %v1360_v19 = vsub.s32 5, %v5959_v36 }
 0x844   : > { %3169 = vmatprep.subr.bf16.mxu0 %v4851_v34 }
 0x847   : > { %3170 = vmatpush1.bf16.msra.mxu0 %v4849_v25 }
 0x848   : > { %3171 = vmatprep.subr.bf16.mxu0 %v4857_v53 }
 0x84b   : > { %3172 = vmatpush1.bf16.msra.mxu0 %v4855_v35 }
 0x911   : > { %v4442_v46 = vpop.f32.mrb[20].mxu0 }
 0x912   : > { %v2817_v47 = vadd.f32 %v4442_v46, %v4129_v42  ;;  %v2808_v48 = vpop.f32.mrb[21].mxu0  ;;  %v4858_v46 = vld [vmem:[%s6736_s11 + $0x80] ss:$16 sps:$4 sm:$0xff]  }
 0x913   : > { %v2809_v50 = vadd.f32 %v4129_v42, %v2808_v48  ;;  %v4443_v51 = vpop.f32.mrb[22].mxu0  ;;  %3121 = vmatpush1.bf16.msra.mxu1 %v4858_v46  ;;  %v4869_v48 = vld [vmem:[%s6736_s11 + $0xac] ss:$16 sps:$4 sm:$0xff]  }
 0x914   : > { %v2829_v31 = vmul.f32 %v2826_v20, %v2817_v47  ;;  %v2820_v58 = vadd.f32 %v4443_v51, %v4129_v42  ;;  %v2811_v59 = vpop.f32.mrb[23].mxu0  ;;  %v4866_v47 = vld [vmem:[%s6736_s11 + $0xa4] ss:$16 sps:$4 sm:$0xff]   ;;  %v4867_v51 = vld [vmem:[%s6736_s11 + $0xa8] ss:$16 sps:$4 sm:$0xff]  }
 0x915   : > { %v2827_v56 = vmul.f32 %v2826_v20, %v2809_v50  ;;  %v2812_v5 = vadd.f32 %v4129_v42, %v2811_v59  ;;  %v4863_v42 = vld [vmem:[%s6736_s11 + $0x8c] ss:$16 sps:$4 sm:$0xff]   ;;  %v4864_v50 = vld [vmem:[%s6736_s11 + $0xa0] ss:$16 sps:$4 sm:$0xff]   ;;  %3122 = vmatprep.subr.bf16.mxu1 %v4866_v47  ;;  %v4873_v59 = vld [vmem:[%s6736_s11 + $0xc8] ss:$16 sps:$4 sm:$0xff]  }
 0x916   : > { %v2830_v27 = vmul.f32 %v2826_v20, %v2820_v58  ;;  %v6280_v8 = vadd.f32 %v5033_v2, %v2829_v31  ;;  %3173 = vmatprep.subr.bf16.mxu0 %v4863_v42  ;;  %v4870_v31 = vld [vmem:[%s6736_s11 + $0xc0] ss:$16 sps:$4 sm:$0xff]   ;;  %v4872_v58 = vld [vmem:[%s6736_s11 + $0xc4] ss:$16 sps:$4 sm:$0xff]  }
 0x917   : > { %v2828_v6 = vmul.f32 %v2826_v20, %v2812_v5  ;;  %v6274_v39 = vadd.f32 %v5031_v41, %v2827_v56  ;;  %v4861_v20 = vld [vmem:[%s6736_s11 + $0x88] ss:$16 sps:$4 sm:$0xff]   ;;  %3123 = vmatpush1.bf16.msra.mxu1 %v4864_v50  ;;  %v4875_v56 = vld [vmem:[%s6736_s11 + $0xcc] ss:$16 sps:$4 sm:$0xff]   ;;  %v4878_v5 = vld [vmem:[%s6736_s11 + $0xe4] ss:$16 sps:$4 sm:$0xff]  }
 0x918   : > { %v6283_v10 = vadd.f32 %v5034_v44, %v2830_v27  ;;  %3174 = vmatpush1.bf16.msra.mxu0 %v4861_v20  ;;  %3124 = vmatprep.subr.bf16.mxu1 %v4872_v58  ;;  %v4881_v27 = vld [vmem:[%s6736_s11 + $0xec] ss:$16 sps:$4 sm:$0xff]   ;;  %v4879_v41 = vld [vmem:[%s6736_s11 + $0xe8] ss:$16 sps:$4 sm:$0xff]  }
 0x919   : > { %2835 = vadd.xlane.f32.xlu0 %v6274_v39  ;;  %v6277_v12 = vadd.f32 %v5032_v9, %v2828_v6  ;;  %3175 = vmatprep.subr.bf16.mxu0 %v4869_v48  ;;  %v4876_v6 = vld [vmem:[%s6736_s11 + $0xe0] ss:$16 sps:$4 sm:$0xff]   ;;  %v1352_v9 = vsub.s32 3, %v5959_v36  ;;  %v4882_v20 = vld [vmem:[%s5794_s5 + $0x40] sm:$0xff]   ;;  %v4890_v58 = vld [vmem:[%s5794_s5 + $0x50] sm:$0xff]  }
 0x91a   : > { %v4883_v47 = vld [vmem:[%s5794_s5 + $0xc0] sm:$0xff]   ;;  %v4886_v50 = vld [vmem:[%s5794_s5 + $0x48] sm:$0xff]  }
 0x91b   : > { %2837 = vadd.xlane.f32.xlu1 %v6277_v12  ;;  %3125 = vmatpush1.bf16.msra.mxu1 %v4870_v31  ;;  %v1353_v49 = vrot.slane %v6263_v45, %v1352_v9  ;;  %v4885_v48 = vld [vmem:[%s5794_s5 + $0x80] sm:$0xff]   ;;  %v4889_v31 = vld [vmem:[%s5794_s5 + $0x88] sm:$0xff]  }
 0x91c   : > { %3176 = vmatpush1.bf16.msra.mxu0 %v4867_v51  ;;  %3126 = vmatprep.subr.bf16.mxu1 %v4878_v5  ;;  %v4888_v51 = vld [vmem:[%s5794_s5 + $0x8] sm:$0xff]   ;;  %v4893_v5 = vld [vmem:[%s5794_s5 + $0x90] sm:$0xff]  }
 0x91d   : > { %2839 = vadd.xlane.f32.xlu0 %v6280_v8  ;;  %3177 = vmatprep.subr.bf16.mxu0 %v4875_v56  ;;  %v4892_v56 = vld [vmem:[%s5794_s5 + $0x10] sm:$0xff]  }
 0x91f   : > { %3127 = vmatpush1.bf16.msra.mxu1 %v4876_v6  ;;  %v4895_v6 = vld [vmem:[%s5794_s5 + $0xd8] sm:$0xff]  }
 0x920   : > { %3178 = vmatpush1.bf16.msra.mxu0 %v4873_v59  ;;  %4278 = vmatprep.subr.bf16.mxu1 %v4882_v20  ;;  %v4891_v59 = vld [vmem:[%s5794_s5 + $0xd0] sm:$0xff]  }
 0x921   : > { %2841 = vadd.xlane.f32.xlu0 %v6283_v10  ;;  %3179 = vmatprep.subr.bf16.mxu0 %v4881_v27  ;;  %v4894_v27 = vld [vmem:[%s5794_s5 + $0x58] sm:$0xff]  }
 0x924   : > { %3180 = vmatpush1.bf16.msra.mxu0 %v4879_v41  ;;  %v4896_v41 = vld [vmem:[%s5794_s5 + $0x18] sm:$0xff]  }
 0x925   : > { %4306 = vmatprep.subr.bf16.mxu0 %v4883_v47 }
 0x9a6   : > { %v2836_v33 = vpop.xlane.xlu0 %2835 }
 0x9a7   : > { %v2843_v43 = vmul.f32 0.0078125, %v2836_v33 }
 0x9a8   : > { %v2838_v18 = vpop.xlane.xlu1 %2837 }
 0x9a9   : > { %v6295_v21 = vsub.f32 %v6274_v39, %v2843_v43  ;;  %v2844_v7 = vmul.f32 0.0078125, %v2838_v18  ;;  %v1446_v43 = vadd.f32 %v5957_v30, %v1353_v49  ;;  %v4902_v49 = vld [vmem:[%s5794_s5 + $0x68] sm:$0xff]  }
 0x9aa   : > { %v2840_v0 = vpop.xlane.xlu0 %2839 }
 0x9ab   : > { %v6298_v54 = vsub.f32 %v6277_v12, %v2844_v7  ;;  %v2845_v26 = vmul.f32 0.0078125, %v2840_v0  ;;  %v2851_v52 = vmul.f32 %v6295_v21, %v6295_v21  ;;  %v1361_v0 = vrot.slane %v6263_v45, %v1360_v19  ;;  %v4906_v19 = vld [vmem:[%s5794_s5 + $0x70] sm:$0xff]  }
 0x9ad   : > { %v6303_v1 = vsub.f32 %v6280_v8, %v2845_v26  ;;  %2855 = vadd.xlane.f32.xlu0 %v2851_v52  ;;  %v2852_v24 = vmul.f32 %v6298_v54, %v6298_v54  ;;  %v2879_v52 = vadd.f32 1.0, %v1446_v43  ;;  %v4908_v43 = vld [vmem:[%s5794_s5 + $0x30] sm:$0xff]  }
 0x9ae   : > { %v2842_v61 = vpop.xlane.xlu0 %2841 }
 0x9af   : > { %v2846_v32 = vmul.f32 0.0078125, %v2842_v61  ;;  %2857 = vadd.xlane.f32.xlu1 %v2852_v24  ;;  %v2853_v38 = vmul.f32 %v6303_v1, %v6303_v1  ;;  %v1487_v24 = vadd.f32 %v5964_v40, %v1361_v0  ;;  %v4911_v0 = vld [vmem:[%s5794_s5 + $0xf8] sm:$0xff]  }
 0x9b1   : > { %v6310_v62 = vsub.f32 %v6283_v10, %v2846_v32  ;;  %2859 = vadd.xlane.f32.xlu0 %v2853_v38  ;;  %v2883_v32 = vrot.slane %v2879_v52, %v5970_v3  ;;  %v2891_v28 = vrot.slane %v1487_v24, %v5970_v3  ;;  %v4913_v52 = vld [vmem:[%s5794_s5 + $0xb8] sm:$0xff]  }
 0x9b2   : > { %v2930_v24 = vld [vmem:[%s5792_s6] sm:$0xf] }
 0x9b3   : > { %v2854_v4 = vmul.f32 %v6310_v62, %v6310_v62 }
 0x9b5   : > { %2861 = vadd.xlane.f32.xlu1 %v2854_v4 }
 0xa3a   : > { %v2856_v2 = vpop.xlane.xlu0 %2855 }
 0xa3b   : > { %v2863_v44 = vmul.f32 0.0078125, %v2856_v2  ;;  %v4897_v2 = vld [vmem:[%s5794_s5 + $0x98] sm:$0xff]  }
 0xa3c   : > { %v2858_v57 = vpop.xlane.xlu1 %2857 }
 0xa3d   : > { %v2867_v11 = vadd.f32 1e-06, %v2863_v44  ;;  %v2864_v13 = vmul.f32 0.0078125, %v2858_v57  ;;  %v4898_v44 = vld [vmem:[%s5794_s5 + $0x60] sm:$0xff]  }
 0xa3e   : > { %v2860_v14 = vpop.xlane.xlu0 %2859  ;;  %v4899_v57 = vld [vmem:[%s5794_s5 + $0xe0] sm:$0xff]  }
 0xa3f   : > { %4990 = vrsqrt.f32 %v2867_v11  ;;  %v2868_v16 = vadd.f32 1e-06, %v2864_v13  ;;  %v2865_v17 = vmul.f32 0.0078125, %v2860_v14  ;;  %v4900_v11 = vld [vmem:[%s5794_s5 + $0x20] sm:$0xff]   ;;  %v4903_v14 = vld [vmem:[%s5794_s5 + $0xe8] sm:$0xff]  }
 0xa40   : > { %v4901_v13 = vld [vmem:[%s5794_s5 + $0xa0] sm:$0xff]  }
 0xa41   : > { %4992 = vrsqrt.f32 %v2868_v16  ;;  %v2869_v33 = vadd.f32 1e-06, %v2865_v17  ;;  %v4904_v16 = vld [vmem:[%s5794_s5 + $0x28] sm:$0xff]  }
 0xa42   : > { %v2862_v18 = vpop.xlane.xlu1 %2861  ;;  %v4905_v17 = vld [vmem:[%s5794_s5 + $0xa8] sm:$0xff]  }
 0xa43   : > { %4994 = vrsqrt.f32 %v2869_v33  ;;  %v2866_v7 = vmul.f32 0.0078125, %v2862_v18  ;;  %v4907_v33 = vld [vmem:[%s5794_s5 + $0xf0] sm:$0xff]  }
 0xa44   : > { %v4909_v18 = vld [vmem:[%s5794_s5 + $0xb0] sm:$0xff]  }
 0xa45   : > { %v2870_v26 = vadd.f32 1e-06, %v2866_v7  ;;  %v4910_v7 = vld [vmem:[%s5794_s5 + $0x78] sm:$0xff]  }
 0xa47   : > { %4996 = vrsqrt.f32 %v2870_v26  ;;  %v4912_v26 = vld [vmem:[%s5794_s5 + $0x38] sm:$0xff]  }
 0xa49   : > { %v4991_v61 = vpop.eup %4990 }
 0xa4a   : > { %v2875_v38 = vmul.f32 %v4991_v61, %v6295_v21  ;;  %v6388_v61 = vrot.slane %v2930_v24, %v5970_v3 }
 0xa4b   : > { %v4993_v4 = vpop.eup %4992 }
 0xa4c   : > { %v2876_v30 = vmul.f32 %v4993_v4, %v6298_v54  ;;  %v2884_v34 = vmul.f32 %v2883_v32, %v2875_v38  ;;  %v6395_v38 = vrot.slane %v2930_v24, %v1352_v9  ;;  %v6398_v4 = vrot.slane %v2930_v24, %v5982_v22 }
 0xa4d   : > { %v4995_v15 = vpop.eup %4994 }
 0xa4e   : > { %v2885_v25 = vmul.f32 %v2883_v32, %v2876_v30  ;;  %v2892_v63 = vadd.f32 %v2891_v28, %v2884_v34  ;;  %v2877_v53 = vmul.f32 %v4995_v15, %v6303_v1 }
 0xa50   : > { %v2893_v55 = vadd.f32 %v2891_v28, %v2885_v25  ;;  %v2886_v40 = vmul.f32 %v2883_v32, %v2877_v53 }
 0xa51   : > { %v4997_v35 = vpop.eup %4996 }
 0xa52   : > { %v2896_v23 = vpack.c.bf16 %v2893_v55, %v2892_v63  ;;  %v2878_v21 = vmul.f32 %v4997_v35, %v6310_v62  ;;  %v2894_v42 = vadd.f32 %v2891_v28, %v2886_v40  ;;  %v4884_v62 = vld [vmem:[%s5794_s5] sm:$0xff]  }
 0xa54   : > { %3145 = vmatmul.mubr.bf16.vlgmr.msra.gmra.mrb[36].mxu1 %v2896_v23  ;;  %3198 = vmatmul.mubr.bf16.vlgmr.msra.gmra.mrb[24].mxu0 %v2896_v23  ;;  %v2887_v54 = vmul.f32 %v2883_v32, %v2878_v21  ;;  %v6391_v32 = vrot.slane %v2930_v24, %v5962_v37 }
 0xa55   : > { %3154 = vmatprep.mubr.bf16.mxu1 %v5331_v60  ;;  %3207 = vmatprep.mubr.bf16.mxu0 %v5331_v60  ;;  %v4887_v60 = vld [vmem:[%s5794_s5 + $0xc8] sm:$0xff]  }
 0xa56   : > { %v2895_v1 = vadd.f32 %v2891_v28, %v2887_v54  ;;  %4279 = vmatpush3.bf16.msra.mxu1 %v4884_v62  ;;  %4307 = vmatpush3.bf16.msra.mxu0 %v4885_v48 }
 0xa57   : > { %4280 = vmatprep.subr.bf16.mxu1 %v4886_v50  ;;  %4308 = vmatprep.subr.bf16.mxu0 %v4887_v60 }
 0xa58   : > { %v2897_v46 = vpack.c.bf16 %v2895_v1, %v2894_v42 }
 0xa5a   : > { %4281 = vmatpush3.bf16.msra.mxu1 %v4888_v51  ;;  %4309 = vmatpush3.bf16.msra.mxu0 %v4889_v31 }
 0xa5b   : > { %4282 = vmatprep.subr.bf16.mxu1 %v4890_v58  ;;  %4310 = vmatprep.subr.bf16.mxu0 %v4891_v59 }
 0xa5c   : > { %3155 = vmatmul.mubr.bf16.gmra.mrb[40].mxu1 %v2897_v46  ;;  %3208 = vmatmul.mubr.bf16.gmra.mrb[28].mxu0 %v2897_v46 }
 0xa5e   : > { %4283 = vmatpush3.bf16.msra.mxu1 %v4892_v56  ;;  %4311 = vmatpush3.bf16.msra.mxu0 %v4893_v5 }
 0xa5f   : > { %4284 = vmatprep.subr.bf16.mxu1 %v4894_v27  ;;  %4312 = vmatprep.subr.bf16.mxu0 %v4895_v6 }
 0xa62   : > { %4285 = vmatpush3.bf16.msra.mxu1 %v4896_v41  ;;  %4313 = vmatpush3.bf16.msra.mxu0 %v4897_v2 }
 0xa63   : > { %4286 = vmatprep.subr.bf16.mxu1 %v4898_v44  ;;  %4314 = vmatprep.subr.bf16.mxu0 %v4899_v57 }
 0xa66   : > { %4287 = vmatpush3.bf16.msra.mxu1 %v4900_v11  ;;  %4315 = vmatpush3.bf16.msra.mxu0 %v4901_v13 }
 0xa67   : > { %4288 = vmatprep.subr.bf16.mxu1 %v4902_v49  ;;  %4316 = vmatprep.subr.bf16.mxu0 %v4903_v14 }
 0xa6a   : > { %4289 = vmatpush3.bf16.msra.mxu1 %v4904_v16  ;;  %4317 = vmatpush3.bf16.msra.mxu0 %v4905_v17 }
 0xa6b   : > { %4290 = vmatprep.subr.bf16.mxu1 %v4906_v19  ;;  %4318 = vmatprep.subr.bf16.mxu0 %v4907_v33 }
 0xa6e   : > { %4291 = vmatpush3.bf16.msra.mxu1 %v4908_v43  ;;  %4319 = vmatpush3.bf16.msra.mxu0 %v4909_v18 }
 0xa6f   : > { %4292 = vmatprep.subr.bf16.mxu1 %v4910_v7  ;;  %4320 = vmatprep.subr.bf16.mxu0 %v4911_v0 }
 0xa72   : > { %4293 = vmatpush3.bf16.msra.mxu1 %v4912_v26  ;;  %4321 = vmatpush3.bf16.msra.mxu0 %v4913_v52 }
 0xb27   : > { %v3146_v28 = vpop.f32.mrb[36].mxu1  ;;  %v3199_v30 = vpop.f32.mrb[24].mxu0 }
 0xb28   : > { %v6401_v34 = vadd.f32 %v3146_v28, %v6388_v61  ;;  %v6404_v15 = vadd.f32 %v3199_v30, %v6391_v32  ;;  %v3148_v25 = vpop.f32.mrb[37].mxu1  ;;  %v3201_v63 = vpop.f32.mrb[25].mxu0 }
 0xb29   : > { %v6407_v37 = vadd.f32 %v3148_v25, %v6398_v4  ;;  %v6410_v36 = vadd.f32 %v3201_v63, %v6395_v38  ;;  %v3150_v9 = vpop.f32.mrb[38].mxu1  ;;  %v3203_v53 = vpop.f32.mrb[26].mxu0 }
 0xb2a   : > { %v3218_v55 = vmul.f32 %v6401_v34, %v6401_v34  ;;  %v3220_v40 = vmul.f32 %v6404_v15, %v6404_v15  ;;  %v6417_v35 = vadd.f32 %v3150_v9, %v6388_v61  ;;  %v6420_v23 = vadd.f32 %v3203_v53, %v6391_v32  ;;  %v3152_v21 = vpop.f32.mrb[39].mxu1  ;;  %v3205_v42 = vpop.f32.mrb[27].mxu0 }
 0xb2b   : > { %v3219_v54 = vmul.f32 %v6407_v37, %v6407_v37  ;;  %v3221_v1 = vmul.f32 %v6410_v36, %v6410_v36  ;;  %v6427_v46 = vadd.f32 %v3152_v21, %v6398_v4  ;;  %v6430_v20 = vadd.f32 %v3205_v42, %v6395_v38 }
 0xb2c   : > { %v3234_v47 = vmul.f32 %v3218_v55, %v6401_v34  ;;  %v3236_v62 = vmul.f32 %v3220_v40, %v6404_v15  ;;  %v3222_v48 = vmul.f32 %v6417_v35, %v6417_v35  ;;  %v3224_v50 = vmul.f32 %v6420_v23, %v6420_v23 }
 0xb2d   : > { %v3235_v60 = vmul.f32 %v3219_v54, %v6407_v37  ;;  %v3237_v51 = vmul.f32 %v3221_v1, %v6410_v36  ;;  %v3223_v31 = vmul.f32 %v6427_v46, %v6427_v46  ;;  %v3225_v58 = vmul.f32 %v6430_v20, %v6430_v20 }
 0xb2e   : > { %v3250_v59 = vmul.f32 0.044715, %v3234_v47  ;;  %v3252_v56 = vmul.f32 0.044715, %v3236_v62  ;;  %v3238_v5 = vmul.f32 %v3222_v48, %v6417_v35  ;;  %v3240_v27 = vmul.f32 %v3224_v50, %v6420_v23 }
 0xb2f   : > { %v3251_v6 = vmul.f32 0.044715, %v3235_v60  ;;  %v3253_v41 = vmul.f32 0.044715, %v3237_v51  ;;  %v3239_v2 = vmul.f32 %v3223_v31, %v6427_v46  ;;  %v3241_v44 = vmul.f32 %v3225_v58, %v6430_v20  ;;  %v3156_v57 = vpop.f32.mrb[40].mxu1  ;;  %v3209_v11 = vpop.f32.mrb[28].mxu0 }
 0xb30   : > { %v3266_v13 = vadd.f32 %v3250_v59, %v6401_v34  ;;  %v3268_v49 = vadd.f32 %v3252_v56, %v6404_v15  ;;  %v3254_v14 = vmul.f32 0.044715, %v3238_v5  ;;  %v3256_v16 = vmul.f32 0.044715, %v3240_v27  ;;  %v3158_v17 = vpop.f32.mrb[41].mxu1  ;;  %v3211_v19 = vpop.f32.mrb[29].mxu0 }
 0xb31   : > { %v3267_v33 = vadd.f32 %v3251_v6, %v6407_v37  ;;  %v3269_v43 = vadd.f32 %v3253_v41, %v6410_v36  ;;  %v3255_v18 = vmul.f32 0.044715, %v3239_v2  ;;  %v3257_v7 = vmul.f32 0.044715, %v3241_v44  ;;  %v3160_v0 = vpop.f32.mrb[42].mxu1  ;;  %v3213_v26 = vpop.f32.mrb[30].mxu0 }
 0xb32   : > { %v3282_v52 = vmul.f32 0.7978846, %v3266_v13  ;;  %v3284_v24 = vmul.f32 0.7978846, %v3268_v49  ;;  %v3270_v28 = vadd.f32 %v3254_v14, %v6417_v35  ;;  %v3272_v30 = vadd.f32 %v3256_v16, %v6420_v23  ;;  %v3162_v25 = vpop.f32.mrb[43].mxu1  ;;  %v3215_v63 = vpop.f32.mrb[31].mxu0 }
 0xb33   : > { %v3283_v9 = vmul.f32 0.7978846, %v3267_v33  ;;  %v3285_v53 = vmul.f32 0.7978846, %v3269_v43  ;;  %v3271_v55 = vadd.f32 %v3255_v18, %v6427_v46  ;;  %v3273_v40 = vadd.f32 %v3257_v7, %v6430_v20 }
 0xb34   : > { %4998 = vtanh.f32 %v3282_v52  ;;  %v3286_v21 = vmul.f32 0.7978846, %v3270_v28  ;;  %v3288_v42 = vmul.f32 0.7978846, %v3272_v30  ;;  %v6457_v54 = vadd.f32 %v3156_v57, %v6388_v61 }
 0xb35   : > { %5000 = vtanh.f32 %v3284_v24  ;;  %v3287_v1 = vmul.f32 0.7978846, %v3271_v55  ;;  %v3289_v47 = vmul.f32 0.7978846, %v3273_v40  ;;  %v6460_v62 = vadd.f32 %v3209_v11, %v6391_v32 }
 0xb36   : > { %5002 = vtanh.f32 %v3283_v9  ;;  %v3226_v48 = vmul.f32 %v6457_v54, %v6457_v54  ;;  %v6465_v50 = vadd.f32 %v3158_v17, %v6398_v4  ;;  %v6468_v60 = vadd.f32 %v3211_v19, %v6395_v38 }
 0xb37   : > { %5004 = vtanh.f32 %v3285_v53  ;;  %v3228_v51 = vmul.f32 %v6460_v62, %v6460_v62  ;;  %v6473_v31 = vadd.f32 %v3160_v0, %v6388_v61  ;;  %v6476_v58 = vadd.f32 %v3213_v26, %v6391_v32 }
 0xb38   : > { %5006 = vtanh.f32 %v3286_v21  ;;  %v3242_v59 = vmul.f32 %v3226_v48, %v6457_v54  ;;  %v3227_v56 = vmul.f32 %v6465_v50, %v6465_v50  ;;  %v3229_v5 = vmul.f32 %v6468_v60, %v6468_v60 }
 0xb39   : > { %5008 = vtanh.f32 %v3288_v42  ;;  %v3244_v27 = vmul.f32 %v3228_v51, %v6460_v62  ;;  %v3230_v6 = vmul.f32 %v6473_v31, %v6473_v31  ;;  %v3232_v61 = vmul.f32 %v6476_v58, %v6476_v58 }
 0xb3a   : > { %5010 = vtanh.f32 %v3287_v1  ;;  %v3258_v32 = vmul.f32 0.044715, %v3242_v59  ;;  %v3243_v41 = vmul.f32 %v3227_v56, %v6465_v50  ;;  %v3245_v2 = vmul.f32 %v3229_v5, %v6468_v60 }
 0xb3b   : > { %5012 = vtanh.f32 %v3289_v47  ;;  %v3260_v44 = vmul.f32 0.044715, %v3244_v27  ;;  %v3246_v57 = vmul.f32 %v3230_v6, %v6473_v31  ;;  %v3248_v11 = vmul.f32 %v3232_v61, %v6476_v58 }
 0xb3c   : > { %v3274_v13 = vadd.f32 %v3258_v32, %v6457_v54  ;;  %v3259_v49 = vmul.f32 0.044715, %v3243_v41  ;;  %v3261_v14 = vmul.f32 0.044715, %v3245_v2  ;;  %v6494_v16 = vadd.f32 %v3162_v25, %v6398_v4 }
 0xb3d   : > { %v3276_v17 = vadd.f32 %v3260_v44, %v6460_v62  ;;  %v3262_v19 = vmul.f32 0.044715, %v3246_v57  ;;  %v3264_v33 = vmul.f32 0.044715, %v3248_v11  ;;  %v6498_v43 = vadd.f32 %v3215_v63, %v6395_v38 }
 0xb3e   : > { %v4999_v18 = vpop.eup %4998  ;;  %v3290_v7 = vmul.f32 0.7978846, %v3274_v13  ;;  %v3275_v0 = vadd.f32 %v3259_v49, %v6465_v50  ;;  %v3277_v26 = vadd.f32 %v3261_v14, %v6468_v60  ;;  %v3231_v52 = vmul.f32 %v6494_v16, %v6494_v16 }
 0xb3f   : > { %v5001_v24 = vpop.eup %5000  ;;  %v3314_v28 = vadd.f32 1.0, %v4999_v18  ;;  %v3292_v4 = vmul.f32 0.7978846, %v3276_v17  ;;  %v3278_v30 = vadd.f32 %v3262_v19, %v6473_v31  ;;  %v3280_v25 = vadd.f32 %v3264_v33, %v6476_v58 }
 0xb40   : > { %v5003_v9 = vpop.eup %5002  ;;  %v3316_v53 = vadd.f32 1.0, %v5001_v24  ;;  %5014 = vtanh.f32 %v3290_v7  ;;  %v3291_v38 = vmul.f32 0.7978846, %v3275_v0  ;;  %v3293_v63 = vmul.f32 0.7978846, %v3277_v26 }
 0xb41   : > { %v5005_v55 = vpop.eup %5004  ;;  %v3330_v40 = vmul.f32 0.5, %v3314_v28  ;;  %5016 = vtanh.f32 %v3292_v4  ;;  %v3294_v21 = vmul.f32 0.7978846, %v3278_v30  ;;  %v3296_v42 = vmul.f32 0.7978846, %v3280_v25 }
 0xb42   : > { %v5007_v1 = vpop.eup %5006  ;;  %v3332_v47 = vmul.f32 0.5, %v3316_v53  ;;  %5018 = vtanh.f32 %v3291_v38  ;;  %v3247_v48 = vmul.f32 %v3231_v52, %v6494_v16  ;;  %v3233_v51 = vmul.f32 %v6498_v43, %v6498_v43 }
 0xb43   : > { %v5009_v59 = vpop.eup %5008  ;;  %v3346_v56 = vmul.f32 %v3330_v40, %v6401_v34  ;;  %v3318_v5 = vadd.f32 1.0, %v5007_v1  ;;  %5020 = vtanh.f32 %v3293_v63  ;;  %v3315_v27 = vadd.f32 1.0, %v5003_v9 }
 0xb44   : > { %v5011_v6 = vpop.eup %5010  ;;  %v3348_v61 = vmul.f32 %v3332_v47, %v6404_v15  ;;  %v3320_v32 = vadd.f32 1.0, %v5009_v59  ;;  %5022 = vtanh.f32 %v3294_v21  ;;  %v3263_v41 = vmul.f32 0.044715, %v3247_v48 }
 0xb45   : > { %v5013_v2 = vpop.eup %5012  ;;  %v3334_v44 = vmul.f32 0.5, %v3318_v5  ;;  %5024 = vtanh.f32 %v3296_v42  ;;  %v3249_v57 = vmul.f32 %v3233_v51, %v6498_v43  ;;  %v3319_v11 = vadd.f32 1.0, %v5011_v6 }
 0xb46   : > { %v3336_v13 = vmul.f32 0.5, %v3320_v32  ;;  %v3279_v49 = vadd.f32 %v3263_v41, %v6494_v16  ;;  %v3331_v14 = vmul.f32 0.5, %v3315_v27  ;;  %v3317_v34 = vadd.f32 1.0, %v5005_v55 }
 0xb47   : > { %v3350_v17 = vmul.f32 %v3334_v44, %v6417_v35  ;;  %v3265_v19 = vmul.f32 0.044715, %v3249_v57  ;;  %v3335_v33 = vmul.f32 0.5, %v3319_v11  ;;  %v3321_v18 = vadd.f32 1.0, %v5013_v2 }
 0xb48   : > { %v3352_v15 = vmul.f32 %v3336_v13, %v6420_v23  ;;  %v3295_v7 = vmul.f32 0.7978846, %v3279_v49  ;;  %v3347_v0 = vmul.f32 %v3331_v14, %v6407_v37  ;;  %v3333_v26 = vmul.f32 0.5, %v3317_v34 }
 0xb49   : > { %v3362_v52 = vpack.c.bf16 %v3350_v17, %v3346_v56  ;;  %v3281_v24 = vadd.f32 %v3265_v19, %v6498_v43  ;;  %v3351_v28 = vmul.f32 %v3335_v33, %v6427_v46  ;;  %v3337_v4 = vmul.f32 0.5, %v3321_v18 }
 0xb4a   : > { %v5015_v30 = vpop.eup %5014  ;;  %v3364_v25 = vpack.c.bf16 %v3352_v15, %v3348_v61  ;;  %5026 = vtanh.f32 %v3295_v7  ;;  %v3349_v35 = vmul.f32 %v3333_v26, %v6410_v36  ;;  %v1345_v33 = vrot.slane %v6263_v45, %v5982_v22 }
 0xb4b   : > { %v5017_v9 = vpop.eup %5016  ;;  %v3297_v53 = vmul.f32 0.7978846, %v3281_v24  ;;  %v3363_v38 = vpack.c.bf16 %v3351_v28, %v3347_v0  ;;  %v3353_v23 = vmul.f32 %v3337_v4, %v6430_v20  ;;  %v3322_v63 = vadd.f32 1.0, %v5015_v30 }
 0xb4c   : > { %v5019_v55 = vpop.eup %5018  ;;  %v3324_v37 = vadd.f32 1.0, %v5017_v9  ;;  %v1405_v15 = vadd.f32 %v5955_v29, %v1345_v33 }
 0xb4d   : > { %v5021_v40 = vpop.eup %5020  ;;  %5028 = vtanh.f32 %v3297_v53  ;;  %3665 = vmatprep.mubr.bf16.mxu1 %v3363_v38  ;;  %v3365_v21 = vpack.c.bf16 %v3353_v23, %v3349_v35  ;;  %v3338_v47 = vmul.f32 0.5, %v3322_v63  ;;  %v3323_v51 = vadd.f32 1.0, %v5019_v55 }
 0xb4e   : > { %v5023_v42 = vpop.eup %5022  ;;  %3666 = vmatmul.mubr.bf16.vlgmr.msra.gmra.mrb[44].mxu1 %v3362_v52  ;;  %v3340_v48 = vmul.f32 0.5, %v3324_v37  ;;  %v3325_v6 = vadd.f32 1.0, %v5021_v40  ;;  %v3734_v22 = vrot.slane %v1405_v15, %v5970_v3 }
 0xb4f   : > { %v5025_v46 = vpop.eup %5024  ;;  %3714 = vmatprep.mubr.bf16.mxu0 %v3365_v21  ;;  %v3326_v1 = vadd.f32 1.0, %v5023_v42  ;;  %v3354_v20 = vmul.f32 %v3338_v47, %v6457_v54  ;;  %v3339_v2 = vmul.f32 0.5, %v3323_v51 }
 0xb50   : > { %3715 = vmatmul.mubr.bf16.vlgmr.msra.gmra.mrb[32].mxu0 %v3364_v25  ;;  %v3328_v36 = vadd.f32 1.0, %v5025_v46  ;;  %v3356_v61 = vmul.f32 %v3340_v48, %v6460_v62  ;;  %v3341_v14 = vmul.f32 0.5, %v3325_v6 }
 0xb51   : > { %v3342_v59 = vmul.f32 0.5, %v3326_v1  ;;  %v3355_v34 = vmul.f32 %v3339_v2, %v6465_v50  ;;  %v4170_v50 = vld [vmem:[%s873_s14] ss:$0 sm:$0xff] }
 0xb52   : > { %v3344_v56 = vmul.f32 0.5, %v3328_v36  ;;  %v3357_v19 = vmul.f32 %v3341_v14, %v6468_v60 }
 0xb53   : > { %v3358_v5 = vmul.f32 %v3342_v59, %v6473_v31 }
 0xb54   : > { %v5027_v27 = vpop.eup %5026  ;;  %v3360_v32 = vmul.f32 %v3344_v56, %v6476_v58 }
 0xb55   : > { %v3327_v41 = vadd.f32 1.0, %v5027_v27  ;;  %v3366_v44 = vpack.c.bf16 %v3358_v5, %v3354_v20 }
 0xb56   : > { %v3368_v57 = vpack.c.bf16 %v3360_v32, %v3356_v61 }
 0xb57   : > { %v5029_v11 = vpop.eup %5028  ;;  %v3343_v13 = vmul.f32 0.5, %v3327_v41 }
 0xb58   : > { %v3329_v49 = vadd.f32 1.0, %v5029_v11 }
 0xb59   : > { %v3359_v54 = vmul.f32 %v3343_v13, %v6494_v16 }
 0xb5a   : > { %v3345_v31 = vmul.f32 0.5, %v3329_v49 }
 0xb5b   : > { %v3367_v17 = vpack.c.bf16 %v3359_v54, %v3355_v34 }
 0xb5c   : > { %v3361_v62 = vmul.f32 %v3345_v31, %v6498_v43 }
 0xb5d   : > { %3673 = vmatprep.mubr.bf16.mxu1 %v3367_v17 }
 0xb5e   : > { %v3369_v58 = vpack.c.bf16 %v3361_v62, %v3357_v19  ;;  %3674 = vmatmul.mubr.bf16.gmra.mrb[48].mxu1 %v3366_v44 }
 0xb60   : > { %3722 = vmatprep.mubr.bf16.mxu0 %v3369_v58 }
 0xb61   : > { %3723 = vmatmul.mubr.bf16.gmra.mrb[36].mxu0 %v3368_v57 }
 0xc21   : > { %v4294_v18 = vpop.f32.mrb[44].mxu1 }
 0xc22   : > { %v4295_v16 = vpop.f32.mrb[45].mxu1 }
 0xc23   : > { %v4322_v60 = vpop.f32.mrb[32].mxu0  ;;  %v4296_v7 = vadd.f32 %v4295_v16, %v4294_v18  ;;  %v4297_v43 = vpop.f32.mrb[46].mxu1 }
 0xc24   : > { %v4323_v0 = vpop.f32.mrb[33].mxu0  ;;  %v4298_v26 = vpop.f32.mrb[47].mxu1 }
 0xc25   : > { %v3668_v52 = vadd.f32 %v4296_v7, %v4170_v50  ;;  %v4324_v24 = vadd.f32 %v4323_v0, %v4322_v60  ;;  %v4325_v28 = vpop.f32.mrb[34].mxu0  ;;  %v4299_v4 = vadd.f32 %v4298_v26, %v4297_v43 }
 0xc26   : > { %v4326_v30 = vpop.f32.mrb[35].mxu0 }
 0xc27   : > { %v3717_v45 = vadd.f32 %v4324_v24, %v3668_v52  ;;  %v3671_v25 = vadd.f32 %v4299_v4, %v4170_v50  ;;  %v4327_v35 = vadd.f32 %v4326_v30, %v4325_v28 }
 0xc29   : > { %v3735_v9 = vmul.f32 %v3734_v22, %v3717_v45  ;;  %v3720_v53 = vadd.f32 %v4327_v35, %v3671_v25 }
 0xc2b   : > { %v3739_v38 = vadd.f32 %v3735_v9, %v6274_v39  ;;  %v3736_v29 = vmul.f32 %v3734_v22, %v3720_v53 }
 0xc2d   : > { %3743 = vst [vmem:[#allocation2] sm:$0xff] %v3739_v38  ;;  %v3740_v23 = vadd.f32 %v3736_v29, %v6277_v12 }
 0xc2f   : > { %3744 = vst [vmem:[#allocation2 + $0x8] sm:$0xff] %v3740_v23 }
 0xc31   : > { %v4300_v63 = vpop.f32.mrb[48].mxu1 }
 0xc32   : > { %v4301_v55 = vpop.f32.mrb[49].mxu1 }
 0xc33   : > { %v4302_v37 = vadd.f32 %v4301_v55, %v4300_v63  ;;  %v4303_v40 = vpop.f32.mrb[50].mxu1 }
 0xc34   : > { %v4328_v21 = vpop.f32.mrb[36].mxu0  ;;  %v4304_v42 = vpop.f32.mrb[51].mxu1 }
 0xc35   : > { %v3676_v46 = vadd.f32 %v4302_v37, %v4170_v50  ;;  %v4329_v3 = vpop.f32.mrb[37].mxu0  ;;  %v4305_v1 = vadd.f32 %v4304_v42, %v4303_v40 }
 0xc36   : > { %v4330_v47 = vadd.f32 %v4329_v3, %v4328_v21  ;;  %v4331_v36 = vpop.f32.mrb[38].mxu0 }
 0xc37   : > { %v3679_v48 = vadd.f32 %v4305_v1, %v4170_v50  ;;  %v4332_v51 = vpop.f32.mrb[39].mxu0 }
 0xc38   : > { %v3725_v59 = vadd.f32 %v4330_v47, %v3676_v46  ;;  %v4333_v39 = vadd.f32 %v4332_v51, %v4331_v36 }
 0xc3a   : > { %v3737_v56 = vmul.f32 %v3734_v22, %v3725_v59  ;;  %v3728_v20 = vadd.f32 %v4333_v39, %v3679_v48  ;;  %3750 = sbr.rel (%p4203_p7) target bundleno = 3137 (0xc41), region = 120 }
 0xc3c   : > { %v3741_v12 = vadd.f32 %v3737_v56, %v6280_v8  ;;  %v3738_v5 = vmul.f32 %v3734_v22, %v3728_v20 }
 0xc3e   : > { %3745 = vst [vmem:[#allocation2 + $0x10] sm:$0xff] %v3741_v12  ;;  %v3742_v27 = vadd.f32 %v3738_v5, %v6283_v10  ;;  %3751 = vst [vmem:[%s5796_s19] sm:$0xff] (!%p4203_p7), %v3741_v12 }
 0xc40   : > { %3746 = vst [vmem:[#allocation2 + $0x18] sm:$0xff] %v3742_v27  ;;  %3752 = vst [vmem:[%s5796_s19 + $0x8] sm:$0xff] (!%p4203_p7), %v3742_v27 }
 0xc41 PF: > { %s6739_s14 = sld [smem:[#allocation23_spill]]  ;;  %s6740_s0 = sld [smem:[#allocation18_spill]] }
 0xc42   : > { %s6741_s9 = sld [smem:[#allocation31_spill]]  ;;  %s6742_s30 = sld [smem:[#allocation52_spill]] }
 0xc43   : > { %s3767_s3 = sshll.u32 %s5796_s19, 4  ;;  %s5335_s18 = smov [#allocation12]   ;;  %s6551_s3 = int_to_ptr.vmem [resolvable:$true] %s3767_s3 }
 0xc44   : > { %s5185_s27 = scalar_lea.vmem %s6551_s3, 256  ;;  %s5189_s1 = sshll.u32 %s5335_s18, 4  ;;  %s5190_s1 = int_to_ptr.vmem [resolvable:$false] %s5189_s1 }
 0xc45   : > { %p5186_p10 = scmp.ne.s32.totalorder %s6551_s3, %s5185_s27  ;;  %s5191_s2 = scalar_lea.vmem %s5190_s1, 512 }
 0xc46   : > { %p5192_p3 = scmp.lt.s32.totalorder %s6551_s3, %s5190_s1  ;;  %p5193_p9 = scmp.lt.s32.totalorder %s5191_s2, %s5185_s27 }
 0xc47   : > { %s4213_s15 = sshll.u32 %s6739_s14, 8  ;;  %s6744_s13 = sand.u32 1, %s6740_s0  }
 0xc48   : > { %s6743_s24 = smov %s6742_s30  ;;  %s6548_s23 = scalar_lea.hbm %s6742_s30, %s4213_s15 }
 0xc49   : > { %s6555_s20 = scalar_lea.sflag [#allocation5], %s6744_s13  ;;  %p6745_p5 = scmp.ne.s32.totalorder %s6741_s9, 0 }
 0xc4a   : > { %p5194_p4 = por %p5193_p9, %p5192_p3 }
 0xc4b   : > { %p5187_p11 = pnand %p5186_p10, %p6745_p5 }
 0xc4d   : > { %p5188_p2 = pneg %p5187_p11 }
 0xc4f   : > { %p5195_p1 = pnand %p5194_p4, %p5188_p2 }
 0xc51   : > { %5198 = shalt.err (!%p5195_p1)
}
 0xc52   : > { %s5199_s19 = scalar_lea.hbm %s6548_s23, 256  ;;  %s5203_s8 = scalar_lea.hbm %s6743_s24, 512 }
 0xc53   : > { %p5200_p6 = scmp.ne.s32.totalorder %s6548_s23, %s5199_s19  ;;  %p5204_p12 = scmp.lt.u32.totalorder %s6548_s23, %s6743_s24 }
 0xc54   : > { %p5205_p13 = scmp.lt.u32.totalorder %s5203_s8, %s5199_s19  ;;  %p5207_p10 = scmp.lt.u32.totalorder %s5199_s19, %s6548_s23 }
 0xc55   : > { %p5201_p0 = pnand %p5200_p6, %p6745_p5 }
 0xc56   : > { %p5206_p7 = por %p5205_p13, %p5204_p12 }
 0xc57   : > { %p5202_p8 = pneg %p5201_p0 }
 0xc58   : > { %p5208_p11 = por %p5207_p10, %p5206_p7 }
 0xc5a   : > { %p5209_p2 = pnand %p5208_p11, %p5202_p8 }
 0xc5c   : > { %5212 = shalt.err (!%p5209_p2)
}
 0xc5d   : > { %s5336_s11 = smov 128   ;;  %s5337_s12 = smov 8  }
 0xc5e   : > { %4472 = dma.vmem_to_hbm [thread:$0]  (%p6745_p5), %s6551_s3, 256, %s6548_s23, %s6555_s20, %s5336_s11, %s5336_s11, %s5337_s12  }
 0xc5f PF: > { %s6746_s6 = sld [smem:[#allocation26_spill]]  ;;  %s6747_s5 = sld [smem:[#allocation17_spill]] }
 0xc60   : > { %s6748_s17 = sld [smem:[#allocation32_spill]] }
 0xc65   : > { %p4495_p3 = scmp.ge.s32.totalorder %s6746_s6, 2  ;;  %s3782_s14 = sand.u32 1, %s6747_s5  }
 0xc66   : > { %p6749_p9 = scmp.ne.s32.totalorder %s6748_s17, 0  ;;  %s3783_s0 = scalar_lea.sflag [#allocation5], %s3782_s14 }
 0xc68   : > { %p4491_p4 = pnand %p4495_p3, %p6749_p9 }
 0xc6a   : > { %5270 = dma.done.wait (!%p4491_p4), %s3783_s0, 256  }
 0xc6b   : > { %5272 = vsyncadd (!%p4491_p4), %s3783_s0, 4294967040  ;;  %s40_s2 = sadd.s32 1, %s6746_s6   ;;  %s6750_s27 = sld [smem:[#allocation18_spill]] }
 0xc6c   : > { %p37_p1 = scmp.ge.s32.totalorder %s40_s2, 6   ;;  %s6751_s28 = sld [smem:[#allocation19_spill]] }
 0xc6d   : > { %s6752_s29 = sld [smem:[#allocation30_spill]]  ;;  %s6753_s30 = sld [smem:[#allocation20_spill]] }
 0xc6e   : > { %s6754_s0 = sld [smem:[#allocation21_spill]]  ;;  %s6755_s19 = sld [smem:[#allocation29_spill]] }
 0xc6f   : > { %s6756_s1 = sld [smem:[#allocation24_spill]]  ;;  %s6757_s20 = sld [smem:[#allocation25_spill]] }
 0xc70   : > { %s6758_s21 = sld [smem:[#allocation27_spill]]  ;;  %s6759_s22 = sld [smem:[#allocation28_spill]] }
 0xc71   :  { %39 = sbr.rel (!%p37_p1) target bundleno = 33 (0x21), region = 214 }
 0xc78   :  { %3788 = vsyncpa [#allocation4], 1 }
 0xc79   :  { %3790 = vsyncpa [#allocation4 + $0x1], 1 }
 0xc7a   :  { %3791 = vsyncpa [#allocation7], 1 }
 0xc7b   :  { %3793 = vsyncpa [#allocation7 + $0x1], 1 }
 0xc7c   :  { %3794 = vsyncpa [#allocation10], 1 }
 0xc7d   :  { %3796 = vsyncpa [#allocation10 + $0x1], 1 }
 0xc7e   :  { %3797 = vsyncpa [#allocation5], 1 }
 0xc7f   :  { %3799 = vsyncpa [#allocation5 + $0x1], 1 }

</bundles_post_ra>
